<compile_context>
chip_gen: v7x
topology: tpu7x:2x2x1
jax: 0.10.0
libtpu: 0.0.40
codegen_flags: <defaults>
</compile_context>

<pallas_src>
import jax
import jax.numpy as jnp
from jax.experimental import pallas as pl
from jax.experimental.pallas import tpu as pltpu

# ---------------- config ----------------
B = 2            # batch
S = 8            # sequence length
H = 32           # bert hidden size
NH = 2           # attention heads
DH = H // NH     # head dim
FF = 64          # ffn intermediate
L = 2            # encoder layers
VOCAB = 64
MAXPOS = 16
C = 16           # GATv2 out channels
N_NODES = 8      # nodes per AMR graph
NUM_CLASSES = 3
NUM_GRAPHS = 2 * B            # B premise + B hypothesis graphs
GN = NUM_GRAPHS * N_NODES     # total graph nodes
T = B * S                     # total tokens
CLS_IN = H + 2 * C
OUT_PAD = 128                 # lane-dense padded classifier width

f32 = jnp.float32
bf16 = jnp.bfloat16


# ---------------- the fused Pallas kernel (grid over encoder layers) ----------------

def _model_kernel(
    xemb_ref, maskb_ref, embg_ref, embb_ref,
    wq_ref, bq_ref, wk_ref, bk_ref, wv_ref, bv_ref,
    wo_ref, bo_ref, ln1g_ref, ln1b_ref,
    w1_ref, b1_ref, w2_ref, b2_ref, ln2g_ref, ln2b_ref,
    gx_ref, adj_ref, mean_ref, wl_ref, bl_ref, wr_ref, br_ref,
    gatt_ref, gbias_ref, clswt_ref, clswp_ref, clswh_ref, clsb_ref,
    out_ref,
    x_scr,
):
    l = pl.program_id(0)
    last = pl.num_programs(0) - 1

    def ln(v, g, b, eps=1e-12):
        mu = jnp.mean(v, axis=-1, keepdims=True)
        var = jnp.mean(jnp.square(v - mu), axis=-1, keepdims=True)
        return (v - mu) * jax.lax.rsqrt(var + eps) * g + b

    def softmax_last(s):
        s = s - jnp.max(s, axis=-1, keepdims=True)
        p = jnp.exp(s)
        return p * pl.reciprocal(jnp.sum(p, axis=-1, keepdims=True), approx=True)

    # ---- embedding LayerNorm only on the first grid step ----
    @pl.when(l == 0)
    def _():
        x_scr[...] = ln(xemb_ref[...], embg_ref[...], embb_ref[...])

    # ---- encoder layer `l` (weights streamed per grid step) ----
    x = x_scr[...]                                  # [T, H] f32 residual stream
    xb = x.astype(bf16)
    maskb = maskb_ref[...]                          # [B, S, S] additive bias (pre-broadcast)

    wq = wq_ref[0]; wk = wk_ref[0]; wv = wv_ref[0]; wo = wo_ref[0]   # [NH, ...] bf16
    bq = bq_ref[0]; bk = bk_ref[0]; bv = bv_ref[0]                    # [NH, 1, DH] f32

    attn_acc = jnp.zeros((T, H), f32)
    for h in range(NH):   # static unroll; weights indexed per head -> no activation lane slicing
        q = (jnp.dot(xb, wq[h], preferred_element_type=f32) + bq[h]).reshape(B, S, DH)
        k = (jnp.dot(xb, wk[h], preferred_element_type=f32) + bk[h]).reshape(B, S, DH)
        v = (jnp.dot(xb, wv[h], preferred_element_type=f32) + bv[h]).reshape(B, S, DH)
        s = jnp.einsum('bqd,bkd->bqk', q.astype(bf16), k.astype(bf16),
                       preferred_element_type=f32)                  # [B, S, S]
        p = softmax_last(s + maskb)                                  # scale folded into wq/bq
        ctx = jnp.einsum('bqk,bkd->bqd', p.astype(bf16), v.astype(bf16),
                         preferred_element_type=f32)                 # [B, S, DH]
        attn_acc = attn_acc + jnp.dot(ctx.reshape(T, DH).astype(bf16), wo[h],
                                      preferred_element_type=f32)    # merge-heads w/o concat

    x = ln(x + attn_acc + bo_ref[0], ln1g_ref[0], ln1b_ref[0])

    hid = jnp.dot(x.astype(bf16), w1_ref[0], preferred_element_type=f32) + b1_ref[0]
    # TODO(synk): HF BERT uses exact erf-GELU; tanh-approx GELU used here (EUP-friendly).
    hid = jax.nn.gelu(hid, approximate=True)
    ffn = jnp.dot(hid.astype(bf16), w2_ref[0], preferred_element_type=f32) + b2_ref[0]
    x = ln(x + ffn, ln2g_ref[0], ln2b_ref[0])
    x_scr[...] = x

    # ---- last grid step: batched GATv2 over all graphs + classifier ----
    @pl.when(l == last)
    def _():
        gxb = gx_ref[...].astype(bf16)                                      # [GN, H]
        xl = jnp.dot(gxb, wl_ref[...], preferred_element_type=f32) + bl_ref[...]   # [GN, C]
        xr = jnp.dot(gxb, wr_ref[...], preferred_element_type=f32) + br_ref[...]   # [GN, C]
        att = gatt_ref[...]                                                 # [1, C] f32

        sc = xr[:, None, :] + xl[None, :, :]                                # [GN, GN, C]
        sc = jnp.where(sc > 0, sc, 0.2 * sc)                                # LeakyReLU(0.2)
        # TODO(synk): at production C (=256) move this reduction onto the MXU
        # ([GN*GN, C] @ att^T); at C=16 the cross-lane reduce is cheaper than the
        # relayout the [GN*GN,1]->[GN,GN] reshape would cost.
        e = jnp.sum(sc * att[None, :, :], axis=-1)                          # [GN, GN]

        adj = adj_ref[...]                                                  # block-diagonal
        e = jnp.where(adj > 0, e, -1e30)                                    # connectivity mask
        e = e - jnp.max(e, axis=-1, keepdims=True)
        pg = jnp.exp(e)
        denom = jnp.maximum(jnp.sum(pg, axis=-1, keepdims=True), 1e-20)     # all-zero-row guard
        pg = pg * pl.reciprocal(denom, approx=True)
        hg = jnp.dot(pg.astype(bf16), xl.astype(bf16),
                     preferred_element_type=f32) + gbias_ref[...]            # [GN, C]
        means = jnp.dot(mean_ref[...], hg.astype(bf16),
                        preferred_element_type=f32)                          # [G, C] readout (MXU)

        # classifier: [CLS | premise | hypothesis] @ Wcls + b, concat-free, single store
        cls = jnp.concatenate([x[b * S:b * S + 1, :] for b in range(B)], axis=0)  # [B, H]
        logits = (jnp.dot(cls.astype(bf16), clswt_ref[...], preferred_element_type=f32)
                  + jnp.dot(means[:B].astype(bf16), clswp_ref[...],
                            preferred_element_type=f32)
                  + jnp.dot(means[B:].astype(bf16), clswh_ref[...],
                            preferred_element_type=f32)
                  + clsb_ref[...])                                            # [B, 128]
        out_ref[...] = logits                                                 # lane-dense store


# ---------------- parameter packing (layout plumbing, done once) ----------------

def pack_params(p):
    """Stack per-layer weights, split per-head, fold 1/sqrt(DH) into wq/bq, cast to bf16."""
    scale = 1.0 / (DH ** 0.5)

    def stack(fn):
        return jnp.stack([fn(lyr) for lyr in p['layers']], axis=0)

    def heads_w(w):     # [H, H] -> [NH, H, DH]  (output columns split per head)
        return jnp.transpose(w.reshape(H, NH, DH), (1, 0, 2))

    def heads_b(b):     # [H]    -> [NH, 1, DH]
        return b.reshape(NH, 1, DH)

    layer = dict(
        wq=stack(lambda l: heads_w(l['wq'] * scale)).astype(bf16),
        bq=stack(lambda l: heads_b(l['bq'] * scale)),
        wk=stack(lambda l: heads_w(l['wk'])).astype(bf16),
        bk=stack(lambda l: heads_b(l['bk'])),
        wv=stack(lambda l: heads_w(l['wv'])).astype(bf16),
        bv=stack(lambda l: heads_b(l['bv'])),
        wo=stack(lambda l: l['wo'].reshape(NH, DH, H)).astype(bf16),
        bo=stack(lambda l: l['bo'][None, :]),
        ln1g=stack(lambda l: l['ln1_g'][None, :]),
        ln1b=stack(lambda l: l['ln1_b'][None, :]),
        w1=stack(lambda l: l['w1']).astype(bf16),
        b1=stack(lambda l: l['b1'][None, :]),
        w2=stack(lambda l: l['w2']).astype(bf16),
        b2=stack(lambda l: l['b2'][None, :]),
        ln2g=stack(lambda l: l['ln2_g'][None, :]),
        ln2b=stack(lambda l: l['ln2_b'][None, :]),
    )
    gat = p['gat']
    clsw_pad = jnp.zeros((CLS_IN, OUT_PAD), f32).at[:, :NUM_CLASSES].set(p['cls_w'])
    clsb_pad = jnp.zeros((1, OUT_PAD), f32).at[0, :NUM_CLASSES].set(p['cls_b'])
    other = dict(
        embg=p['emb_ln_g'][None, :], embb=p['emb_ln_b'][None, :],
        wl=gat['wl'].astype(bf16), bl=gat['bl'][None, :],
        wr=gat['wr'].astype(bf16), br=gat['br'][None, :],
        gatt=gat['att'][None, :], gbias=gat['bias'][None, :],
        clswt=clsw_pad[0:H].astype(bf16),
        clswp=clsw_pad[H:H + C].astype(bf16),
        clswh=clsw_pad[H + C:].astype(bf16),
        clsb=clsb_pad,
    )
    return layer, other


# ---------------- model wrapper ----------------

@jax.jit
def forward(params, input_ids, attention_mask, premise_graphs, hypothesis_graphs):
    # TODO(synk): embedding lookup (gather) stays in plain JAX; no clean dense Pallas form.
    we = params['word_emb'][input_ids]                                 # [B, S, H]
    pe = params['pos_emb'][:S][None, :, :]
    te = params['type_emb'][0][None, None, :]                          # token_type_ids = 0
    xemb = (we + pe + te).reshape(T, H).astype(f32)

    # hoisted mask broadcast: built once here, added once per layer in-kernel
    mask_bias = (1.0 - attention_mask.astype(f32)) * -1e9              # [B, S]
    maskb = jnp.broadcast_to(mask_bias[:, None, :], (B, S, S))

    graphs = list(premise_graphs) + list(hypothesis_graphs)            # G = 2*B graphs
    gx = jnp.concatenate([g[0] for g in graphs], axis=0)               # [GN, H]
    adj = jnp.zeros((GN, GN), f32)                                     # block-diagonal adjacency
    for i, (_, a) in enumerate(graphs):
        adj = adj.at[i * N_NODES:(i + 1) * N_NODES,
                     i * N_NODES:(i + 1) * N_NODES].set(a)
    mean_mat = (jnp.repeat(jnp.eye(NUM_GRAPHS, dtype=f32), N_NODES, axis=1)
                / N_NODES).astype(bf16)                                # [G, GN] readout matrix

    layer, other = pack_params(params)

    const_pre = (xemb, maskb, other['embg'], other['embb'])
    layer_args = (layer['wq'], layer['bq'], layer['wk'], layer['bk'],
                  layer['wv'], layer['bv'], layer['wo'], layer['bo'],
                  layer['ln1g'], layer['ln1b'], layer['w1'], layer['b1'],
                  layer['w2'], layer['b2'], layer['ln2g'], layer['ln2b'])
    const_post = (gx, adj, mean_mat, other['wl'], other['bl'], other['wr'],
                  other['br'], other['gatt'], other['gbias'],
                  other['clswt'], other['clswp'], other['clswh'], other['clsb'])
    args = const_pre + layer_args + const_post

    def _const_spec(a):   # whole array, same block every step (no re-DMA across the grid)
        z = (0,) * a.ndim
        return pl.BlockSpec(a.shape, lambda l, _z=z: _z)

    def _layer_spec(a):   # stream one layer's slice per grid step
        blk = (1,) + a.shape[1:]
        z = (0,) * (a.ndim - 1)
        return pl.BlockSpec(blk, lambda l, _z=z: (l,) + _z)

    in_specs = ([_const_spec(a) for a in const_pre]
                + [_layer_spec(a) for a in layer_args]
                + [_const_spec(a) for a in const_post])

    grid_spec = pltpu.PrefetchScalarGridSpec(
        num_scalar_prefetch=0,
        grid=(L,),
        in_specs=in_specs,
        out_specs=pl.BlockSpec((B, OUT_PAD), lambda l: (0, 0)),
        scratch_shapes=[pltpu.VMEM((T, H), f32)],       # persistent residual stream
    )

    padded = pl.pallas_call(
        _model_kernel,
        out_shape=jax.ShapeDtypeStruct((B, OUT_PAD), f32),
        grid_spec=grid_spec,
        compiler_params=pltpu.CompilerParams(
            dimension_semantics=("arbitrary",),
            vmem_limit_bytes=64 * 1024 * 1024),
    )(*args)
    return padded[:, :NUM_CLASSES]


# ---------------- deterministic parameter / input construction ----------------

def init_params(key):
    keys = iter(jax.random.split(key, 128))

    def nrm(shape, scale=0.02):
        return scale * jax.random.normal(next(keys), shape, f32)

    p = {
        'word_emb': nrm((VOCAB, H)),
        'pos_emb': nrm((MAXPOS, H)),
        'type_emb': nrm((2, H)),
        'emb_ln_g': jnp.ones((H,), f32),
        'emb_ln_b': jnp.zeros((H,), f32),
        'layers': [],
    }
    for _ in range(L):
        p['layers'].append(dict(
            wq=nrm((H, H)), bq=jnp.zeros((H,), f32),
            wk=nrm((H, H)), bk=jnp.zeros((H,), f32),
            wv=nrm((H, H)), bv=jnp.zeros((H,), f32),
            wo=nrm((H, H)), bo=jnp.zeros((H,), f32),
            ln1_g=jnp.ones((H,), f32), ln1_b=jnp.zeros((H,), f32),
            w1=nrm((H, FF)), b1=jnp.zeros((FF,), f32),
            w2=nrm((FF, H)), b2=jnp.zeros((H,), f32),
            ln2_g=jnp.ones((H,), f32), ln2_b=jnp.zeros((H,), f32),
        ))
    p['gat'] = dict(
        wl=nrm((H, C), 0.1), bl=jnp.zeros((C,), f32),
        wr=nrm((H, C), 0.1), br=jnp.zeros((C,), f32),
        att=nrm((C,), 0.1), bias=jnp.zeros((C,), f32),
    )
    p['cls_w'] = nrm((CLS_IN, NUM_CLASSES))
    p['cls_b'] = jnp.zeros((NUM_CLASSES,), f32)
    return p


def make_graph(key):
    """One AMR graph: node features [N, H] and dense adjacency (chain + self loops)."""
    x = jax.random.normal(key, (N_NODES, H), f32)
    adj = jnp.eye(N_NODES, dtype=f32)                          # add_self_loops=True
    src = jnp.arange(N_NODES - 1)
    adj = adj.at[src + 1, src].set(1.0)                        # edges i -> i+1
    adj = adj.at[0, N_NODES - 1].set(1.0)                      # one back edge
    return x, adj


if __name__ == "__main__":
    root = jax.random.PRNGKey(0)
    k_param, k_ids, kg0, kg1, kg2, kg3 = jax.random.split(root, 6)

    params = init_params(k_param)

    input_ids = jax.random.randint(k_ids, (B, S), 0, VOCAB, dtype=jnp.int32)
    attention_mask = jnp.ones((B, S), jnp.int32).at[1, S - 2:].set(0)

    premise_graphs = [make_graph(kg0), make_graph(kg1)]
    hypothesis_graphs = [make_graph(kg2), make_graph(kg3)]

    logits = forward(params, input_ids, attention_mask,
                     premise_graphs, hypothesis_graphs)
    logits = jax.block_until_ready(logits)

    assert logits.shape == (B, NUM_CLASSES), logits.shape
    assert bool(jnp.all(jnp.isfinite(logits)))
    print("KERNEL_OK")
</pallas_src>

<mosaic_0001>
module attributes {stable_mosaic.version = 11 : i64} {
  func.func @_model_kernel(%arg0: i32, %arg1: memref<16x32xf32, #tpu.memory_space<vmem>>, %arg2: memref<2x8x8xf32, #tpu.memory_space<vmem>>, %arg3: memref<1x32xf32, #tpu.memory_space<vmem>>, %arg4: memref<1x32xf32, #tpu.memory_space<vmem>>, %arg5: memref<1x2x32x16xbf16, #tpu.memory_space<vmem>>, %arg6: memref<1x2x1x16xf32, #tpu.memory_space<vmem>>, %arg7: memref<1x2x32x16xbf16, #tpu.memory_space<vmem>>, %arg8: memref<1x2x1x16xf32, #tpu.memory_space<vmem>>, %arg9: memref<1x2x32x16xbf16, #tpu.memory_space<vmem>>, %arg10: memref<1x2x1x16xf32, #tpu.memory_space<vmem>>, %arg11: memref<1x2x16x32xbf16, #tpu.memory_space<vmem>>, %arg12: memref<1x1x32xf32, #tpu.memory_space<vmem>>, %arg13: memref<1x1x32xf32, #tpu.memory_space<vmem>>, %arg14: memref<1x1x32xf32, #tpu.memory_space<vmem>>, %arg15: memref<1x32x64xbf16, #tpu.memory_space<vmem>>, %arg16: memref<1x1x64xf32, #tpu.memory_space<vmem>>, %arg17: memref<1x64x32xbf16, #tpu.memory_space<vmem>>, %arg18: memref<1x1x32xf32, #tpu.memory_space<vmem>>, %arg19: memref<1x1x32xf32, #tpu.memory_space<vmem>>, %arg20: memref<1x1x32xf32, #tpu.memory_space<vmem>>, %arg21: memref<32x32xf32, #tpu.memory_space<vmem>>, %arg22: memref<32x32xf32, #tpu.memory_space<vmem>>, %arg23: memref<4x32xbf16, #tpu.memory_space<vmem>>, %arg24: memref<32x16xbf16, #tpu.memory_space<vmem>>, %arg25: memref<1x16xf32, #tpu.memory_space<vmem>>, %arg26: memref<32x16xbf16, #tpu.memory_space<vmem>>, %arg27: memref<1x16xf32, #tpu.memory_space<vmem>>, %arg28: memref<1x16xf32, #tpu.memory_space<vmem>>, %arg29: memref<1x16xf32, #tpu.memory_space<vmem>>, %arg30: memref<32x128xbf16, #tpu.memory_space<vmem>>, %arg31: memref<16x128xbf16, #tpu.memory_space<vmem>>, %arg32: memref<16x128xbf16, #tpu.memory_space<vmem>>, %arg33: memref<1x128xf32, #tpu.memory_space<vmem>>, %arg34: memref<2x128xf32, #tpu.memory_space<vmem>>, %arg35: memref<16x32xf32, #tpu.memory_space<vmem>>) attributes {dimension_semantics = [#tpu.dimension_semantics<arbitrary>], iteration_bounds = array<i64: 2>, scalar_prefetch = 0 : i64, scratch_operands = 1 : i64, tpu.core_type = #tpu.core_type<tc>, window_params = [{pipeline_mode = #tpu.pipeline_mode<synchronous>, transform_indices = @transform_0, window_bounds = array<i64: 16, 32>}, {pipeline_mode = #tpu.pipeline_mode<synchronous>, transform_indices = @transform_1, window_bounds = array<i64: 2, 8, 8>}, {pipeline_mode = #tpu.pipeline_mode<synchronous>, transform_indices = @transform_2, window_bounds = array<i64: 1, 32>}, {pipeline_mode = #tpu.pipeline_mode<synchronous>, transform_indices = @transform_3, window_bounds = array<i64: 1, 32>}, {transform_indices = @transform_4, window_bounds = array<i64: 1, 2, 32, 16>}, {transform_indices = @transform_5, window_bounds = array<i64: 1, 2, 1, 16>}, {transform_indices = @transform_6, window_bounds = array<i64: 1, 2, 32, 16>}, {transform_indices = @transform_7, window_bounds = array<i64: 1, 2, 1, 16>}, {transform_indices = @transform_8, window_bounds = array<i64: 1, 2, 32, 16>}, {transform_indices = @transform_9, window_bounds = array<i64: 1, 2, 1, 16>}, {transform_indices = @transform_10, window_bounds = array<i64: 1, 2, 16, 32>}, {transform_indices = @transform_11, window_bounds = array<i64: 1, 1, 32>}, {transform_indices = @transform_12, window_bounds = array<i64: 1, 1, 32>}, {transform_indices = @transform_13, window_bounds = array<i64: 1, 1, 32>}, {transform_indices = @transform_14, window_bounds = array<i64: 1, 32, 64>}, {transform_indices = @transform_15, window_bounds = array<i64: 1, 1, 64>}, {transform_indices = @transform_16, window_bounds = array<i64: 1, 64, 32>}, {transform_indices = @transform_17, window_bounds = array<i64: 1, 1, 32>}, {transform_indices = @transform_18, window_bounds = array<i64: 1, 1, 32>}, {transform_indices = @transform_19, window_bounds = array<i64: 1, 1, 32>}, {pipeline_mode = #tpu.pipeline_mode<synchronous>, transform_indices = @transform_20, window_bounds = array<i64: 32, 32>}, {pipeline_mode = #tpu.pipeline_mode<synchronous>, transform_indices = @transform_21, window_bounds = array<i64: 32, 32>}, {pipeline_mode = #tpu.pipeline_mode<synchronous>, transform_indices = @transform_22, window_bounds = array<i64: 4, 32>}, {pipeline_mode = #tpu.pipeline_mode<synchronous>, transform_indices = @transform_23, window_bounds = array<i64: 32, 16>}, {pipeline_mode = #tpu.pipeline_mode<synchronous>, transform_indices = @transform_24, window_bounds = array<i64: 1, 16>}, {pipeline_mode = #tpu.pipeline_mode<synchronous>, transform_indices = @transform_25, window_bounds = array<i64: 32, 16>}, {pipeline_mode = #tpu.pipeline_mode<synchronous>, transform_indices = @transform_26, window_bounds = array<i64: 1, 16>}, {pipeline_mode = #tpu.pipeline_mode<synchronous>, transform_indices = @transform_27, window_bounds = array<i64: 1, 16>}, {pipeline_mode = #tpu.pipeline_mode<synchronous>, transform_indices = @transform_28, window_bounds = array<i64: 1, 16>}, {pipeline_mode = #tpu.pipeline_mode<synchronous>, transform_indices = @transform_29, window_bounds = array<i64: 32, 128>}, {pipeline_mode = #tpu.pipeline_mode<synchronous>, transform_indices = @transform_30, window_bounds = array<i64: 16, 128>}, {pipeline_mode = #tpu.pipeline_mode<synchronous>, transform_indices = @transform_31, window_bounds = array<i64: 16, 128>}, {pipeline_mode = #tpu.pipeline_mode<synchronous>, transform_indices = @transform_32, window_bounds = array<i64: 1, 128>}, {pipeline_mode = #tpu.pipeline_mode<synchronous>, transform_indices = @transform_33, window_bounds = array<i64: 2, 128>}]} {
    %c0_i32 = arith.constant 0 : i32
    %0 = arith.cmpi eq, %arg0, %c0_i32 : i32
    %1 = arith.extui %0 : i1 to i32
    %c0_i32_0 = arith.constant 0 : i32
    %2 = arith.cmpi ne, %1, %c0_i32_0 : i32
    scf.if %2 {
      %c0_95 = arith.constant 0 : index
      %c0_96 = arith.constant 0 : index
      %206 = vector.load %arg1[%c0_95, %c0_96] : memref<16x32xf32, #tpu.memory_space<vmem>>, vector<16x32xf32>
      %c0_97 = arith.constant 0 : index
      %c0_98 = arith.constant 0 : index
      %207 = vector.load %arg3[%c0_97, %c0_98] : memref<1x32xf32, #tpu.memory_space<vmem>>, vector<1x32xf32>
      %c0_99 = arith.constant 0 : index
      %c0_100 = arith.constant 0 : index
      %208 = vector.load %arg4[%c0_99, %c0_100] : memref<1x32xf32, #tpu.memory_space<vmem>>, vector<1x32xf32>
      %cst_101 = arith.constant dense<0.000000e+00> : vector<16xf32>
      %209 = vector.multi_reduction <add>, %206, %cst_101 [1] : vector<16x32xf32> to vector<16xf32>
      %210 = vector.shape_cast %209 : vector<16xf32> to vector<16x1xf32>
      %cst_102 = arith.constant 3.200000e+01 : f32
      %211 = vector.broadcast %cst_102 : f32 to vector<16x1xf32>
      %212 = arith.divf %210, %211 : vector<16x1xf32>
      %213 = vector.broadcast %212 : vector<16x1xf32> to vector<16x32xf32>
      %214 = arith.subf %206, %213 : vector<16x32xf32>
      %215 = arith.mulf %214, %214 : vector<16x32xf32>
      %cst_103 = arith.constant dense<0.000000e+00> : vector<16xf32>
      %216 = vector.multi_reduction <add>, %215, %cst_103 [1] : vector<16x32xf32> to vector<16xf32>
      %217 = vector.shape_cast %216 : vector<16xf32> to vector<16x1xf32>
      %cst_104 = arith.constant 3.200000e+01 : f32
      %218 = vector.broadcast %cst_104 : f32 to vector<16x1xf32>
      %219 = arith.divf %217, %218 : vector<16x1xf32>
      %220 = vector.broadcast %212 : vector<16x1xf32> to vector<16x32xf32>
      %221 = arith.subf %206, %220 : vector<16x32xf32>
      %cst_105 = arith.constant 9.99999996E-13 : f32
      %222 = vector.broadcast %cst_105 : f32 to vector<16x1xf32>
      %223 = arith.addf %219, %222 : vector<16x1xf32>
      %224 = math.rsqrt %223 : vector<16x1xf32>
      %225 = vector.broadcast %224 : vector<16x1xf32> to vector<16x32xf32>
      %226 = arith.mulf %221, %225 : vector<16x32xf32>
      %227 = vector.broadcast %207 : vector<1x32xf32> to vector<16x32xf32>
      %228 = arith.mulf %226, %227 : vector<16x32xf32>
      %229 = vector.broadcast %208 : vector<1x32xf32> to vector<16x32xf32>
      %230 = arith.addf %228, %229 : vector<16x32xf32>
      %c0_106 = arith.constant 0 : index
      %c0_107 = arith.constant 0 : index
      %231 = vector.load %arg35[%c0_106, %c0_107] : memref<16x32xf32, #tpu.memory_space<vmem>>, vector<16x32xf32>
      tpu.vector_store %arg35[%c0_106, %c0_107], %230 {strides = array<i32>} : memref<16x32xf32, #tpu.memory_space<vmem>>, vector<16x32xf32>,
    } else {
    }
    %c0 = arith.constant 0 : index
    %c0_1 = arith.constant 0 : index
    %3 = vector.load %arg35[%c0, %c0_1] : memref<16x32xf32, #tpu.memory_space<vmem>>, vector<16x32xf32>
    %4 = arith.truncf %3 : vector<16x32xf32> to vector<16x32xbf16>
    %c0_2 = arith.constant 0 : index
    %c0_3 = arith.constant 0 : index
    %c0_4 = arith.constant 0 : index
    %5 = vector.load %arg2[%c0_2, %c0_3, %c0_4] : memref<2x8x8xf32, #tpu.memory_space<vmem>>, vector<2x8x8xf32>
    %c0_5 = arith.constant 0 : index
    %c0_6 = arith.constant 0 : index
    %c0_7 = arith.constant 0 : index
    %c0_8 = arith.constant 0 : index
    %6 = vector.load %arg5[%c0_5, %c0_6, %c0_7, %c0_8] : memref<1x2x32x16xbf16, #tpu.memory_space<vmem>>, vector<1x2x32x16xbf16>
    %7 = vector.shape_cast %6 : vector<1x2x32x16xbf16> to vector<2x32x16xbf16>
    %c0_9 = arith.constant 0 : index
    %c0_10 = arith.constant 0 : index
    %c0_11 = arith.constant 0 : index
    %c0_12 = arith.constant 0 : index
    %8 = vector.load %arg7[%c0_9, %c0_10, %c0_11, %c0_12] : memref<1x2x32x16xbf16, #tpu.memory_space<vmem>>, vector<1x2x32x16xbf16>
    %9 = vector.shape_cast %8 : vector<1x2x32x16xbf16> to vector<2x32x16xbf16>
    %c0_13 = arith.constant 0 : index
    %c0_14 = arith.constant 0 : index
    %c0_15 = arith.constant 0 : index
    %c0_16 = arith.constant 0 : index
    %10 = vector.load %arg9[%c0_13, %c0_14, %c0_15, %c0_16] : memref<1x2x32x16xbf16, #tpu.memory_space<vmem>>, vector<1x2x32x16xbf16>
    %11 = vector.shape_cast %10 : vector<1x2x32x16xbf16> to vector<2x32x16xbf16>
    %c0_17 = arith.constant 0 : index
    %c0_18 = arith.constant 0 : index
    %c0_19 = arith.constant 0 : index
    %c0_20 = arith.constant 0 : index
    %12 = vector.load %arg11[%c0_17, %c0_18, %c0_19, %c0_20] : memref<1x2x16x32xbf16, #tpu.memory_space<vmem>>, vector<1x2x16x32xbf16>
    %13 = vector.shape_cast %12 : vector<1x2x16x32xbf16> to vector<2x16x32xbf16>
    %c0_21 = arith.constant 0 : index
    %c0_22 = arith.constant 0 : index
    %c0_23 = arith.constant 0 : index
    %c0_24 = arith.constant 0 : index
    %14 = vector.load %arg6[%c0_21, %c0_22, %c0_23, %c0_24] : memref<1x2x1x16xf32, #tpu.memory_space<vmem>>, vector<1x2x1x16xf32>
    %15 = vector.shape_cast %14 : vector<1x2x1x16xf32> to vector<2x1x16xf32>
    %c0_25 = arith.constant 0 : index
    %c0_26 = arith.constant 0 : index
    %c0_27 = arith.constant 0 : index
    %c0_28 = arith.constant 0 : index
    %16 = vector.load %arg8[%c0_25, %c0_26, %c0_27, %c0_28] : memref<1x2x1x16xf32, #tpu.memory_space<vmem>>, vector<1x2x1x16xf32>
    %17 = vector.shape_cast %16 : vector<1x2x1x16xf32> to vector<2x1x16xf32>
    %c0_29 = arith.constant 0 : index
    %c0_30 = arith.constant 0 : index
    %c0_31 = arith.constant 0 : index
    %c0_32 = arith.constant 0 : index
    %18 = vector.load %arg10[%c0_29, %c0_30, %c0_31, %c0_32] : memref<1x2x1x16xf32, #tpu.memory_space<vmem>>, vector<1x2x1x16xf32>
    %19 = vector.shape_cast %18 : vector<1x2x1x16xf32> to vector<2x1x16xf32>
    %cst = arith.constant 0.000000e+00 : f32
    %20 = vector.broadcast %cst : f32 to vector<16x32xf32>
    %21 = vector.extract_strided_slice %7 {offsets = [0, 0, 0], sizes = [1, 32, 16], strides = [1, 1, 1]} : vector<2x32x16xbf16> to vector<1x32x16xbf16>
    %22 = vector.shape_cast %21 : vector<1x32x16xbf16> to vector<32x16xbf16>
    %cst_33 = arith.constant dense<0.000000e+00> : vector<16x16xf32>
    %23 = tpu.matmul %4, %22, %cst_33 {dimension_numbers = #tpu.dot_dimension_numbers<[1], [0], [0], [1], [0, 0, 1, 1], [], []>} : vector<16x32xbf16>, vector<32x16xbf16>, vector<16x16xf32> -> vector<16x16xf32>
    %24 = vector.extract_strided_slice %15 {offsets = [0, 0, 0], sizes = [1, 1, 16], strides = [1, 1, 1]} : vector<2x1x16xf32> to vector<1x1x16xf32>
    %25 = vector.shape_cast %24 : vector<1x1x16xf32> to vector<1x16xf32>
    %26 = vector.broadcast %25 : vector<1x16xf32> to vector<16x16xf32>
    %27 = arith.addf %23, %26 : vector<16x16xf32>
    %28 = vector.shape_cast %27 : vector<16x16xf32> to vector<2x8x16xf32>
    %29 = vector.extract_strided_slice %9 {offsets = [0, 0, 0], sizes = [1, 32, 16], strides = [1, 1, 1]} : vector<2x32x16xbf16> to vector<1x32x16xbf16>
    %30 = vector.shape_cast %29 : vector<1x32x16xbf16> to vector<32x16xbf16>
    %cst_34 = arith.constant dense<0.000000e+00> : vector<16x16xf32>
    %31 = tpu.matmul %4, %30, %cst_34 {dimension_numbers = #tpu.dot_dimension_numbers<[1], [0], [0], [1], [0, 0, 1, 1], [], []>} : vector<16x32xbf16>, vector<32x16xbf16>, vector<16x16xf32> -> vector<16x16xf32>
    %32 = vector.extract_strided_slice %17 {offsets = [0, 0, 0], sizes = [1, 1, 16], strides = [1, 1, 1]} : vector<2x1x16xf32> to vector<1x1x16xf32>
    %33 = vector.shape_cast %32 : vector<1x1x16xf32> to vector<1x16xf32>
    %34 = vector.broadcast %33 : vector<1x16xf32> to vector<16x16xf32>
    %35 = arith.addf %31, %34 : vector<16x16xf32>
    %36 = vector.shape_cast %35 : vector<16x16xf32> to vector<2x8x16xf32>
    %37 = vector.extract_strided_slice %11 {offsets = [0, 0, 0], sizes = [1, 32, 16], strides = [1, 1, 1]} : vector<2x32x16xbf16> to vector<1x32x16xbf16>
    %38 = vector.shape_cast %37 : vector<1x32x16xbf16> to vector<32x16xbf16>
    %cst_35 = arith.constant dense<0.000000e+00> : vector<16x16xf32>
    %39 = tpu.matmul %4, %38, %cst_35 {dimension_numbers = #tpu.dot_dimension_numbers<[1], [0], [0], [1], [0, 0, 1, 1], [], []>} : vector<16x32xbf16>, vector<32x16xbf16>, vector<16x16xf32> -> vector<16x16xf32>
    %40 = vector.extract_strided_slice %19 {offsets = [0, 0, 0], sizes = [1, 1, 16], strides = [1, 1, 1]} : vector<2x1x16xf32> to vector<1x1x16xf32>
    %41 = vector.shape_cast %40 : vector<1x1x16xf32> to vector<1x16xf32>
    %42 = vector.broadcast %41 : vector<1x16xf32> to vector<16x16xf32>
    %43 = arith.addf %39, %42 : vector<16x16xf32>
    %44 = vector.shape_cast %43 : vector<16x16xf32> to vector<2x8x16xf32>
    %45 = arith.truncf %28 : vector<2x8x16xf32> to vector<2x8x16xbf16>
    %46 = arith.truncf %36 : vector<2x8x16xf32> to vector<2x8x16xbf16>
    "tpu.trace_start"() <{level = 10 : i32, message = "bqd,bkd->bqk"}> : () -> ()
    %cst_36 = arith.constant dense<0.000000e+00> : vector<2x8x8xf32>
    %47 = tpu.matmul %45, %46, %cst_36 {dimension_numbers = #tpu.dot_dimension_numbers<[2], [2], [1], [1], [0, 0, 0, 1, 1, 1], [0], [0]>} : vector<2x8x16xbf16>, vector<2x8x16xbf16>, vector<2x8x8xf32> -> vector<2x8x8xf32>
    "tpu.trace_stop"() : () -> ()
    %48 = arith.addf %47, %5 : vector<2x8x8xf32>
    %cst_37 = arith.constant dense<0xFF800000> : vector<2x8xf32>
    %49 = vector.multi_reduction <maximumf>, %48, %cst_37 [2] : vector<2x8x8xf32> to vector<2x8xf32>
    %50 = vector.shape_cast %49 : vector<2x8xf32> to vector<2x8x1xf32>
    %51 = vector.broadcast %50 : vector<2x8x1xf32> to vector<2x8x8xf32>
    %52 = arith.subf %48, %51 : vector<2x8x8xf32>
    %53 = math.exp %52 : vector<2x8x8xf32>
    %cst_38 = arith.constant dense<0.000000e+00> : vector<2x8xf32>
    %54 = vector.multi_reduction <add>, %53, %cst_38 [2] : vector<2x8x8xf32> to vector<2x8xf32>
    %55 = vector.shape_cast %54 : vector<2x8xf32> to vector<2x8x1xf32>
    %56 = tpu.reciprocal %55 {approx = true} : vector<2x8x1xf32> -> vector<2x8x1xf32>
    %57 = vector.broadcast %56 : vector<2x8x1xf32> to vector<2x8x8xf32>
    %58 = arith.mulf %53, %57 : vector<2x8x8xf32>
    %59 = arith.truncf %58 : vector<2x8x8xf32> to vector<2x8x8xbf16>
    %60 = arith.truncf %44 : vector<2x8x16xf32> to vector<2x8x16xbf16>
    "tpu.trace_start"() <{level = 10 : i32, message = "bqk,bkd->bqd"}> : () -> ()
    %cst_39 = arith.constant dense<0.000000e+00> : vector<2x8x16xf32>
    %61 = tpu.matmul %59, %60, %cst_39 {dimension_numbers = #tpu.dot_dimension_numbers<[2], [1], [1], [2], [0, 0, 0, 1, 1, 2], [0], [0]>} : vector<2x8x8xbf16>, vector<2x8x16xbf16>, vector<2x8x16xf32> -> vector<2x8x16xf32>
    "tpu.trace_stop"() : () -> ()
    %62 = vector.shape_cast %61 : vector<2x8x16xf32> to vector<16x16xf32>
    %63 = arith.truncf %62 : vector<16x16xf32> to vector<16x16xbf16>
    %64 = vector.extract_strided_slice %13 {offsets = [0, 0, 0], sizes = [1, 16, 32], strides = [1, 1, 1]} : vector<2x16x32xbf16> to vector<1x16x32xbf16>
    %65 = vector.shape_cast %64 : vector<1x16x32xbf16> to vector<16x32xbf16>
    %cst_40 = arith.constant dense<0.000000e+00> : vector<16x32xf32>
    %66 = tpu.matmul %63, %65, %cst_40 {dimension_numbers = #tpu.dot_dimension_numbers<[1], [0], [0], [1], [0, 0, 1, 1], [], []>} : vector<16x16xbf16>, vector<16x32xbf16>, vector<16x32xf32> -> vector<16x32xf32>
    %67 = arith.addf %20, %66 : vector<16x32xf32>
    %68 = vector.extract_strided_slice %7 {offsets = [1, 0, 0], sizes = [1, 32, 16], strides = [1, 1, 1]} : vector<2x32x16xbf16> to vector<1x32x16xbf16>
    %69 = vector.shape_cast %68 : vector<1x32x16xbf16> to vector<32x16xbf16>
    %cst_41 = arith.constant dense<0.000000e+00> : vector<16x16xf32>
    %70 = tpu.matmul %4, %69, %cst_41 {dimension_numbers = #tpu.dot_dimension_numbers<[1], [0], [0], [1], [0, 0, 1, 1], [], []>} : vector<16x32xbf16>, vector<32x16xbf16>, vector<16x16xf32> -> vector<16x16xf32>
    %71 = vector.extract_strided_slice %15 {offsets = [1, 0, 0], sizes = [1, 1, 16], strides = [1, 1, 1]} : vector<2x1x16xf32> to vector<1x1x16xf32>
    %72 = vector.shape_cast %71 : vector<1x1x16xf32> to vector<1x16xf32>
    %73 = vector.broadcast %72 : vector<1x16xf32> to vector<16x16xf32>
    %74 = arith.addf %70, %73 : vector<16x16xf32>
    %75 = vector.shape_cast %74 : vector<16x16xf32> to vector<2x8x16xf32>
    %76 = vector.extract_strided_slice %9 {offsets = [1, 0, 0], sizes = [1, 32, 16], strides = [1, 1, 1]} : vector<2x32x16xbf16> to vector<1x32x16xbf16>
    %77 = vector.shape_cast %76 : vector<1x32x16xbf16> to vector<32x16xbf16>
    %cst_42 = arith.constant dense<0.000000e+00> : vector<16x16xf32>
    %78 = tpu.matmul %4, %77, %cst_42 {dimension_numbers = #tpu.dot_dimension_numbers<[1], [0], [0], [1], [0, 0, 1, 1], [], []>} : vector<16x32xbf16>, vector<32x16xbf16>, vector<16x16xf32> -> vector<16x16xf32>
    %79 = vector.extract_strided_slice %17 {offsets = [1, 0, 0], sizes = [1, 1, 16], strides = [1, 1, 1]} : vector<2x1x16xf32> to vector<1x1x16xf32>
    %80 = vector.shape_cast %79 : vector<1x1x16xf32> to vector<1x16xf32>
    %81 = vector.broadcast %80 : vector<1x16xf32> to vector<16x16xf32>
    %82 = arith.addf %78, %81 : vector<16x16xf32>
    %83 = vector.shape_cast %82 : vector<16x16xf32> to vector<2x8x16xf32>
    %84 = vector.extract_strided_slice %11 {offsets = [1, 0, 0], sizes = [1, 32, 16], strides = [1, 1, 1]} : vector<2x32x16xbf16> to vector<1x32x16xbf16>
    %85 = vector.shape_cast %84 : vector<1x32x16xbf16> to vector<32x16xbf16>
    %cst_43 = arith.constant dense<0.000000e+00> : vector<16x16xf32>
    %86 = tpu.matmul %4, %85, %cst_43 {dimension_numbers = #tpu.dot_dimension_numbers<[1], [0], [0], [1], [0, 0, 1, 1], [], []>} : vector<16x32xbf16>, vector<32x16xbf16>, vector<16x16xf32> -> vector<16x16xf32>
    %87 = vector.extract_strided_slice %19 {offsets = [1, 0, 0], sizes = [1, 1, 16], strides = [1, 1, 1]} : vector<2x1x16xf32> to vector<1x1x16xf32>
    %88 = vector.shape_cast %87 : vector<1x1x16xf32> to vector<1x16xf32>
    %89 = vector.broadcast %88 : vector<1x16xf32> to vector<16x16xf32>
    %90 = arith.addf %86, %89 : vector<16x16xf32>
    %91 = vector.shape_cast %90 : vector<16x16xf32> to vector<2x8x16xf32>
    %92 = arith.truncf %75 : vector<2x8x16xf32> to vector<2x8x16xbf16>
    %93 = arith.truncf %83 : vector<2x8x16xf32> to vector<2x8x16xbf16>
    "tpu.trace_start"() <{level = 10 : i32, message = "bqd,bkd->bqk"}> : () -> ()
    %cst_44 = arith.constant dense<0.000000e+00> : vector<2x8x8xf32>
    %94 = tpu.matmul %92, %93, %cst_44 {dimension_numbers = #tpu.dot_dimension_numbers<[2], [2], [1], [1], [0, 0, 0, 1, 1, 1], [0], [0]>} : vector<2x8x16xbf16>, vector<2x8x16xbf16>, vector<2x8x8xf32> -> vector<2x8x8xf32>
    "tpu.trace_stop"() : () -> ()
    %95 = arith.addf %94, %5 : vector<2x8x8xf32>
    %cst_45 = arith.constant dense<0xFF800000> : vector<2x8xf32>
    %96 = vector.multi_reduction <maximumf>, %95, %cst_45 [2] : vector<2x8x8xf32> to vector<2x8xf32>
    %97 = vector.shape_cast %96 : vector<2x8xf32> to vector<2x8x1xf32>
    %98 = vector.broadcast %97 : vector<2x8x1xf32> to vector<2x8x8xf32>
    %99 = arith.subf %95, %98 : vector<2x8x8xf32>
    %100 = math.exp %99 : vector<2x8x8xf32>
    %cst_46 = arith.constant dense<0.000000e+00> : vector<2x8xf32>
    %101 = vector.multi_reduction <add>, %100, %cst_46 [2] : vector<2x8x8xf32> to vector<2x8xf32>
    %102 = vector.shape_cast %101 : vector<2x8xf32> to vector<2x8x1xf32>
    %103 = tpu.reciprocal %102 {approx = true} : vector<2x8x1xf32> -> vector<2x8x1xf32>
    %104 = vector.broadcast %103 : vector<2x8x1xf32> to vector<2x8x8xf32>
    %105 = arith.mulf %100, %104 : vector<2x8x8xf32>
    %106 = arith.truncf %105 : vector<2x8x8xf32> to vector<2x8x8xbf16>
    %107 = arith.truncf %91 : vector<2x8x16xf32> to vector<2x8x16xbf16>
    "tpu.trace_start"() <{level = 10 : i32, message = "bqk,bkd->bqd"}> : () -> ()
    %cst_47 = arith.constant dense<0.000000e+00> : vector<2x8x16xf32>
    %108 = tpu.matmul %106, %107, %cst_47 {dimension_numbers = #tpu.dot_dimension_numbers<[2], [1], [1], [2], [0, 0, 0, 1, 1, 2], [0], [0]>} : vector<2x8x8xbf16>, vector<2x8x16xbf16>, vector<2x8x16xf32> -> vector<2x8x16xf32>
    "tpu.trace_stop"() : () -> ()
    %109 = vector.shape_cast %108 : vector<2x8x16xf32> to vector<16x16xf32>
    %110 = arith.truncf %109 : vector<16x16xf32> to vector<16x16xbf16>
    %111 = vector.extract_strided_slice %13 {offsets = [1, 0, 0], sizes = [1, 16, 32], strides = [1, 1, 1]} : vector<2x16x32xbf16> to vector<1x16x32xbf16>
    %112 = vector.shape_cast %111 : vector<1x16x32xbf16> to vector<16x32xbf16>
    %cst_48 = arith.constant dense<0.000000e+00> : vector<16x32xf32>
    %113 = tpu.matmul %110, %112, %cst_48 {dimension_numbers = #tpu.dot_dimension_numbers<[1], [0], [0], [1], [0, 0, 1, 1], [], []>} : vector<16x16xbf16>, vector<16x32xbf16>, vector<16x32xf32> -> vector<16x32xf32>
    %114 = arith.addf %67, %113 : vector<16x32xf32>
    %115 = arith.addf %3, %114 : vector<16x32xf32>
    %c0_49 = arith.constant 0 : index
    %c0_50 = arith.constant 0 : index
    %c0_51 = arith.constant 0 : index
    %116 = vector.load %arg12[%c0_49, %c0_50, %c0_51] : memref<1x1x32xf32, #tpu.memory_space<vmem>>, vector<1x1x32xf32>
    %117 = vector.shape_cast %116 : vector<1x1x32xf32> to vector<1x32xf32>
    %118 = vector.broadcast %117 : vector<1x32xf32> to vector<16x32xf32>
    %119 = arith.addf %115, %118 : vector<16x32xf32>
    %c0_52 = arith.constant 0 : index
    %c0_53 = arith.constant 0 : index
    %c0_54 = arith.constant 0 : index
    %120 = vector.load %arg13[%c0_52, %c0_53, %c0_54] : memref<1x1x32xf32, #tpu.memory_space<vmem>>, vector<1x1x32xf32>
    %121 = vector.shape_cast %120 : vector<1x1x32xf32> to vector<1x32xf32>
    %c0_55 = arith.constant 0 : index
    %c0_56 = arith.constant 0 : index
    %c0_57 = arith.constant 0 : index
    %122 = vector.load %arg14[%c0_55, %c0_56, %c0_57] : memref<1x1x32xf32, #tpu.memory_space<vmem>>, vector<1x1x32xf32>
    %123 = vector.shape_cast %122 : vector<1x1x32xf32> to vector<1x32xf32>
    %cst_58 = arith.constant dense<0.000000e+00> : vector<16xf32>
    %124 = vector.multi_reduction <add>, %119, %cst_58 [1] : vector<16x32xf32> to vector<16xf32>
    %125 = vector.shape_cast %124 : vector<16xf32> to vector<16x1xf32>
    %cst_59 = arith.constant 3.200000e+01 : f32
    %126 = vector.broadcast %cst_59 : f32 to vector<16x1xf32>
    %127 = arith.divf %125, %126 : vector<16x1xf32>
    %128 = vector.broadcast %127 : vector<16x1xf32> to vector<16x32xf32>
    %129 = arith.subf %119, %128 : vector<16x32xf32>
    %130 = arith.mulf %129, %129 : vector<16x32xf32>
    %cst_60 = arith.constant dense<0.000000e+00> : vector<16xf32>
    %131 = vector.multi_reduction <add>, %130, %cst_60 [1] : vector<16x32xf32> to vector<16xf32>
    %132 = vector.shape_cast %131 : vector<16xf32> to vector<16x1xf32>
    %cst_61 = arith.constant 3.200000e+01 : f32
    %133 = vector.broadcast %cst_61 : f32 to vector<16x1xf32>
    %134 = arith.divf %132, %133 : vector<16x1xf32>
    %135 = vector.broadcast %127 : vector<16x1xf32> to vector<16x32xf32>
    %136 = arith.subf %119, %135 : vector<16x32xf32>
    %cst_62 = arith.constant 9.99999996E-13 : f32
    %137 = vector.broadcast %cst_62 : f32 to vector<16x1xf32>
    %138 = arith.addf %134, %137 : vector<16x1xf32>
    %139 = math.rsqrt %138 : vector<16x1xf32>
    %140 = vector.broadcast %139 : vector<16x1xf32> to vector<16x32xf32>
    %141 = arith.mulf %136, %140 : vector<16x32xf32>
    %142 = vector.broadcast %121 : vector<1x32xf32> to vector<16x32xf32>
    %143 = arith.mulf %141, %142 : vector<16x32xf32>
    %144 = vector.broadcast %123 : vector<1x32xf32> to vector<16x32xf32>
    %145 = arith.addf %143, %144 : vector<16x32xf32>
    %146 = arith.truncf %145 : vector<16x32xf32> to vector<16x32xbf16>
    %c0_63 = arith.constant 0 : index
    %c0_64 = arith.constant 0 : index
    %c0_65 = arith.constant 0 : index
    %147 = vector.load %arg15[%c0_63, %c0_64, %c0_65] : memref<1x32x64xbf16, #tpu.memory_space<vmem>>, vector<1x32x64xbf16>
    %148 = vector.shape_cast %147 : vector<1x32x64xbf16> to vector<32x64xbf16>
    %cst_66 = arith.constant dense<0.000000e+00> : vector<16x64xf32>
    %149 = tpu.matmul %146, %148, %cst_66 {dimension_numbers = #tpu.dot_dimension_numbers<[1], [0], [0], [1], [0, 0, 1, 1], [], []>} : vector<16x32xbf16>, vector<32x64xbf16>, vector<16x64xf32> -> vector<16x64xf32>
    %c0_67 = arith.constant 0 : index
    %c0_68 = arith.constant 0 : index
    %c0_69 = arith.constant 0 : index
    %150 = vector.load %arg16[%c0_67, %c0_68, %c0_69] : memref<1x1x64xf32, #tpu.memory_space<vmem>>, vector<1x1x64xf32>
    %151 = vector.shape_cast %150 : vector<1x1x64xf32> to vector<1x64xf32>
    %152 = vector.broadcast %151 : vector<1x64xf32> to vector<16x64xf32>
    %153 = arith.addf %149, %152 : vector<16x64xf32>
    %154 = arith.mulf %153, %153 : vector<16x64xf32>
    %155 = arith.mulf %153, %154 : vector<16x64xf32>
    %cst_70 = arith.constant 4.471500e-02 : f32
    %156 = vector.broadcast %cst_70 : f32 to vector<16x64xf32>
    %157 = arith.mulf %156, %155 : vector<16x64xf32>
    %158 = arith.addf %153, %157 : vector<16x64xf32>
    %cst_71 = arith.constant 0.797884583 : f32
    %159 = vector.broadcast %cst_71 : f32 to vector<16x64xf32>
    %160 = arith.mulf %159, %158 : vector<16x64xf32>
    %161 = math.tanh %160 : vector<16x64xf32>
    %cst_72 = arith.constant 1.000000e+00 : f32
    %162 = vector.broadcast %cst_72 : f32 to vector<16x64xf32>
    %163 = arith.addf %162, %161 : vector<16x64xf32>
    %cst_73 = arith.constant 5.000000e-01 : f32
    %164 = vector.broadcast %cst_73 : f32 to vector<16x64xf32>
    %165 = arith.mulf %164, %163 : vector<16x64xf32>
    %166 = arith.mulf %153, %165 : vector<16x64xf32>
    %167 = arith.truncf %166 : vector<16x64xf32> to vector<16x64xbf16>
    %c0_74 = arith.constant 0 : index
    %c0_75 = arith.constant 0 : index
    %c0_76 = arith.constant 0 : index
    %168 = vector.load %arg17[%c0_74, %c0_75, %c0_76] : memref<1x64x32xbf16, #tpu.memory_space<vmem>>, vector<1x64x32xbf16>
    %169 = vector.shape_cast %168 : vector<1x64x32xbf16> to vector<64x32xbf16>
    %cst_77 = arith.constant dense<0.000000e+00> : vector<16x32xf32>
    %170 = tpu.matmul %167, %169, %cst_77 {dimension_numbers = #tpu.dot_dimension_numbers<[1], [0], [0], [1], [0, 0, 1, 1], [], []>} : vector<16x64xbf16>, vector<64x32xbf16>, vector<16x32xf32> -> vector<16x32xf32>
    %c0_78 = arith.constant 0 : index
    %c0_79 = arith.constant 0 : index
    %c0_80 = arith.constant 0 : index
    %171 = vector.load %arg18[%c0_78, %c0_79, %c0_80] : memref<1x1x32xf32, #tpu.memory_space<vmem>>, vector<1x1x32xf32>
    %172 = vector.shape_cast %171 : vector<1x1x32xf32> to vector<1x32xf32>
    %173 = vector.broadcast %172 : vector<1x32xf32> to vector<16x32xf32>
    %174 = arith.addf %170, %173 : vector<16x32xf32>
    %175 = arith.addf %145, %174 : vector<16x32xf32>
    %c0_81 = arith.constant 0 : index
    %c0_82 = arith.constant 0 : index
    %c0_83 = arith.constant 0 : index
    %176 = vector.load %arg19[%c0_81, %c0_82, %c0_83] : memref<1x1x32xf32, #tpu.memory_space<vmem>>, vector<1x1x32xf32>
    %177 = vector.shape_cast %176 : vector<1x1x32xf32> to vector<1x32xf32>
    %c0_84 = arith.constant 0 : index
    %c0_85 = arith.constant 0 : index
    %c0_86 = arith.constant 0 : index
    %178 = vector.load %arg20[%c0_84, %c0_85, %c0_86] : memref<1x1x32xf32, #tpu.memory_space<vmem>>, vector<1x1x32xf32>
    %179 = vector.shape_cast %178 : vector<1x1x32xf32> to vector<1x32xf32>
    %cst_87 = arith.constant dense<0.000000e+00> : vector<16xf32>
    %180 = vector.multi_reduction <add>, %175, %cst_87 [1] : vector<16x32xf32> to vector<16xf32>
    %181 = vector.shape_cast %180 : vector<16xf32> to vector<16x1xf32>
    %cst_88 = arith.constant 3.200000e+01 : f32
    %182 = vector.broadcast %cst_88 : f32 to vector<16x1xf32>
    %183 = arith.divf %181, %182 : vector<16x1xf32>
    %184 = vector.broadcast %183 : vector<16x1xf32> to vector<16x32xf32>
    %185 = arith.subf %175, %184 : vector<16x32xf32>
    %186 = arith.mulf %185, %185 : vector<16x32xf32>
    %cst_89 = arith.constant dense<0.000000e+00> : vector<16xf32>
    %187 = vector.multi_reduction <add>, %186, %cst_89 [1] : vector<16x32xf32> to vector<16xf32>
    %188 = vector.shape_cast %187 : vector<16xf32> to vector<16x1xf32>
    %cst_90 = arith.constant 3.200000e+01 : f32
    %189 = vector.broadcast %cst_90 : f32 to vector<16x1xf32>
    %190 = arith.divf %188, %189 : vector<16x1xf32>
    %191 = vector.broadcast %183 : vector<16x1xf32> to vector<16x32xf32>
    %192 = arith.subf %175, %191 : vector<16x32xf32>
    %cst_91 = arith.constant 9.99999996E-13 : f32
    %193 = vector.broadcast %cst_91 : f32 to vector<16x1xf32>
    %194 = arith.addf %190, %193 : vector<16x1xf32>
    %195 = math.rsqrt %194 : vector<16x1xf32>
    %196 = vector.broadcast %195 : vector<16x1xf32> to vector<16x32xf32>
    %197 = arith.mulf %192, %196 : vector<16x32xf32>
    %198 = vector.broadcast %177 : vector<1x32xf32> to vector<16x32xf32>
    %199 = arith.mulf %197, %198 : vector<16x32xf32>
    %200 = vector.broadcast %179 : vector<1x32xf32> to vector<16x32xf32>
    %201 = arith.addf %199, %200 : vector<16x32xf32>
    %c0_92 = arith.constant 0 : index
    %c0_93 = arith.constant 0 : index
    %202 = vector.load %arg35[%c0_92, %c0_93] : memref<16x32xf32, #tpu.memory_space<vmem>>, vector<16x32xf32>
    tpu.vector_store %arg35[%c0_92, %c0_93], %201 {strides = array<i32>} : memref<16x32xf32, #tpu.memory_space<vmem>>, vector<16x32xf32>,
    %c1_i32 = arith.constant 1 : i32
    %203 = arith.cmpi eq, %arg0, %c1_i32 : i32
    %204 = arith.extui %203 : i1 to i32
    %c0_i32_94 = arith.constant 0 : i32
    %205 = arith.cmpi ne, %204, %c0_i32_94 : i32
    scf.if %205 {
      %c0_95 = arith.constant 0 : index
      %c0_96 = arith.constant 0 : index
      %206 = vector.load %arg21[%c0_95, %c0_96] : memref<32x32xf32, #tpu.memory_space<vmem>>, vector<32x32xf32>
      %207 = arith.truncf %206 : vector<32x32xf32> to vector<32x32xbf16>
      %c0_97 = arith.constant 0 : index
      %c0_98 = arith.constant 0 : index
      %208 = vector.load %arg24[%c0_97, %c0_98] : memref<32x16xbf16, #tpu.memory_space<vmem>>, vector<32x16xbf16>
      %cst_99 = arith.constant dense<0.000000e+00> : vector<32x16xf32>
      %209 = tpu.matmul %207, %208, %cst_99 {dimension_numbers = #tpu.dot_dimension_numbers<[1], [0], [0], [1], [0, 0, 1, 1], [], []>} : vector<32x32xbf16>, vector<32x16xbf16>, vector<32x16xf32> -> vector<32x16xf32>
      %c0_100 = arith.constant 0 : index
      %c0_101 = arith.constant 0 : index
      %210 = vector.load %arg25[%c0_100, %c0_101] : memref<1x16xf32, #tpu.memory_space<vmem>>, vector<1x16xf32>
      %211 = vector.broadcast %210 : vector<1x16xf32> to vector<32x16xf32>
      %212 = arith.addf %209, %211 : vector<32x16xf32>
      %c0_102 = arith.constant 0 : index
      %c0_103 = arith.constant 0 : index
      %213 = vector.load %arg26[%c0_102, %c0_103] : memref<32x16xbf16, #tpu.memory_space<vmem>>, vector<32x16xbf16>
      %cst_104 = arith.constant dense<0.000000e+00> : vector<32x16xf32>
      %214 = tpu.matmul %207, %213, %cst_104 {dimension_numbers = #tpu.dot_dimension_numbers<[1], [0], [0], [1], [0, 0, 1, 1], [], []>} : vector<32x32xbf16>, vector<32x16xbf16>, vector<32x16xf32> -> vector<32x16xf32>
      %c0_105 = arith.constant 0 : index
      %c0_106 = arith.constant 0 : index
      %215 = vector.load %arg27[%c0_105, %c0_106] : memref<1x16xf32, #tpu.memory_space<vmem>>, vector<1x16xf32>
      %216 = vector.broadcast %215 : vector<1x16xf32> to vector<32x16xf32>
      %217 = arith.addf %214, %216 : vector<32x16xf32>
      %c0_107 = arith.constant 0 : index
      %c0_108 = arith.constant 0 : index
      %218 = vector.load %arg28[%c0_107, %c0_108] : memref<1x16xf32, #tpu.memory_space<vmem>>, vector<1x16xf32>
      %219 = vector.shape_cast %217 : vector<32x16xf32> to vector<32x1x16xf32>
      %220 = vector.shape_cast %212 : vector<32x16xf32> to vector<1x32x16xf32>
      %221 = vector.broadcast %219 : vector<32x1x16xf32> to vector<32x32x16xf32>
      %222 = vector.broadcast %220 : vector<1x32x16xf32> to vector<32x32x16xf32>
      %223 = arith.addf %221, %222 : vector<32x32x16xf32>
      %cst_109 = arith.constant 0.000000e+00 : f32
      %224 = vector.broadcast %cst_109 : f32 to vector<32x32x16xf32>
      %225 = arith.cmpf ogt, %223, %224 : vector<32x32x16xf32>
      %cst_110 = arith.constant 2.000000e-01 : f32
      %226 = vector.broadcast %cst_110 : f32 to vector<32x32x16xf32>
      %227 = arith.mulf %226, %223 : vector<32x32x16xf32>
      %228 = arith.select %225, %223, %227 : vector<32x32x16xi1>, vector<32x32x16xf32>
      %229 = vector.shape_cast %218 : vector<1x16xf32> to vector<1x1x16xf32>
      %230 = vector.broadcast %229 : vector<1x1x16xf32> to vector<32x32x16xf32>
      %231 = arith.mulf %228, %230 : vector<32x32x16xf32>
      %cst_111 = arith.constant dense<0.000000e+00> : vector<32x32xf32>
      %232 = vector.multi_reduction <add>, %231, %cst_111 [2] : vector<32x32x16xf32> to vector<32x32xf32>
      %c0_112 = arith.constant 0 : index
      %c0_113 = arith.constant 0 : index
      %233 = vector.load %arg22[%c0_112, %c0_113] : memref<32x32xf32, #tpu.memory_space<vmem>>, vector<32x32xf32>
      %cst_114 = arith.constant 0.000000e+00 : f32
      %234 = vector.broadcast %cst_114 : f32 to vector<32x32xf32>
      %235 = arith.cmpf ogt, %233, %234 : vector<32x32xf32>
      %cst_115 = arith.constant -1.000000e+30 : f32
      %236 = vector.broadcast %cst_115 : f32 to vector<32x32xf32>
      %237 = arith.select %235, %232, %236 : vector<32x32xi1>, vector<32x32xf32>
      %cst_116 = arith.constant dense<0xFF800000> : vector<32xf32>
      %238 = vector.multi_reduction <maximumf>, %237, %cst_116 [1] : vector<32x32xf32> to vector<32xf32>
      %239 = vector.shape_cast %238 : vector<32xf32> to vector<32x1xf32>
      %240 = vector.broadcast %239 : vector<32x1xf32> to vector<32x32xf32>
      %241 = arith.subf %237, %240 : vector<32x32xf32>
      %242 = math.exp %241 : vector<32x32xf32>
      %cst_117 = arith.constant dense<0.000000e+00> : vector<32xf32>
      %243 = vector.multi_reduction <add>, %242, %cst_117 [1] : vector<32x32xf32> to vector<32xf32>
      %244 = vector.shape_cast %243 : vector<32xf32> to vector<32x1xf32>
      %cst_118 = arith.constant 9.99999968E-21 : f32
      %245 = vector.broadcast %cst_118 : f32 to vector<32x1xf32>
      %246 = arith.maximumf %244, %245 : vector<32x1xf32>
      %247 = tpu.reciprocal %246 {approx = true} : vector<32x1xf32> -> vector<32x1xf32>
      %248 = vector.broadcast %247 : vector<32x1xf32> to vector<32x32xf32>
      %249 = arith.mulf %242, %248 : vector<32x32xf32>
      %250 = arith.truncf %249 : vector<32x32xf32> to vector<32x32xbf16>
      %251 = arith.truncf %212 : vector<32x16xf32> to vector<32x16xbf16>
      %cst_119 = arith.constant dense<0.000000e+00> : vector<32x16xf32>
      %252 = tpu.matmul %250, %251, %cst_119 {dimension_numbers = #tpu.dot_dimension_numbers<[1], [0], [0], [1], [0, 0, 1, 1], [], []>} : vector<32x32xbf16>, vector<32x16xbf16>, vector<32x16xf32> -> vector<32x16xf32>
      %c0_120 = arith.constant 0 : index
      %c0_121 = arith.constant 0 : index
      %253 = vector.load %arg29[%c0_120, %c0_121] : memref<1x16xf32, #tpu.memory_space<vmem>>, vector<1x16xf32>
      %254 = vector.broadcast %253 : vector<1x16xf32> to vector<32x16xf32>
      %255 = arith.addf %252, %254 : vector<32x16xf32>
      %c0_122 = arith.constant 0 : index
      %c0_123 = arith.constant 0 : index
      %256 = vector.load %arg23[%c0_122, %c0_123] : memref<4x32xbf16, #tpu.memory_space<vmem>>, vector<4x32xbf16>
      %257 = arith.truncf %255 : vector<32x16xf32> to vector<32x16xbf16>
      %cst_124 = arith.constant dense<0.000000e+00> : vector<4x16xf32>
      %258 = tpu.matmul %256, %257, %cst_124 {dimension_numbers = #tpu.dot_dimension_numbers<[1], [0], [0], [1], [0, 0, 1, 1], [], []>} : vector<4x32xbf16>, vector<32x16xbf16>, vector<4x16xf32> -> vector<4x16xf32>
      %259 = vector.extract_strided_slice %201 {offsets = [0, 0], sizes = [1, 32], strides = [1, 1]} : vector<16x32xf32> to vector<1x32xf32>
      %260 = vector.extract_strided_slice %201 {offsets = [8, 0], sizes = [1, 32], strides = [1, 1]} : vector<16x32xf32> to vector<1x32xf32>
      %261 = tpu.concatenate %259, %260 in 0 : vector<1x32xf32>, vector<1x32xf32> -> vector<2x32xf32>
      %262 = arith.truncf %261 : vector<2x32xf32> to vector<2x32xbf16>
      %c0_125 = arith.constant 0 : index
      %c0_126 = arith.constant 0 : index
      %263 = vector.load %arg30[%c0_125, %c0_126] : memref<32x128xbf16, #tpu.memory_space<vmem>>, vector<32x128xbf16>
      %cst_127 = arith.constant dense<0.000000e+00> : vector<2x128xf32>
      %264 = tpu.matmul %262, %263, %cst_127 {dimension_numbers = #tpu.dot_dimension_numbers<[1], [0], [0], [1], [0, 0, 1, 1], [], []>} : vector<2x32xbf16>, vector<32x128xbf16>, vector<2x128xf32> -> vector<2x128xf32>
      %265 = vector.extract_strided_slice %258 {offsets = [0, 0], sizes = [2, 16], strides = [1, 1]} : vector<4x16xf32> to vector<2x16xf32>
      %266 = arith.truncf %265 : vector<2x16xf32> to vector<2x16xbf16>
      %c0_128 = arith.constant 0 : index
      %c0_129 = arith.constant 0 : index
      %267 = vector.load %arg31[%c0_128, %c0_129] : memref<16x128xbf16, #tpu.memory_space<vmem>>, vector<16x128xbf16>
      %cst_130 = arith.constant dense<0.000000e+00> : vector<2x128xf32>
      %268 = tpu.matmul %266, %267, %cst_130 {dimension_numbers = #tpu.dot_dimension_numbers<[1], [0], [0], [1], [0, 0, 1, 1], [], []>} : vector<2x16xbf16>, vector<16x128xbf16>, vector<2x128xf32> -> vector<2x128xf32>
      %269 = arith.addf %264, %268 : vector<2x128xf32>
      %270 = vector.extract_strided_slice %258 {offsets = [2, 0], sizes = [2, 16], strides = [1, 1]} : vector<4x16xf32> to vector<2x16xf32>
      %271 = arith.truncf %270 : vector<2x16xf32> to vector<2x16xbf16>
      %c0_131 = arith.constant 0 : index
      %c0_132 = arith.constant 0 : index
      %272 = vector.load %arg32[%c0_131, %c0_132] : memref<16x128xbf16, #tpu.memory_space<vmem>>, vector<16x128xbf16>
      %cst_133 = arith.constant dense<0.000000e+00> : vector<2x128xf32>
      %273 = tpu.matmul %271, %272, %cst_133 {dimension_numbers = #tpu.dot_dimension_numbers<[1], [0], [0], [1], [0, 0, 1, 1], [], []>} : vector<2x16xbf16>, vector<16x128xbf16>, vector<2x128xf32> -> vector<2x128xf32>
      %274 = arith.addf %269, %273 : vector<2x128xf32>
      %c0_134 = arith.constant 0 : index
      %c0_135 = arith.constant 0 : index
      %275 = vector.load %arg33[%c0_134, %c0_135] : memref<1x128xf32, #tpu.memory_space<vmem>>, vector<1x128xf32>
      %276 = vector.broadcast %275 : vector<1x128xf32> to vector<2x128xf32>
      %277 = arith.addf %274, %276 : vector<2x128xf32>
      %c0_136 = arith.constant 0 : index
      %c0_137 = arith.constant 0 : index
      %278 = vector.load %arg34[%c0_136, %c0_137] : memref<2x128xf32, #tpu.memory_space<vmem>>, vector<2x128xf32>
      tpu.vector_store %arg34[%c0_136, %c0_137], %277 {strides = array<i32>} : memref<2x128xf32, #tpu.memory_space<vmem>>, vector<2x128xf32>,
    } else {
    }
    return
  }
  func.func @transform_0(%arg0: i32) -> (i32, i32) {
    %c0_i32 = arith.constant 0 : i32
    %c0_i32_0 = arith.constant 0 : i32
    %c0_i32_1 = arith.constant 0 : i32
    return %c0_i32, %c0_i32_0 : i32, i32
  }
  func.func @transform_1(%arg0: i32) -> (i32, i32, i32) {
    %c0_i32 = arith.constant 0 : i32
    %c0_i32_0 = arith.constant 0 : i32
    %c0_i32_1 = arith.constant 0 : i32
    %c0_i32_2 = arith.constant 0 : i32
    return %c0_i32, %c0_i32_0, %c0_i32_1 : i32, i32, i32
  }
  func.func @transform_2(%arg0: i32) -> (i32, i32) {
    %c0_i32 = arith.constant 0 : i32
    %c0_i32_0 = arith.constant 0 : i32
    %c0_i32_1 = arith.constant 0 : i32
    return %c0_i32, %c0_i32_0 : i32, i32
  }
  func.func @transform_3(%arg0: i32) -> (i32, i32) {
    %c0_i32 = arith.constant 0 : i32
    %c0_i32_0 = arith.constant 0 : i32
    %c0_i32_1 = arith.constant 0 : i32
    return %c0_i32, %c0_i32_0 : i32, i32
  }
  func.func @transform_4(%arg0: i32) -> (i32, i32, i32, i32) {
    %c0_i32 = arith.constant 0 : i32
    %c0_i32_0 = arith.constant 0 : i32
    %c0_i32_1 = arith.constant 0 : i32
    %c0_i32_2 = arith.constant 0 : i32
    return %arg0, %c0_i32, %c0_i32_0, %c0_i32_1 : i32, i32, i32, i32
  }
  func.func @transform_5(%arg0: i32) -> (i32, i32, i32, i32) {
    %c0_i32 = arith.constant 0 : i32
    %c0_i32_0 = arith.constant 0 : i32
    %c0_i32_1 = arith.constant 0 : i32
    %c0_i32_2 = arith.constant 0 : i32
    return %arg0, %c0_i32, %c0_i32_0, %c0_i32_1 : i32, i32, i32, i32
  }
  func.func @transform_6(%arg0: i32) -> (i32, i32, i32, i32) {
    %c0_i32 = arith.constant 0 : i32
    %c0_i32_0 = arith.constant 0 : i32
    %c0_i32_1 = arith.constant 0 : i32
    %c0_i32_2 = arith.constant 0 : i32
    return %arg0, %c0_i32, %c0_i32_0, %c0_i32_1 : i32, i32, i32, i32
  }
  func.func @transform_7(%arg0: i32) -> (i32, i32, i32, i32) {
    %c0_i32 = arith.constant 0 : i32
    %c0_i32_0 = arith.constant 0 : i32
    %c0_i32_1 = arith.constant 0 : i32
    %c0_i32_2 = arith.constant 0 : i32
    return %arg0, %c0_i32, %c0_i32_0, %c0_i32_1 : i32, i32, i32, i32
  }
  func.func @transform_8(%arg0: i32) -> (i32, i32, i32, i32) {
    %c0_i32 = arith.constant 0 : i32
    %c0_i32_0 = arith.constant 0 : i32
    %c0_i32_1 = arith.constant 0 : i32
    %c0_i32_2 = arith.constant 0 : i32
    return %arg0, %c0_i32, %c0_i32_0, %c0_i32_1 : i32, i32, i32, i32
  }
  func.func @transform_9(%arg0: i32) -> (i32, i32, i32, i32) {
    %c0_i32 = arith.constant 0 : i32
    %c0_i32_0 = arith.constant 0 : i32
    %c0_i32_1 = arith.constant 0 : i32
    %c0_i32_2 = arith.constant 0 : i32
    return %arg0, %c0_i32, %c0_i32_0, %c0_i32_1 : i32, i32, i32, i32
  }
  func.func @transform_10(%arg0: i32) -> (i32, i32, i32, i32) {
    %c0_i32 = arith.constant 0 : i32
    %c0_i32_0 = arith.constant 0 : i32
    %c0_i32_1 = arith.constant 0 : i32
    %c0_i32_2 = arith.constant 0 : i32
    return %arg0, %c0_i32, %c0_i32_0, %c0_i32_1 : i32, i32, i32, i32
  }
  func.func @transform_11(%arg0: i32) -> (i32, i32, i32) {
    %c0_i32 = arith.constant 0 : i32
    %c0_i32_0 = arith.constant 0 : i32
    %c0_i32_1 = arith.constant 0 : i32
    return %arg0, %c0_i32, %c0_i32_0 : i32, i32, i32
  }
  func.func @transform_12(%arg0: i32) -> (i32, i32, i32) {
    %c0_i32 = arith.constant 0 : i32
    %c0_i32_0 = arith.constant 0 : i32
    %c0_i32_1 = arith.constant 0 : i32
    return %arg0, %c0_i32, %c0_i32_0 : i32, i32, i32
  }
  func.func @transform_13(%arg0: i32) -> (i32, i32, i32) {
    %c0_i32 = arith.constant 0 : i32
    %c0_i32_0 = arith.constant 0 : i32
    %c0_i32_1 = arith.constant 0 : i32
    return %arg0, %c0_i32, %c0_i32_0 : i32, i32, i32
  }
  func.func @transform_14(%arg0: i32) -> (i32, i32, i32) {
    %c0_i32 = arith.constant 0 : i32
    %c0_i32_0 = arith.constant 0 : i32
    %c0_i32_1 = arith.constant 0 : i32
    return %arg0, %c0_i32, %c0_i32_0 : i32, i32, i32
  }
  func.func @transform_15(%arg0: i32) -> (i32, i32, i32) {
    %c0_i32 = arith.constant 0 : i32
    %c0_i32_0 = arith.constant 0 : i32
    %c0_i32_1 = arith.constant 0 : i32
    return %arg0, %c0_i32, %c0_i32_0 : i32, i32, i32
  }
  func.func @transform_16(%arg0: i32) -> (i32, i32, i32) {
    %c0_i32 = arith.constant 0 : i32
    %c0_i32_0 = arith.constant 0 : i32
    %c0_i32_1 = arith.constant 0 : i32
    return %arg0, %c0_i32, %c0_i32_0 : i32, i32, i32
  }
  func.func @transform_17(%arg0: i32) -> (i32, i32, i32) {
    %c0_i32 = arith.constant 0 : i32
    %c0_i32_0 = arith.constant 0 : i32
    %c0_i32_1 = arith.constant 0 : i32
    return %arg0, %c0_i32, %c0_i32_0 : i32, i32, i32
  }
  func.func @transform_18(%arg0: i32) -> (i32, i32, i32) {
    %c0_i32 = arith.constant 0 : i32
    %c0_i32_0 = arith.constant 0 : i32
    %c0_i32_1 = arith.constant 0 : i32
    return %arg0, %c0_i32, %c0_i32_0 : i32, i32, i32
  }
  func.func @transform_19(%arg0: i32) -> (i32, i32, i32) {
    %c0_i32 = arith.constant 0 : i32
    %c0_i32_0 = arith.constant 0 : i32
    %c0_i32_1 = arith.constant 0 : i32
    return %arg0, %c0_i32, %c0_i32_0 : i32, i32, i32
  }
  func.func @transform_20(%arg0: i32) -> (i32, i32) {
    %c0_i32 = arith.constant 0 : i32
    %c0_i32_0 = arith.constant 0 : i32
    %c0_i32_1 = arith.constant 0 : i32
    return %c0_i32, %c0_i32_0 : i32, i32
  }
  func.func @transform_21(%arg0: i32) -> (i32, i32) {
    %c0_i32 = arith.constant 0 : i32
    %c0_i32_0 = arith.constant 0 : i32
    %c0_i32_1 = arith.constant 0 : i32
    return %c0_i32, %c0_i32_0 : i32, i32
  }
  func.func @transform_22(%arg0: i32) -> (i32, i32) {
    %c0_i32 = arith.constant 0 : i32
    %c0_i32_0 = arith.constant 0 : i32
    %c0_i32_1 = arith.constant 0 : i32
    return %c0_i32, %c0_i32_0 : i32, i32
  }
  func.func @transform_23(%arg0: i32) -> (i32, i32) {
    %c0_i32 = arith.constant 0 : i32
    %c0_i32_0 = arith.constant 0 : i32
    %c0_i32_1 = arith.constant 0 : i32
    return %c0_i32, %c0_i32_0 : i32, i32
  }
  func.func @transform_24(%arg0: i32) -> (i32, i32) {
    %c0_i32 = arith.constant 0 : i32
    %c0_i32_0 = arith.constant 0 : i32
    %c0_i32_1 = arith.constant 0 : i32
    return %c0_i32, %c0_i32_0 : i32, i32
  }
  func.func @transform_25(%arg0: i32) -> (i32, i32) {
    %c0_i32 = arith.constant 0 : i32
    %c0_i32_0 = arith.constant 0 : i32
    %c0_i32_1 = arith.constant 0 : i32
    return %c0_i32, %c0_i32_0 : i32, i32
  }
  func.func @transform_26(%arg0: i32) -> (i32, i32) {
    %c0_i32 = arith.constant 0 : i32
    %c0_i32_0 = arith.constant 0 : i32
    %c0_i32_1 = arith.constant 0 : i32
    return %c0_i32, %c0_i32_0 : i32, i32
  }
  func.func @transform_27(%arg0: i32) -> (i32, i32) {
    %c0_i32 = arith.constant 0 : i32
    %c0_i32_0 = arith.constant 0 : i32
    %c0_i32_1 = arith.constant 0 : i32
    return %c0_i32, %c0_i32_0 : i32, i32
  }
  func.func @transform_28(%arg0: i32) -> (i32, i32) {
    %c0_i32 = arith.constant 0 : i32
    %c0_i32_0 = arith.constant 0 : i32
    %c0_i32_1 = arith.constant 0 : i32
    return %c0_i32, %c0_i32_0 : i32, i32
  }
  func.func @transform_29(%arg0: i32) -> (i32, i32) {
    %c0_i32 = arith.constant 0 : i32
    %c0_i32_0 = arith.constant 0 : i32
    %c0_i32_1 = arith.constant 0 : i32
    return %c0_i32, %c0_i32_0 : i32, i32
  }
  func.func @transform_30(%arg0: i32) -> (i32, i32) {
    %c0_i32 = arith.constant 0 : i32
    %c0_i32_0 = arith.constant 0 : i32
    %c0_i32_1 = arith.constant 0 : i32
    return %c0_i32, %c0_i32_0 : i32, i32
  }
  func.func @transform_31(%arg0: i32) -> (i32, i32) {
    %c0_i32 = arith.constant 0 : i32
    %c0_i32_0 = arith.constant 0 : i32
    %c0_i32_1 = arith.constant 0 : i32
    return %c0_i32, %c0_i32_0 : i32, i32
  }
  func.func @transform_32(%arg0: i32) -> (i32, i32) {
    %c0_i32 = arith.constant 0 : i32
    %c0_i32_0 = arith.constant 0 : i32
    %c0_i32_1 = arith.constant 0 : i32
    return %c0_i32, %c0_i32_0 : i32, i32
  }
  func.func @transform_33(%arg0: i32) -> (i32, i32) {
    %c0_i32 = arith.constant 0 : i32
    %c0_i32_0 = arith.constant 0 : i32
    %c0_i32_1 = arith.constant 0 : i32
    return %c0_i32, %c0_i32_0 : i32, i32
  }
}

</mosaic_0001>

<bundles_post_ra>
// kernel: forward.1
= control target key start
LH: loop header
LB: loop body
LE: loop exit
PB: predicated region body
PF: predicated region fallthrough
CT: control target
= control target key end

     0   :  { %s8058_s6 = smov 1   ;;  %s8059_s10 = smov 2   ;;  %s10429_s0 = inlined_call_operand.smem [shape: u32[34], index: -1, kind: input, shape index: {}] }
   0x1   :  { %s8146_s5 = sld [smem:[%s10429_s0]]   ;;  %s8060_s14 = smov 3  }
   0x2   :  { %s8151_s9 = sld [smem:[%s10429_s0 + %s8058_s6]]   ;;  %s8061_s18 = smov 4  }
   0x3   :  { %s8156_s13 = sld [smem:[%s10429_s0 + %s8059_s10]]   ;;  %s8062_s22 = smov 5  }
   0x4   :  { %s8161_s17 = sld [smem:[%s10429_s0 + %s8060_s14]]   ;;  %s8063_s26 = smov 6  }
   0x5   :  { %s8166_s21 = sld [smem:[%s10429_s0 + %s8061_s18]]   ;;  %s8064_s30 = smov 7  }
   0x6   :  { %s8171_s25 = sld [smem:[%s10429_s0 + %s8062_s22]]   ;;  %s8065_s4 = smov 8  }
   0x7   :  { %10501 = sst [smem:[#allocation60_spill]] %s8146_s5  ;;  %s8066_s10 = smov 9  }
   0x8   :  { %10502 = sst [smem:[#allocation61_spill]] %s8151_s9  ;;  %s8067_s15 = smov 10  }
   0x9   :  { %10503 = sst [smem:[#allocation62_spill]] %s8156_s13  ;;  %s8068_s20 = smov 11  }
   0xa   :  { %10504 = sst [smem:[#allocation63_spill]] %s8161_s17  ;;  %s8070_s1 = smov 13  }
   0xb   :  { %10505 = sst [smem:[#allocation64_spill]] %s8166_s21  ;;  %s8071_s7 = smov 14  }
   0xc   :  { %10506 = sst [smem:[#allocation65_spill]] %s8171_s25  ;;  %s8073_s22 = smov 16  }
   0xd   :  { %s8176_s29 = sld [smem:[%s10429_s0 + %s8063_s26]]   ;;  %s8069_s26 = smov 12  }
   0xe   :  { %s8181_s3 = sld [smem:[%s10429_s0 + %s8064_s30]]   ;;  %s8074_s28 = smov 17  }
   0xf   :  { %s8186_s8 = sld [smem:[%s10429_s0 + %s8065_s4]]  }
  0x10   :  { %s8191_s14 = sld [smem:[%s10429_s0 + %s8066_s10]]  }
  0x11   :  { %s8196_s19 = sld [smem:[%s10429_s0 + %s8067_s15]]   ;;  %s8072_s15 = smov 15  }
  0x12   :  { %s8201_s24 = sld [smem:[%s10429_s0 + %s8068_s20]]  }
  0x13   :  { %10507 = sst [smem:[#allocation66_spill]] %s8176_s29 }
  0x14   :  { %10508 = sst [smem:[#allocation67_spill]] %s8181_s3 }
  0x15   :  { %10509 = sst [smem:[#allocation68_spill]] %s8186_s8 }
  0x16   :  { %10510 = sst [smem:[#allocation69_spill]] %s8191_s14 }
  0x17   :  { %10511 = sst [smem:[#allocation70_spill]] %s8196_s19 }
  0x18   :  { %10512 = sst [smem:[#allocation71_spill]] %s8201_s24 }
  0x19   :  { %s8206_s30 = sld [smem:[%s10429_s0 + %s8069_s26]]  }
  0x1a   :  { %s8211_s6 = sld [smem:[%s10429_s0 + %s8070_s1]]  }
  0x1b   :  { %s8216_s12 = sld [smem:[%s10429_s0 + %s8071_s7]]   ;;  %s8075_s7 = smov 18  }
  0x1c   :  { %s8221_s20 = sld [smem:[%s10429_s0 + %s8072_s15]]   ;;  %s8076_s15 = smov 19  }
  0x1d   :  { %s8226_s27 = sld [smem:[%s10429_s0 + %s8073_s22]]   ;;  %s8077_s22 = smov 20  }
  0x1e   :  { %s8231_s4 = sld [smem:[%s10429_s0 + %s8074_s28]]   ;;  %s8078_s28 = smov 21  }
  0x1f   :  { %10513 = sst [smem:[#allocation72_spill]] %s8206_s30 }
  0x20   :  { %10514 = sst [smem:[#allocation73_spill]] %s8211_s6 }
  0x21   :  { %10515 = sst [smem:[#allocation74_spill]] %s8216_s12 }
  0x22   :  { %10516 = sst [smem:[#allocation75_spill]] %s8221_s20 }
  0x23   :  { %10517 = sst [smem:[#allocation76_spill]] %s8226_s27 }
  0x24   :  { %10518 = sst [smem:[#allocation77_spill]] %s8231_s4 }
  0x25   :  { %s8236_s12 = sld [smem:[%s10429_s0 + %s8075_s7]]   ;;  %s8079_s7 = smov 22  }
  0x26   :  { %s8241_s20 = sld [smem:[%s10429_s0 + %s8076_s15]]   ;;  %s8080_s15 = smov 23  }
  0x27   :  { %s8246_s27 = sld [smem:[%s10429_s0 + %s8077_s22]]   ;;  %s8081_s22 = smov 24  }
  0x28   :  { %s8251_s4 = sld [smem:[%s10429_s0 + %s8078_s28]]   ;;  %s8082_s28 = smov 25  }
  0x29   :  { %s8266_s6 = sld [smem:[%s10429_s0 + %s8081_s22]]   ;;  %s8085_s22 = smov 28  }
  0x2a   :  { %s8271_s30 = sld [smem:[%s10429_s0 + %s8082_s28]]   ;;  %s8086_s28 = smov 29  }
  0x2b   :  { %10519 = sst [smem:[#allocation78_spill]] %s8236_s12 }
  0x2c   :  { %10520 = sst [smem:[#allocation79_spill]] %s8241_s20 }
  0x2d   :  { %s8256_s12 = sld [smem:[%s10429_s0 + %s8079_s7]]   ;;  %s8083_s7 = smov 26  }
  0x2e   :  { %10521 = sst [smem:[#allocation80_spill]] %s8251_s4 }
  0x2f   :  { %s8261_s20 = sld [smem:[%s10429_s0 + %s8080_s15]]   ;;  %s8084_s15 = smov 27  }
  0x30   :  { %10523 = sst [smem:[#allocation82_spill]] %s8266_s6 }
  0x31   :  { %s8276_s24 = sld [smem:[%s10429_s0 + %s8083_s7]]   ;;  %s8087_s7 = smov 30  }
  0x32   :  { %s8281_s19 = sld [smem:[%s10429_s0 + %s8084_s15]]   ;;  %s8088_s15 = smov 31  }
  0x33   :  { %10522 = sst [smem:[#allocation81_spill]] %s8256_s12 }
  0x34   :  { %s8286_s14 = sld [smem:[%s10429_s0 + %s8085_s22]]   ;;  %s8089_s22 = smov 32  }
  0x35   :  { %s8291_s8 = sld [smem:[%s10429_s0 + %s8086_s28]]   ;;  %s8090_s28 = smov 33  }
  0x36   :  { %s8296_s3 = sld [smem:[%s10429_s0 + %s8087_s7]]  }
  0x37   :  { %s8301_s29 = sld [smem:[%s10429_s0 + %s8088_s15]]  }
  0x38   :  { %s8306_s25 = sld [smem:[%s10429_s0 + %s8089_s22]]  }
  0x39   :  { %s8311_s21 = sld [smem:[%s10429_s0 + %s8090_s28]]  }
  0x3a   :  { %10524 = sst [smem:[#allocation83_spill]] %s8286_s14 }
  0x3b   :  { %10525 = sst [smem:[#allocation84_spill]] %s8291_s8 }
  0x3c   :  { %10526 = sst [smem:[#allocation85_spill]] %s8296_s3 }
  0x3f   :  { %10527 = sst [smem:[#allocation86_spill]] %s8311_s21 }
  0x40   :  { %72 = vsyncpa [#allocation4], 0 }
  0x41   :  { %73 = vsyncpa [#allocation7], 0 }
  0x42   :  { %74 = vsyncpa [#allocation10], 0 }
  0x43   :  { %75 = vsyncpa [#allocation30], 0 }
  0x44   :  { %76 = vsyncpa [#allocation33], 0 }
  0x45   :  { %77 = vsyncpa [#allocation36], 0 }
  0x46   :  { %78 = vsyncpa [#allocation39], 0 }
  0x47   :  { %79 = vsyncpa [#allocation42], 0 }
  0x48   :  { %80 = vsyncpa [#allocation45], 0 }
  0x49   :  { %81 = vsyncpa [#allocation5], 0  ;;  %s8313_s7 = smov 0   ;;  %s8315_s10 = smov 0  }
  0x4a   :  { %s8317_s11 = smov 0   ;;  %s8319_s15 = smov 0  }
  0x4b LB: > { %s10528_s17 = sld [smem:[#allocation63_spill]]  ;;  %s10529_s14 = sld [smem:[#allocation83_spill]]  ;;  %s8048_s10 = sphi %s8315_s10, %s10609_s10   ;;  %s8044_s7 = sphi %s8313_s7, %s10607_s7   ;;  %s8056_s15 = sphi %s8319_s15, %s10606_s15   ;;  %s8052_s11 = sphi %s8317_s11, %s10610_s11  }
  0x4c   : > { %s10530_s13 = sld [smem:[#allocation62_spill]]  ;;  %s10531_s12 = sld [smem:[#allocation81_spill]] }
  0x4d   : > { %s10532_s9 = sld [smem:[#allocation61_spill]]  ;;  %s10533_s8 = sld [smem:[#allocation84_spill]] }
  0x4e   : > { %s10534_s6 = sld [smem:[#allocation82_spill]]  ;;  %s10535_s5 = sld [smem:[#allocation60_spill]] }
  0x4f   : > { %s10536_s4 = sld [smem:[#allocation80_spill]]  ;;  %s10537_s3 = sld [smem:[#allocation85_spill]] }
  0x50   : > { %10538 = sst [smem:[#allocation87_spill]] %s8048_s10  ;;  %s8332_s0 = sadd.s32 4294967295, %s8056_s15  }
  0x51   : > { %10539 = sst [smem:[#allocation88_spill]] %s8332_s0  ;;  %s8335_s16 = sadd.s32 1, %s8056_s15  }
  0x52   : > { %10540 = sst [smem:[#allocation89_spill]] %s8335_s16  ;;  %s175_s18 = ssub.s32 %s8056_s15, %s8335_s16 }
  0x53   : > { %s178_s22 = sadd.s32 1, %s8052_s11  ;;  %p176_p0 = scmp.eq.s32.totalorder %s175_s18, 0 }
  0x54   : > { %p185_p1 = scmp.ne.s32.totalorder %s8052_s11, %s8048_s10  ;;  %p186_p2 = scmp.eq.s32.totalorder %s8056_s15, 0 }
  0x55   : > { %p191_p3 = scmp.ne.s32.totalorder %s8048_s10, %s8044_s7  ;;  %p10451_p5 = scmp.eq.s32.totalorder %s8332_s0, 0 }
  0x56   : > { %s8345_s23 = scalar_select %p176_p0, %s8052_s11, %s178_s22  }
  0x57   : > { %p8347_p4 = por %p186_p2, %p185_p1  ;;  %p6239_p6 = scmp.ge.s32.totalorder %s8056_s15, 1 }
  0x58   : > { %10541 = sst [smem:[#allocation90_spill]] %s8345_s23  ;;  %p886_p7 = scmp.lt.s32.totalorder %s8056_s15, 3 }
  0x59   : > { %s10542_s26 = scalar_select %p8347_p4, 1, 0 }
  0x5a   : > { %p8356_p8 = por %p10451_p5, %p191_p3  ;;  %p8361_p10 = pnand %p6239_p6, %p886_p7 }
  0x5b   : > { %s8091_s2 = smov [#allocation6]   ;;  %s8092_s22 = smov [#allocation8]  }
  0x5c   : > { %s10543_s28 = scalar_select %p8356_p8, 1, 0 }
  0x5d   : > { %s10545_s1 = scalar_select %p8361_p10, 1, 0 }
  0x5e   : > { %10544 = sst [smem:[#allocation91_spill]] %s10543_s28  ;;  %p6762_p11 = pneg %p8361_p10 }
  0x5f   : > { %s911_s7 = sshll.u32 %s8091_s2, 4  ;;  %s925_s23 = sshll.u32 %s8092_s22, 4  ;;  %s8367_s7 = int_to_ptr.vmem [resolvable:$true] %s911_s7  ;;  %s8375_s23 = int_to_ptr.vmem [resolvable:$true] %s925_s23 }
  0x60   : > { %p8371_p12 = pnand %p6762_p11, %p10451_p5  ;;  %s8093_s16 = smov [#allocation9]  }
  0x61   : > { %s8377_s21 = sshll.u32 %s8093_s16, 4  ;;  %s7024_s28 = scalar_lea.hbm %s10532_s9, 256  ;;  %s937_s21 = int_to_ptr.vmem [resolvable:$true] %s8377_s21 }
  0x62   : > { %p7025_p13 = scmp.ne.s32.totalorder %s10532_s9, %s7024_s28  ;;  %p8383_p0 = pneg %p8371_p12 }
  0x63   : > { %p7031_p3 = scmp.lt.u32.totalorder %s7024_s28, %s10532_s9 }
  0x64   : > { %p7027_p1 = pnand %p8383_p0, %p7025_p13 }
  0x66   : > { %p7028_p2 = pneg %p7027_p1 }
  0x68   : > { %p7033_p6 = pnand %p7031_p3, %p7028_p2 }
  0x6a   : > { %7036 = shalt.err (!%p7033_p6)
}
  0x6b   : > { %s7037_s16 = scalar_lea.vmem %s8367_s7, 256  ;;  %p7045_p5 = scmp.lt.s32.totalorder %s8367_s7, %s8367_s7 }
  0x6c   : > { %p7038_p7 = scmp.ne.s32.totalorder %s8367_s7, %s7037_s16  ;;  %p7046_p8 = scmp.lt.s32.totalorder %s7037_s16, %s7037_s16 }
  0x6e   : > { %p7040_p11 = pnand %p7038_p7, %p8383_p0  ;;  %p7047_p10 = por %p7046_p8, %p7045_p5 }
  0x70   : > { %p7041_p9 = pneg %p7040_p11 }
  0x72   : > { %p7048_p4 = pnand %p7047_p10, %p7041_p9 }
  0x74   : > { %7051 = shalt.err (!%p7048_p4)
}
  0x75   : > { %s10459_s22 = smov 128   ;;  %s10461_s28 = smov 8  }
  0x76   : > { %6768 = dma.hbm_to_vmem [thread:$0]  (!%p8371_p12), %s10532_s9, 256, %s8367_s7, [#allocation7], %s10459_s22, %s10459_s22, %s10461_s28  }
  0x77   : > { %s7052_s10 = scalar_lea.hbm %s10530_s13, 16 }
  0x78   : > { %p7053_p13 = scmp.ne.s32.totalorder %s10530_s13, %s7052_s10  ;;  %p7059_p4 = scmp.lt.u32.totalorder %s7052_s10, %s10530_s13 }
  0x7a   : > { %p7055_p5 = pnand %p7053_p13, %p8383_p0 }
  0x7c   : > { %p7056_p8 = pneg %p7055_p5 }
  0x7e   : > { %p7061_p9 = pnand %p7059_p4, %p7056_p8 }
  0x80   : > { %7064 = shalt.err (!%p7061_p9)
}
  0x81   : > { %s7065_s16 = scalar_lea.vmem %s8375_s23, 16  ;;  %s7072_s0 = scalar_lea.vmem %s8375_s23, 32 }
  0x82   : > { %p7066_p10 = scmp.ne.s32.totalorder %s8375_s23, %s7065_s16  ;;  %p7073_p3 = scmp.lt.s32.totalorder %s8375_s23, %s8375_s23 }
  0x83   : > { %p7074_p6 = scmp.lt.s32.totalorder %s7072_s0, %s7065_s16 }
  0x84   : > { %p7068_p1 = pnand %p7066_p10, %p8383_p0 }
  0x85   : > { %p7075_p7 = por %p7074_p6, %p7073_p3 }
  0x86   : > { %p7069_p2 = pneg %p7068_p1 }
  0x88   : > { %p7076_p11 = pnand %p7075_p7, %p7069_p2 }
  0x8a   : > { %7079 = shalt.err (!%p7076_p11)
}
  0x8b   : > { %6771 = dma.hbm_to_vmem [thread:$0]  (!%p8371_p12), %s10530_s13, 16, %s8375_s23, [#allocation7]  }
  0x8c   : > { %s7080_s10 = scalar_lea.hbm %s10528_s17, 16 }
  0x8d   : > { %p7081_p13 = scmp.ne.s32.totalorder %s10528_s17, %s7080_s10  ;;  %p7087_p4 = scmp.lt.u32.totalorder %s7080_s10, %s10528_s17 }
  0x8f   : > { %p7083_p5 = pnand %p7081_p13, %p8383_p0 }
  0x91   : > { %p7084_p8 = pneg %p7083_p5 }
  0x93   : > { %p7089_p9 = pnand %p7087_p4, %p7084_p8 }
  0x95   : > { %7092 = shalt.err (!%p7089_p9)
}
  0x96   : > { %s7093_s0 = scalar_lea.vmem %s937_s21, 16  ;;  %s7100_s7 = scalar_lea.vmem %s937_s21, 32 }
  0x97   : > { %p7094_p10 = scmp.ne.s32.totalorder %s937_s21, %s7093_s0  ;;  %p7101_p3 = scmp.lt.s32.totalorder %s937_s21, %s937_s21 }
  0x98   : > { %p7102_p6 = scmp.lt.s32.totalorder %s7100_s7, %s7093_s0 }
  0x99   : > { %p7096_p1 = pnand %p7094_p10, %p8383_p0 }
  0x9a   : > { %p7103_p7 = por %p7102_p6, %p7101_p3 }
  0x9b   : > { %p7097_p2 = pneg %p7096_p1 }
  0x9d   : > { %p7104_p11 = pnand %p7103_p7, %p7097_p2 }
  0x9f   : > { %7107 = shalt.err (!%p7104_p11)
}
  0xa0   : > { %6774 = dma.hbm_to_vmem [thread:$0]  (!%p8371_p12), %s10528_s17, 16, %s937_s21, [#allocation10]  }
  0xa1   : > { %s8096_s23 = smov [#allocation29]   ;;  %s8097_s10 = smov [#allocation32]  }
  0xa2   : > { %s973_s16 = sshll.u32 %s8096_s23, 4  ;;  %s997_s22 = sshll.u32 %s8097_s10, 4  ;;  %s974_s16 = int_to_ptr.vmem [resolvable:$true] %s973_s16  ;;  %s998_s22 = int_to_ptr.vmem [resolvable:$true] %s997_s22 }
  0xa3   : > { %s7108_s28 = scalar_lea.hbm %s10531_s12, 32 }
  0xa4   : > { %p7109_p13 = scmp.ne.s32.totalorder %s10531_s12, %s7108_s28  ;;  %p7115_p4 = scmp.lt.u32.totalorder %s7108_s28, %s10531_s12 }
  0xa6   : > { %p7111_p5 = pnand %p7109_p13, %p8383_p0 }
  0xa8   : > { %p7112_p8 = pneg %p7111_p5 }
  0xaa   : > { %p7117_p9 = pnand %p7115_p4, %p7112_p8 }
  0xac   : > { %7120 = shalt.err (!%p7117_p9)
}
  0xad   : > { %s7121_s0 = scalar_lea.vmem %s974_s16, 32  ;;  %p7129_p3 = scmp.lt.s32.totalorder %s974_s16, %s974_s16 }
  0xae   : > { %p7122_p10 = scmp.ne.s32.totalorder %s974_s16, %s7121_s0  ;;  %p7130_p6 = scmp.lt.s32.totalorder %s7121_s0, %s7121_s0 }
  0xb0   : > { %p7124_p1 = pnand %p7122_p10, %p8383_p0  ;;  %p7131_p7 = por %p7130_p6, %p7129_p3 }
  0xb2   : > { %p7125_p2 = pneg %p7124_p1 }
  0xb4   : > { %p7132_p11 = pnand %p7131_p7, %p7125_p2 }
  0xb6   : > { %7135 = shalt.err (!%p7132_p11)
}
  0xb7   : > { %6783 = dma.hbm_to_vmem [thread:$0]  (!%p8371_p12), %s10531_s12, 32, %s974_s16, [#allocation30]  }
  0xb8   : > { %s7136_s21 = scalar_lea.hbm %s10534_s6, 16 }
  0xb9   : > { %p7137_p13 = scmp.ne.s32.totalorder %s10534_s6, %s7136_s21  ;;  %p7143_p4 = scmp.lt.u32.totalorder %s7136_s21, %s10534_s6 }
  0xbb   : > { %p7139_p5 = pnand %p7137_p13, %p8383_p0 }
  0xbd   : > { %p7140_p8 = pneg %p7139_p5 }
  0xbf   : > { %p7145_p9 = pnand %p7143_p4, %p7140_p8 }
  0xc1   : > { %7148 = shalt.err (!%p7145_p9)
}
  0xc2   : > { %s7149_s28 = scalar_lea.vmem %s998_s22, 16  ;;  %s7156_s7 = scalar_lea.vmem %s998_s22, 32 }
  0xc3   : > { %p7150_p10 = scmp.ne.s32.totalorder %s998_s22, %s7149_s28  ;;  %p7157_p3 = scmp.lt.s32.totalorder %s998_s22, %s998_s22 }
  0xc4   : > { %p7158_p6 = scmp.lt.s32.totalorder %s7156_s7, %s7149_s28 }
  0xc5   : > { %p7152_p1 = pnand %p7150_p10, %p8383_p0 }
  0xc6   : > { %p7159_p7 = por %p7158_p6, %p7157_p3 }
  0xc7   : > { %p7153_p2 = pneg %p7152_p1 }
  0xc9   : > { %p7160_p11 = pnand %p7159_p7, %p7153_p2 }
  0xcb   : > { %7163 = shalt.err (!%p7160_p11)
}
  0xcc   : > { %6789 = dma.hbm_to_vmem [thread:$0]  (!%p8371_p12), %s10534_s6, 16, %s998_s22, [#allocation33]  }
  0xcd   : > { %s8098_s23 = smov [#allocation35]   ;;  %s8099_s10 = smov [#allocation38]  }
  0xce   : > { %s1021_s16 = sshll.u32 %s8098_s23, 4  ;;  %s1043_s0 = sshll.u32 %s8099_s10, 4  ;;  %s1022_s16 = int_to_ptr.vmem [resolvable:$true] %s1021_s16  ;;  %s1044_s0 = int_to_ptr.vmem [resolvable:$true] %s1043_s0 }
  0xcf   : > { %s7164_s21 = scalar_lea.hbm %s8276_s24, 16 }
  0xd0   : > { %p7165_p13 = scmp.ne.s32.totalorder %s8276_s24, %s7164_s21  ;;  %p7171_p4 = scmp.lt.u32.totalorder %s7164_s21, %s8276_s24 }
  0xd2   : > { %p7167_p5 = pnand %p7165_p13, %p8383_p0 }
  0xd4   : > { %p7168_p8 = pneg %p7167_p5 }
  0xd6   : > { %p7173_p9 = pnand %p7171_p4, %p7168_p8 }
  0xd8   : > { %7176 = shalt.err (!%p7173_p9)
}
  0xd9   : > { %s7177_s28 = scalar_lea.vmem %s1022_s16, 16  ;;  %s7184_s22 = scalar_lea.vmem %s1022_s16, 32 }
  0xda   : > { %p7178_p10 = scmp.ne.s32.totalorder %s1022_s16, %s7177_s28  ;;  %p7185_p3 = scmp.lt.s32.totalorder %s1022_s16, %s1022_s16 }
  0xdb   : > { %p7186_p6 = scmp.lt.s32.totalorder %s7184_s22, %s7177_s28 }
  0xdc   : > { %p7180_p1 = pnand %p7178_p10, %p8383_p0 }
  0xdd   : > { %p7187_p7 = por %p7186_p6, %p7185_p3 }
  0xde   : > { %p7181_p2 = pneg %p7180_p1 }
  0xe0   : > { %p7188_p11 = pnand %p7187_p7, %p7181_p2 }
  0xe2   : > { %7191 = shalt.err (!%p7188_p11)
}
  0xe3   : > { %6795 = dma.hbm_to_vmem [thread:$0]  (!%p8371_p12), %s8276_s24, 16, %s1022_s16, [#allocation36]  }
  0xe4   : > { %s7192_s7 = scalar_lea.hbm %s10529_s14, 16 }
  0xe5   : > { %p7193_p13 = scmp.ne.s32.totalorder %s10529_s14, %s7192_s7  ;;  %p7199_p4 = scmp.lt.u32.totalorder %s7192_s7, %s10529_s14 }
  0xe7   : > { %p7195_p5 = pnand %p7193_p13, %p8383_p0 }
  0xe9   : > { %p7196_p8 = pneg %p7195_p5 }
  0xeb   : > { %p7201_p9 = pnand %p7199_p4, %p7196_p8 }
  0xed   : > { %7204 = shalt.err (!%p7201_p9)
}
  0xee   : > { %s7205_s23 = scalar_lea.vmem %s1044_s0, 16  ;;  %s7212_s10 = scalar_lea.vmem %s1044_s0, 32 }
  0xef   : > { %p7206_p10 = scmp.ne.s32.totalorder %s1044_s0, %s7205_s23  ;;  %p7213_p3 = scmp.lt.s32.totalorder %s1044_s0, %s1044_s0 }
  0xf0   : > { %p7214_p6 = scmp.lt.s32.totalorder %s7212_s10, %s7205_s23 }
  0xf1   : > { %p7208_p1 = pnand %p7206_p10, %p8383_p0 }
  0xf2   : > { %p7215_p7 = por %p7214_p6, %p7213_p3 }
  0xf3   : > { %p7209_p2 = pneg %p7208_p1 }
  0xf5   : > { %p7216_p11 = pnand %p7215_p7, %p7209_p2 }
  0xf7   : > { %7219 = shalt.err (!%p7216_p11)
}
  0xf8   : > { %6801 = dma.hbm_to_vmem [thread:$0]  (!%p8371_p12), %s10529_s14, 16, %s1044_s0, [#allocation39]  }
  0xf9   : > { %s8100_s16 = smov [#allocation41]   ;;  %s8101_s28 = smov [#allocation3]  }
  0xfa   : > { %s1066_s21 = sshll.u32 %s8100_s16, 4  ;;  %s898_s22 = sshll.u32 %s8101_s28, 4  ;;  %s1067_s21 = int_to_ptr.vmem [resolvable:$true] %s1066_s21  ;;  %s899_s22 = int_to_ptr.vmem [resolvable:$true] %s898_s22 }
  0xfb   : > { %s7220_s7 = scalar_lea.hbm %s10537_s3, 128 }
  0xfc   : > { %p7221_p13 = scmp.ne.s32.totalorder %s10537_s3, %s7220_s7  ;;  %p7227_p4 = scmp.lt.u32.totalorder %s7220_s7, %s10537_s3 }
  0xfe   : > { %p7223_p5 = pnand %p7221_p13, %p8383_p0 }
 0x100   : > { %p7224_p8 = pneg %p7223_p5 }
 0x102   : > { %p7229_p9 = pnand %p7227_p4, %p7224_p8 }
 0x104   : > { %7232 = shalt.err (!%p7229_p9)
}
 0x105   : > { %s7233_s23 = scalar_lea.vmem %s1067_s21, 128  ;;  %p7241_p3 = scmp.lt.s32.totalorder %s1067_s21, %s1067_s21 }
 0x106   : > { %p7234_p10 = scmp.ne.s32.totalorder %s1067_s21, %s7233_s23  ;;  %p7242_p6 = scmp.lt.s32.totalorder %s7233_s23, %s7233_s23 }
 0x108   : > { %p7236_p1 = pnand %p7234_p10, %p8383_p0  ;;  %p7243_p7 = por %p7242_p6, %p7241_p3 }
 0x10a   : > { %p7237_p2 = pneg %p7236_p1 }
 0x10c   : > { %p7244_p11 = pnand %p7243_p7, %p7237_p2 }
 0x10e   : > { %7247 = shalt.err (!%p7244_p11)
}
 0x10f   : > { %s10463_s0 = smov 64   ;;  %s10465_s10 = smov 4  }
 0x110   : > { %6807 = dma.hbm_to_vmem [thread:$0]  (!%p8371_p12), %s10537_s3, 128, %s1067_s21, [#allocation42], %s10463_s0, %s10463_s0, %s10465_s10  }
 0x111   : > { %s7248_s16 = scalar_lea.hbm %s10535_s5, 256 }
 0x112   : > { %p7249_p13 = scmp.ne.s32.totalorder %s10535_s5, %s7248_s16  ;;  %p7255_p4 = scmp.lt.u32.totalorder %s7248_s16, %s10535_s5 }
 0x114   : > { %p7251_p5 = pnand %p7249_p13, %p8383_p0 }
 0x116   : > { %p7252_p8 = pneg %p7251_p5 }
 0x118   : > { %p7257_p9 = pnand %p7255_p4, %p7252_p8 }
 0x11a   : > { %7260 = shalt.err (!%p7257_p9)
}
 0x11b   : > { %s7261_s28 = scalar_lea.vmem %s899_s22, 256  ;;  %p7269_p3 = scmp.lt.s32.totalorder %s899_s22, %s899_s22 }
 0x11c   : > { %p7262_p10 = scmp.ne.s32.totalorder %s899_s22, %s7261_s28  ;;  %p7270_p6 = scmp.lt.s32.totalorder %s7261_s28, %s7261_s28 }
 0x11e   : > { %p7264_p1 = pnand %p7262_p10, %p8383_p0  ;;  %p7271_p7 = por %p7270_p6, %p7269_p3 }
 0x120   : > { %p7265_p2 = pneg %p7264_p1 }
 0x122   : > { %p7272_p11 = pnand %p7271_p7, %p7265_p2 }
 0x124   : > { %7275 = shalt.err (!%p7272_p11)
}
 0x125   : > { %s10548_s21 = smov 8   ;;  %s10549_s7 = smov 128  }
 0x126   : > { %6765 = dma.hbm_to_vmem [thread:$0]  (!%p8371_p12), %s10535_s5, 256, %s899_s22, [#allocation4], %s10549_s7, %s10549_s7, %s10548_s21  }
 0x127   : > { %s8104_s23 = smov [#allocation27]   ;;  %s8105_s0 = smov [#allocation28]  }
 0x128   : > { %s946_s16 = sshll.u32 %s8104_s23, 4  ;;  %s959_s10 = sshll.u32 %s8105_s0, 4  ;;  %s947_s16 = int_to_ptr.vmem [resolvable:$true] %s946_s16  ;;  %s960_s10 = int_to_ptr.vmem [resolvable:$true] %s959_s10 }
 0x129   : > { %s7276_s28 = scalar_lea.hbm %s8246_s27, 512 }
 0x12a   : > { %p7277_p13 = scmp.ne.s32.totalorder %s8246_s27, %s7276_s28  ;;  %p7283_p4 = scmp.lt.u32.totalorder %s7276_s28, %s8246_s27 }
 0x12c   : > { %p7279_p5 = pnand %p7277_p13, %p8383_p0 }
 0x12e   : > { %p7280_p8 = pneg %p7279_p5 }
 0x130   : > { %p7285_p9 = pnand %p7283_p4, %p7280_p8 }
 0x132   : > { %7288 = shalt.err (!%p7285_p9)
}
 0x133   : > { %s7289_s3 = scalar_lea.vmem %s947_s16, 512  ;;  %p7297_p3 = scmp.lt.s32.totalorder %s947_s16, %s947_s16 }
 0x134   : > { %p7290_p10 = scmp.ne.s32.totalorder %s947_s16, %s7289_s3  ;;  %p7298_p6 = scmp.lt.s32.totalorder %s7289_s3, %s7289_s3 }
 0x136   : > { %p7292_p1 = pnand %p7290_p10, %p8383_p0  ;;  %p7299_p7 = por %p7298_p6, %p7297_p3 }
 0x138   : > { %p7293_p2 = pneg %p7292_p1 }
 0x13a   : > { %p7300_p11 = pnand %p7299_p7, %p7293_p2 }
 0x13c   : > { %7303 = shalt.err (!%p7300_p11)
}
 0x13d   : > { %6777 = dma.hbm_to_vmem [thread:$0]  (!%p8371_p12), %s8246_s27, 512, %s947_s16, [#allocation7], %s10549_s7, %s10549_s7, %s10548_s21  }
 0x13e   : > { %s7304_s22 = scalar_lea.hbm %s10536_s4, 512 }
 0x13f   : > { %p7305_p13 = scmp.ne.s32.totalorder %s10536_s4, %s7304_s22  ;;  %p7311_p4 = scmp.lt.u32.totalorder %s7304_s22, %s10536_s4 }
 0x141   : > { %p7307_p5 = pnand %p7305_p13, %p8383_p0 }
 0x143   : > { %p7308_p8 = pneg %p7307_p5 }
 0x145   : > { %p7313_p9 = pnand %p7311_p4, %p7308_p8 }
 0x147   : > { %7316 = shalt.err (!%p7313_p9)
}
 0x148   : > { %s7317_s3 = scalar_lea.vmem %s960_s10, 512  ;;  %p7325_p3 = scmp.lt.s32.totalorder %s960_s10, %s960_s10 }
 0x149   : > { %p7318_p10 = scmp.ne.s32.totalorder %s960_s10, %s7317_s3  ;;  %p7326_p6 = scmp.lt.s32.totalorder %s7317_s3, %s7317_s3 }
 0x14b   : > { %p7320_p1 = pnand %p7318_p10, %p8383_p0  ;;  %p7327_p7 = por %p7326_p6, %p7325_p3 }
 0x14d   : > { %p7321_p2 = pneg %p7320_p1 }
 0x14f   : > { %p7328_p11 = pnand %p7327_p7, %p7321_p2 }
 0x151   : > { %7331 = shalt.err (!%p7328_p11)
}
 0x152   : > { %6780 = dma.hbm_to_vmem [thread:$0]  (!%p8371_p12), %s10536_s4, 512, %s960_s10, [#allocation10], %s10549_s7, %s10549_s7, %s10548_s21  }
 0x153   : > { %s8106_s0 = smov [#allocation31]   ;;  %s8107_s16 = smov [#allocation34]  }
 0x154   : > { %s983_s23 = sshll.u32 %s8106_s0, 4  ;;  %s1007_s28 = sshll.u32 %s8107_s16, 4  ;;  %s984_s23 = int_to_ptr.vmem [resolvable:$true] %s983_s23  ;;  %s1008_s28 = int_to_ptr.vmem [resolvable:$true] %s1007_s28 }
 0x155   : > { %s7332_s22 = scalar_lea.hbm %s8261_s20, 256 }
 0x156   : > { %p7333_p13 = scmp.ne.s32.totalorder %s8261_s20, %s7332_s22  ;;  %p7339_p4 = scmp.lt.u32.totalorder %s7332_s22, %s8261_s20 }
 0x158   : > { %p7335_p5 = pnand %p7333_p13, %p8383_p0 }
 0x15a   : > { %p7336_p8 = pneg %p7335_p5 }
 0x15c   : > { %p7341_p9 = pnand %p7339_p4, %p7336_p8 }
 0x15e   : > { %7344 = shalt.err (!%p7341_p9)
}
 0x15f   : > { %s7345_s3 = scalar_lea.vmem %s984_s23, 256  ;;  %p7353_p3 = scmp.lt.s32.totalorder %s984_s23, %s984_s23 }
 0x160   : > { %p7346_p10 = scmp.ne.s32.totalorder %s984_s23, %s7345_s3  ;;  %p7354_p6 = scmp.lt.s32.totalorder %s7345_s3, %s7345_s3 }
 0x162   : > { %p7348_p1 = pnand %p7346_p10, %p8383_p0  ;;  %p7355_p7 = por %p7354_p6, %p7353_p3 }
 0x164   : > { %p7349_p2 = pneg %p7348_p1 }
 0x166   : > { %p7356_p11 = pnand %p7355_p7, %p7349_p2 }
 0x168   : > { %7359 = shalt.err (!%p7356_p11)
}
 0x169   : > { %s10550_s10 = smov 4   ;;  %s10551_s21 = smov 64  }
 0x16a   : > { %6786 = dma.hbm_to_vmem [thread:$0]  (!%p8371_p12), %s8261_s20, 256, %s984_s23, [#allocation30], %s10551_s21, %s10551_s21, %s10550_s10  }
 0x16b   : > { %s7360_s7 = scalar_lea.hbm %s8271_s30, 256 }
 0x16c   : > { %p7361_p13 = scmp.ne.s32.totalorder %s8271_s30, %s7360_s7  ;;  %p7367_p4 = scmp.lt.u32.totalorder %s7360_s7, %s8271_s30 }
 0x16e   : > { %p7363_p5 = pnand %p7361_p13, %p8383_p0 }
 0x170   : > { %p7364_p8 = pneg %p7363_p5 }
 0x172   : > { %p7369_p9 = pnand %p7367_p4, %p7364_p8 }
 0x174   : > { %7372 = shalt.err (!%p7369_p9)
}
 0x175   : > { %s7373_s0 = scalar_lea.vmem %s1008_s28, 256  ;;  %p7381_p3 = scmp.lt.s32.totalorder %s1008_s28, %s1008_s28 }
 0x176   : > { %p7374_p10 = scmp.ne.s32.totalorder %s1008_s28, %s7373_s0  ;;  %p7382_p6 = scmp.lt.s32.totalorder %s7373_s0, %s7373_s0 }
 0x178   : > { %p7376_p1 = pnand %p7374_p10, %p8383_p0  ;;  %p7383_p7 = por %p7382_p6, %p7381_p3 }
 0x17a   : > { %p7377_p2 = pneg %p7376_p1 }
 0x17c   : > { %p7384_p11 = pnand %p7383_p7, %p7377_p2 }
 0x17e   : > { %7387 = shalt.err (!%p7384_p11)
}
 0x17f   : > { %6792 = dma.hbm_to_vmem [thread:$0]  (!%p8371_p12), %s8271_s30, 256, %s1008_s28, [#allocation33], %s10551_s21, %s10551_s21, %s10550_s10  }
 0x180   : > { %s8108_s23 = smov [#allocation37]   ;;  %s8109_s22 = smov [#allocation40]  }
 0x181   : > { %s1032_s16 = sshll.u32 %s8108_s23, 4  ;;  %s1053_s3 = sshll.u32 %s8109_s22, 4  ;;  %s1033_s16 = int_to_ptr.vmem [resolvable:$true] %s1032_s16  ;;  %s1054_s3 = int_to_ptr.vmem [resolvable:$true] %s1053_s3 }
 0x182   : > { %s7388_s7 = scalar_lea.hbm %s8281_s19, 16 }
 0x183   : > { %p7389_p13 = scmp.ne.s32.totalorder %s8281_s19, %s7388_s7  ;;  %p7395_p4 = scmp.lt.u32.totalorder %s7388_s7, %s8281_s19 }
 0x185   : > { %p7391_p5 = pnand %p7389_p13, %p8383_p0 }
 0x187   : > { %p7392_p8 = pneg %p7391_p5 }
 0x189   : > { %p7397_p9 = pnand %p7395_p4, %p7392_p8 }
 0x18b   : > { %7400 = shalt.err (!%p7397_p9)
}
 0x18c   : > { %s7401_s0 = scalar_lea.vmem %s1033_s16, 16  ;;  %s7408_s28 = scalar_lea.vmem %s1033_s16, 32 }
 0x18d   : > { %p7402_p10 = scmp.ne.s32.totalorder %s1033_s16, %s7401_s0  ;;  %p7409_p3 = scmp.lt.s32.totalorder %s1033_s16, %s1033_s16 }
 0x18e   : > { %p7410_p6 = scmp.lt.s32.totalorder %s7408_s28, %s7401_s0 }
 0x18f   : > { %p7404_p1 = pnand %p7402_p10, %p8383_p0 }
 0x190   : > { %p7411_p7 = por %p7410_p6, %p7409_p3 }
 0x191   : > { %p7405_p2 = pneg %p7404_p1 }
 0x193   : > { %p7412_p11 = pnand %p7411_p7, %p7405_p2 }
 0x195   : > { %7415 = shalt.err (!%p7412_p11)
}
 0x196   : > { %6798 = dma.hbm_to_vmem [thread:$0]  (!%p8371_p12), %s8281_s19, 16, %s1033_s16, [#allocation36]  }
 0x197   : > { %s7416_s23 = scalar_lea.hbm %s10533_s8, 256 }
 0x198   : > { %p7417_p13 = scmp.ne.s32.totalorder %s10533_s8, %s7416_s23  ;;  %p7423_p4 = scmp.lt.u32.totalorder %s7416_s23, %s10533_s8 }
 0x19a   : > { %p7419_p5 = pnand %p7417_p13, %p8383_p0 }
 0x19c   : > { %p7420_p8 = pneg %p7419_p5 }
 0x19e   : > { %p7425_p9 = pnand %p7423_p4, %p7420_p8 }
 0x1a0   : > { %7428 = shalt.err (!%p7425_p9)
}
 0x1a1   : > { %s7429_s22 = scalar_lea.vmem %s1054_s3, 256  ;;  %p7437_p3 = scmp.lt.s32.totalorder %s1054_s3, %s1054_s3 }
 0x1a2   : > { %p7430_p10 = scmp.ne.s32.totalorder %s1054_s3, %s7429_s22  ;;  %p7438_p6 = scmp.lt.s32.totalorder %s7429_s22, %s7429_s22 }
 0x1a4   : > { %p7432_p1 = pnand %p7430_p10, %p8383_p0  ;;  %p7439_p7 = por %p7438_p6, %p7437_p3 }
 0x1a6   : > { %p7433_p2 = pneg %p7432_p1 }
 0x1a8   : > { %p7440_p11 = pnand %p7439_p7, %p7433_p2 }
 0x1aa   : > { %7443 = shalt.err (!%p7440_p11)
}
 0x1ab   : > { %6804 = dma.hbm_to_vmem [thread:$0]  (!%p8371_p12), %s10533_s8, 256, %s1054_s3, [#allocation39], %s10551_s21, %s10551_s21, %s10550_s10  }
 0x1ac   : > { %s8110_s16 = smov [#allocation43]   ;;  %s8111_s0 = smov [#allocation44]  }
 0x1ad   : > { %s1079_s7 = sshll.u32 %s8110_s16, 4  ;;  %s1093_s28 = sshll.u32 %s8111_s0, 4  ;;  %s1080_s7 = int_to_ptr.vmem [resolvable:$true] %s1079_s7  ;;  %s1094_s28 = int_to_ptr.vmem [resolvable:$true] %s1093_s28 }
 0x1ae   : > { %s7444_s23 = scalar_lea.hbm %s8301_s29, 128 }
 0x1af   : > { %p7445_p13 = scmp.ne.s32.totalorder %s8301_s29, %s7444_s23  ;;  %p7451_p4 = scmp.lt.u32.totalorder %s7444_s23, %s8301_s29 }
 0x1b1   : > { %p7447_p5 = pnand %p7445_p13, %p8383_p0 }
 0x1b3   : > { %p7448_p8 = pneg %p7447_p5 }
 0x1b5   : > { %p7453_p9 = pnand %p7451_p4, %p7448_p8 }
 0x1b7   : > { %7456 = shalt.err (!%p7453_p9)
}
 0x1b8   : > { %s7457_s22 = scalar_lea.vmem %s1080_s7, 128  ;;  %p7465_p3 = scmp.lt.s32.totalorder %s1080_s7, %s1080_s7 }
 0x1b9   : > { %p7458_p10 = scmp.ne.s32.totalorder %s1080_s7, %s7457_s22  ;;  %p7466_p6 = scmp.lt.s32.totalorder %s7457_s22, %s7457_s22 }
 0x1bb   : > { %p7460_p1 = pnand %p7458_p10, %p8383_p0  ;;  %p7467_p7 = por %p7466_p6, %p7465_p3 }
 0x1bd   : > { %p7461_p2 = pneg %p7460_p1 }
 0x1bf   : > { %p7468_p11 = pnand %p7467_p7, %p7461_p2 }
 0x1c1   : > { %7471 = shalt.err (!%p7468_p11)
}
 0x1c2   : > { %6810 = dma.hbm_to_vmem [thread:$0]  (!%p8371_p12), %s8301_s29, 128, %s1080_s7, [#allocation42], %s10551_s21, %s10551_s21, %s10550_s10  }
 0x1c3   : > { %s7472_s3 = scalar_lea.hbm %s8306_s25, 16 }
 0x1c4   : > { %p7473_p13 = scmp.ne.s32.totalorder %s8306_s25, %s7472_s3  ;;  %p7479_p4 = scmp.lt.u32.totalorder %s7472_s3, %s8306_s25 }
 0x1c6   : > { %p7475_p5 = pnand %p7473_p13, %p8383_p0 }
 0x1c8   : > { %p7476_p8 = pneg %p7475_p5 }
 0x1ca   : > { %p7481_p9 = pnand %p7479_p4, %p7476_p8 }
 0x1cc   : > { %7484 = shalt.err (!%p7481_p9)
}
 0x1cd   : > { %s7485_s16 = scalar_lea.vmem %s1094_s28, 16  ;;  %s7492_s0 = scalar_lea.vmem %s1094_s28, 32 }
 0x1ce   : > { %p7486_p10 = scmp.ne.s32.totalorder %s1094_s28, %s7485_s16  ;;  %p7493_p3 = scmp.lt.s32.totalorder %s1094_s28, %s1094_s28 }
 0x1cf   : > { %p7494_p6 = scmp.lt.s32.totalorder %s7492_s0, %s7485_s16 }
 0x1d0   : > { %p7488_p1 = pnand %p7486_p10, %p8383_p0 }
 0x1d1   : > { %p7495_p7 = por %p7494_p6, %p7493_p3 }
 0x1d2   : > { %p7489_p2 = pneg %p7488_p1 }
 0x1d4   : > { %p7496_p11 = pnand %p7495_p7, %p7489_p2 }
 0x1d6   : > { %7499 = shalt.err (!%p7496_p11)
}
 0x1d7   : > { %6813 = dma.hbm_to_vmem [thread:$0]  (!%p8371_p12), %s8306_s25, 16, %s1094_s28, [#allocation45]  }
 0x1d8   : > { %p6257_p13 = scmp.ge.s32.totalorder %s8056_s15, 2 }
 0x1d9   : > { %s10552_s10 = sld [smem:[#allocation64_spill]] (!%p6257_p13)  ;;  %s1104_s2 = sand.u32 (!%p6257_p13), 1, %s8056_s15  }
 0x1da   : > { %1100 = sbr.rel (%p6257_p13) target bundleno = 884 (0x374), region = 84  ;;  %s8597_s7 = sand.u32 (!%p6257_p13), 1, %s8052_s11  }
 0x1db   : > { %s8600_s23 = sshll.u32 (!%p6257_p13), %s8597_s7, 5  ;;  %s8603_s18 = sshll.u32 (!%p6257_p13), %s8056_s15, 9 }
 0x1dc   : > { %s1108_s22 = scalar_lea.vmem (!%p6257_p13), [#allocation11], %s8600_s23  ;;  %s8613_s16 = sshll.u32 (!%p6257_p13), %s8597_s7, 1 }
 0x1dd   : > { %s1115_s3 = sshll.u32 (!%p6257_p13), %s1108_s22, 4  ;;  %s8615_s0 = scalar_lea.sflag (!%p6257_p13), [#allocation4], %s1104_s2  ;;  %s8610_s3 = int_to_ptr.vmem [resolvable:$true] %s1115_s3 }
 0x1de   : > { %p10554_p0 = scmp.ne.s32.totalorder (!%p6257_p13), %s10542_s26, 0 }
 0x1df   : > { %s10553_s21 = smov (!%p6257_p13), %s10552_s10  ;;  %s8607_s28 = scalar_lea.hbm (!%p6257_p13), %s10552_s10, %s8603_s18 }
 0x1e0   : > { %s7500_s4 = scalar_lea.hbm (!%p6257_p13), %s8607_s28, 512  ;;  %s7504_s5 = scalar_lea.hbm (!%p6257_p13), %s10553_s21, 1024 }
 0x1e1   : > { %p7501_p12 = scmp.ne.s32.totalorder %s8607_s28, %s7500_s4  ;;  %p7505_p4 = scmp.lt.u32.totalorder %s8607_s28, %s10553_s21 }
 0x1e2   : > { %p7506_p9 = scmp.lt.u32.totalorder %s7504_s5, %s7500_s4  ;;  %p7508_p1 = scmp.lt.u32.totalorder %s7500_s4, %s8607_s28 }
 0x1e3   : > { %p7502_p5 = pnand %p7501_p12, %p10554_p0 }
 0x1e4   : > { %p7507_p10 = por %p7506_p9, %p7505_p4 }
 0x1e5   : > { %p7503_p8 = pneg %p7502_p5 }
 0x1e6   : > { %p7509_p2 = por %p7508_p1, %p7507_p10 }
 0x1e8   : > { %p7510_p3 = pnand %p7509_p2, %p7503_p8 }
 0x1ea   : > { %7513 = shalt.err (!%p7510_p3)
}
 0x1eb   : > { %s7514_s10 = scalar_lea.vmem %s8610_s3, 512  ;;  %s8112_s2 = smov [#allocation11]  }
 0x1ec   : > { %p7515_p6 = scmp.ne.s32.totalorder %s8610_s3, %s7514_s10  ;;  %s7518_s22 = sshll.u32 %s8112_s2, 4  ;;  %s7519_s22 = int_to_ptr.vmem [resolvable:$false] %s7518_s22 }
 0x1ed   : > { %s7520_s6 = scalar_lea.vmem %s7519_s22, 1024  ;;  %p7521_p13 = scmp.lt.s32.totalorder %s8610_s3, %s7519_s22 }
 0x1ee   : > { %p7516_p7 = pnand %p7515_p6, %p10554_p0  ;;  %p7522_p12 = scmp.lt.s32.totalorder %s7520_s6, %s7514_s10 }
 0x1f0   : > { %p7517_p11 = pneg %p7516_p7  ;;  %p7523_p5 = por %p7522_p12, %p7521_p13 }
 0x1f2   : > { %p7524_p4 = pnand %p7523_p5, %p7517_p11 }
 0x1f4   : > { %7527 = shalt.err (!%p7524_p4)
}
 0x1f5   : > { %s10474_s5 = smov 64   ;;  %s10555_s4 = sld [smem:[#allocation65_spill]] }
 0x1f6   : > { %s10476_s8 = smov 4   ;;  %s8639_s6 = sshll.u32 %s8056_s15, 5 }
 0x1f7   : > { %6692 = dma.hbm_to_vmem [thread:$0]  (%p10554_p0), %s8607_s28, 512, %s8610_s3, %s8615_s0, %s10474_s5, %s10474_s5, %s10476_s8  }
 0x1f8   : > { %s1129_s2 = scalar_lea.vmem [#allocation12], %s8613_s16 }
 0x1f9   : > { %s1136_s22 = sshll.u32 %s1129_s2, 4  ;;  %s8646_s22 = int_to_ptr.vmem [resolvable:$true] %s1136_s22 }
 0x1fb   : > { %s8643_s10 = scalar_lea.hbm %s10555_s4, %s8639_s6  ;;  %s7532_s12 = scalar_lea.hbm %s10555_s4, 64 }
 0x1fc   : > { %s7528_s9 = scalar_lea.hbm %s8643_s10, 32  ;;  %p7533_p1 = scmp.lt.u32.totalorder %s8643_s10, %s10555_s4 }
 0x1fd   : > { %p7529_p8 = scmp.ne.s32.totalorder %s8643_s10, %s7528_s9  ;;  %p7534_p2 = scmp.lt.u32.totalorder %s7532_s12, %s7528_s9 }
 0x1fe   : > { %p7536_p6 = scmp.lt.u32.totalorder %s7528_s9, %s8643_s10 }
 0x1ff   : > { %p7530_p9 = pnand %p7529_p8, %p10554_p0  ;;  %p7535_p3 = por %p7534_p2, %p7533_p1 }
 0x201   : > { %p7531_p10 = pneg %p7530_p9  ;;  %p7537_p7 = por %p7536_p6, %p7535_p3 }
 0x203   : > { %p7538_p11 = pnand %p7537_p7, %p7531_p10 }
 0x205   : > { %7541 = shalt.err (!%p7538_p11)
}
 0x206   : > { %s7542_s28 = scalar_lea.vmem %s8646_s22, 32  ;;  %s8115_s3 = smov [#allocation12]  }
 0x207   : > { %p7543_p13 = scmp.ne.s32.totalorder %s8646_s22, %s7542_s28  ;;  %s7546_s2 = sshll.u32 %s8115_s3, 4  ;;  %s7547_s2 = int_to_ptr.vmem [resolvable:$false] %s7546_s2 }
 0x208   : > { %s7548_s5 = scalar_lea.vmem %s7547_s2, 64  ;;  %p7549_p4 = scmp.lt.s32.totalorder %s8646_s22, %s7547_s2 }
 0x209   : > { %p7544_p12 = pnand %p7543_p13, %p10554_p0  ;;  %p7550_p8 = scmp.lt.s32.totalorder %s7548_s5, %s7542_s28 }
 0x20b   : > { %p7545_p5 = pneg %p7544_p12  ;;  %p7551_p9 = por %p7550_p8, %p7549_p4 }
 0x20d   : > { %p7552_p1 = pnand %p7551_p9, %p7545_p5 }
 0x20f   : > { %7555 = shalt.err (!%p7552_p1)
}
 0x210   : > { %s10479_s9 = smov 16   ;;  %s10556_s12 = sld [smem:[#allocation66_spill]] }
 0x211   : > { %s10481_s8 = smov 1   ;;  %s1150_s28 = scalar_lea.vmem [#allocation13], %s8600_s23 }
 0x212   : > { %6693 = dma.hbm_to_vmem [thread:$0]  (%p10554_p0), %s8643_s10, 32, %s8646_s22, %s8615_s0, %s10479_s9, %s10479_s9, %s10481_s8  }
 0x213   : > { %s1157_s3 = sshll.u32 %s1150_s28, 4  ;;  %s8674_s3 = int_to_ptr.vmem [resolvable:$true] %s1157_s3 }
 0x216   : > { %s8671_s5 = scalar_lea.hbm %s10556_s12, %s8603_s18  ;;  %s7560_s4 = scalar_lea.hbm %s10556_s12, 1024 }
 0x217   : > { %s7556_s2 = scalar_lea.hbm %s8671_s5, 512  ;;  %p7561_p6 = scmp.lt.u32.totalorder %s8671_s5, %s10556_s12 }
 0x218   : > { %p7557_p10 = scmp.ne.s32.totalorder %s8671_s5, %s7556_s2  ;;  %p7562_p7 = scmp.lt.u32.totalorder %s7560_s4, %s7556_s2 }
 0x219   : > { %p7564_p13 = scmp.lt.u32.totalorder %s7556_s2, %s8671_s5 }
 0x21a   : > { %p7558_p2 = pnand %p7557_p10, %p10554_p0  ;;  %p7563_p11 = por %p7562_p7, %p7561_p6 }
 0x21c   : > { %p7559_p3 = pneg %p7558_p2  ;;  %p7565_p12 = por %p7564_p13, %p7563_p11 }
 0x21e   : > { %p7566_p5 = pnand %p7565_p12, %p7559_p3 }
 0x220   : > { %7569 = shalt.err (!%p7566_p5)
}
 0x221   : > { %s7570_s10 = scalar_lea.vmem %s8674_s3, 512  ;;  %s8118_s22 = smov [#allocation13]  }
 0x222   : > { %p7571_p4 = scmp.ne.s32.totalorder %s8674_s3, %s7570_s10  ;;  %s7574_s28 = sshll.u32 %s8118_s22, 4  ;;  %s7575_s28 = int_to_ptr.vmem [resolvable:$false] %s7574_s28 }
 0x223   : > { %s7576_s9 = scalar_lea.vmem %s7575_s28, 1024  ;;  %p7577_p1 = scmp.lt.s32.totalorder %s8674_s3, %s7575_s28 }
 0x224   : > { %p7572_p8 = pnand %p7571_p4, %p10554_p0  ;;  %p7578_p10 = scmp.lt.s32.totalorder %s7576_s9, %s7570_s10 }
 0x226   : > { %p7573_p9 = pneg %p7572_p8  ;;  %p7579_p2 = por %p7578_p10, %p7577_p1 }
 0x228   : > { %p7580_p6 = pnand %p7579_p2, %p7573_p9 }
 0x22a   : > { %7583 = shalt.err (!%p7580_p6)
}
 0x22b   : > { %s10557_s4 = smov 4   ;;  %s10558_s2 = smov 64  }
 0x22c   : > { %s10559_s8 = sld [smem:[#allocation67_spill]]  ;;  %s1171_s9 = scalar_lea.vmem [#allocation14], %s8613_s16 }
 0x22d   : > { %6694 = dma.hbm_to_vmem [thread:$0]  (%p10554_p0), %s8671_s5, 512, %s8674_s3, %s8615_s0, %s10558_s2, %s10558_s2, %s10557_s4  }
 0x22e   : > { %s1178_s10 = sshll.u32 %s1171_s9, 4  ;;  %s8702_s10 = int_to_ptr.vmem [resolvable:$true] %s1178_s10 }
 0x232   : > { %s8699_s22 = scalar_lea.hbm %s10559_s8, %s8639_s6  ;;  %s7588_s12 = scalar_lea.hbm %s10559_s8, 64 }
 0x233   : > { %s7584_s28 = scalar_lea.hbm %s8699_s22, 32  ;;  %p7589_p13 = scmp.lt.u32.totalorder %s8699_s22, %s10559_s8 }
 0x234   : > { %p7585_p3 = scmp.ne.s32.totalorder %s8699_s22, %s7584_s28  ;;  %p7590_p12 = scmp.lt.u32.totalorder %s7588_s12, %s7584_s28 }
 0x235   : > { %p7592_p4 = scmp.lt.u32.totalorder %s7584_s28, %s8699_s22 }
 0x236   : > { %p7586_p7 = pnand %p7585_p3, %p10554_p0  ;;  %p7591_p5 = por %p7590_p12, %p7589_p13 }
 0x238   : > { %p7587_p11 = pneg %p7586_p7  ;;  %p7593_p8 = por %p7592_p4, %p7591_p5 }
 0x23a   : > { %p7594_p9 = pnand %p7593_p8, %p7587_p11 }
 0x23c   : > { %7597 = shalt.err (!%p7594_p9)
}
 0x23d   : > { %s7598_s5 = scalar_lea.vmem %s8702_s10, 32  ;;  %s8119_s3 = smov [#allocation14]  }
 0x23e   : > { %p7599_p1 = scmp.ne.s32.totalorder %s8702_s10, %s7598_s5  ;;  %s7602_s9 = sshll.u32 %s8119_s3, 4  ;;  %s7603_s9 = int_to_ptr.vmem [resolvable:$false] %s7602_s9 }
 0x23f   : > { %s7604_s13 = scalar_lea.vmem %s7603_s9, 64  ;;  %p7605_p6 = scmp.lt.s32.totalorder %s8702_s10, %s7603_s9 }
 0x240   : > { %p7600_p10 = pnand %p7599_p1, %p10554_p0  ;;  %p7606_p3 = scmp.lt.s32.totalorder %s7604_s13, %s7598_s5 }
 0x242   : > { %p7601_p2 = pneg %p7600_p10  ;;  %p7607_p7 = por %p7606_p3, %p7605_p6 }
 0x244   : > { %p7608_p13 = pnand %p7607_p7, %p7601_p2 }
 0x246   : > { %7611 = shalt.err (!%p7608_p13)
}
 0x247   : > { %s10560_s12 = smov 1   ;;  %s10561_s28 = smov 16  }
 0x248   : > { %s10562_s8 = sld [smem:[#allocation68_spill]]  ;;  %s1192_s13 = scalar_lea.vmem [#allocation15], %s8600_s23 }
 0x249   : > { %6695 = dma.hbm_to_vmem [thread:$0]  (%p10554_p0), %s8699_s22, 32, %s8702_s10, %s8615_s0, %s10561_s28, %s10561_s28, %s10560_s12  }
 0x24a   : > { %s1199_s5 = sshll.u32 %s1192_s13, 4  ;;  %s8730_s5 = int_to_ptr.vmem [resolvable:$true] %s1199_s5 }
 0x24e   : > { %s8727_s3 = scalar_lea.hbm %s10562_s8, %s8603_s18  ;;  %s7616_s14 = scalar_lea.hbm %s10562_s8, 1024 }
 0x24f   : > { %s7612_s9 = scalar_lea.hbm %s8727_s3, 512  ;;  %p7617_p4 = scmp.lt.u32.totalorder %s8727_s3, %s10562_s8 }
 0x250   : > { %p7613_p11 = scmp.ne.s32.totalorder %s8727_s3, %s7612_s9  ;;  %p7618_p8 = scmp.lt.u32.totalorder %s7616_s14, %s7612_s9 }
 0x251   : > { %p7620_p1 = scmp.lt.u32.totalorder %s7612_s9, %s8727_s3 }
 0x252   : > { %p7614_p12 = pnand %p7613_p11, %p10554_p0  ;;  %p7619_p9 = por %p7618_p8, %p7617_p4 }
 0x254   : > { %p7615_p5 = pneg %p7614_p12  ;;  %p7621_p10 = por %p7620_p1, %p7619_p9 }
 0x256   : > { %p7622_p2 = pnand %p7621_p10, %p7615_p5 }
 0x258   : > { %7625 = shalt.err (!%p7622_p2)
}
 0x259   : > { %s7626_s22 = scalar_lea.vmem %s8730_s5, 512  ;;  %s8120_s10 = smov [#allocation15]  }
 0x25a   : > { %p7627_p6 = scmp.ne.s32.totalorder %s8730_s5, %s7626_s22  ;;  %s7630_s13 = sshll.u32 %s8120_s10, 4  ;;  %s7631_s13 = int_to_ptr.vmem [resolvable:$false] %s7630_s13 }
 0x25b   : > { %s7632_s17 = scalar_lea.vmem %s7631_s13, 1024  ;;  %p7633_p13 = scmp.lt.s32.totalorder %s8730_s5, %s7631_s13 }
 0x25c   : > { %p7628_p3 = pnand %p7627_p6, %p10554_p0  ;;  %p7634_p11 = scmp.lt.s32.totalorder %s7632_s17, %s7626_s22 }
 0x25e   : > { %p7629_p7 = pneg %p7628_p3  ;;  %p7635_p12 = por %p7634_p11, %p7633_p13 }
 0x260   : > { %p7636_p4 = pnand %p7635_p12, %p7629_p7 }
 0x262   : > { %7639 = shalt.err (!%p7636_p4)
}
 0x263   : > { %s10563_s14 = sld [smem:[#allocation69_spill]]  ;;  %s1213_s9 = scalar_lea.vmem [#allocation16], %s8613_s16 }
 0x264   : > { %6696 = dma.hbm_to_vmem [thread:$0]  (%p10554_p0), %s8727_s3, 512, %s8730_s5, %s8615_s0, %s10558_s2, %s10558_s2, %s10557_s4  }
 0x265   : > { %s1220_s22 = sshll.u32 %s1213_s9, 4  ;;  %s10489_s10 = sshll.u32 %s8597_s7, 4  ;;  %s8758_s22 = int_to_ptr.vmem [resolvable:$true] %s1220_s22 }
 0x269   : > { %s8755_s17 = scalar_lea.hbm %s10563_s14, %s8639_s6  ;;  %s7644_s8 = scalar_lea.hbm %s10563_s14, 64 }
 0x26a   : > { %s7640_s13 = scalar_lea.hbm %s8755_s17, 32  ;;  %p7645_p1 = scmp.lt.u32.totalorder %s8755_s17, %s10563_s14 }
 0x26b   : > { %p7641_p5 = scmp.ne.s32.totalorder %s8755_s17, %s7640_s13  ;;  %p7646_p10 = scmp.lt.u32.totalorder %s7644_s8, %s7640_s13 }
 0x26c   : > { %p7648_p6 = scmp.lt.u32.totalorder %s7640_s13, %s8755_s17 }
 0x26d   : > { %p7642_p8 = pnand %p7641_p5, %p10554_p0  ;;  %p7647_p2 = por %p7646_p10, %p7645_p1 }
 0x26f   : > { %p7643_p9 = pneg %p7642_p8  ;;  %p7649_p3 = por %p7648_p6, %p7647_p2 }
 0x271   : > { %p7650_p7 = pnand %p7649_p3, %p7643_p9 }
 0x273   : > { %7653 = shalt.err (!%p7650_p7)
}
 0x274   : > { %s7654_s16 = scalar_lea.vmem %s8758_s22, 32  ;;  %s8121_s6 = smov [#allocation16]  }
 0x275   : > { %p7655_p13 = scmp.ne.s32.totalorder %s8758_s22, %s7654_s16  ;;  %s7658_s3 = sshll.u32 %s8121_s6, 4  ;;  %s7659_s3 = int_to_ptr.vmem [resolvable:$false] %s7658_s3 }
 0x276   : > { %s7660_s5 = scalar_lea.vmem %s7659_s3, 64  ;;  %p7661_p4 = scmp.lt.s32.totalorder %s8758_s22, %s7659_s3 }
 0x277   : > { %p7656_p11 = pnand %p7655_p13, %p10554_p0  ;;  %p7662_p5 = scmp.lt.s32.totalorder %s7660_s5, %s7654_s16 }
 0x279   : > { %p7657_p12 = pneg %p7656_p11  ;;  %p7663_p8 = por %p7662_p5, %p7661_p4 }
 0x27b   : > { %p7664_p1 = pnand %p7663_p8, %p7657_p12 }
 0x27d   : > { %7667 = shalt.err (!%p7664_p1)
}
 0x27e   : > { %s10564_s8 = sld [smem:[#allocation70_spill]]  ;;  %s10490_s9 = sshll.u32 %s8056_s15, 8 }
 0x27f   : > { %6697 = dma.hbm_to_vmem [thread:$0]  (%p10554_p0), %s8755_s17, 32, %s8758_s22, %s8615_s0, %s10561_s28, %s10561_s28, %s10560_s12  }
 0x280   : > { %s1234_s16 = scalar_lea.vmem [#allocation17], %s10489_s10 }
 0x281   : > { %s1241_s6 = sshll.u32 %s1234_s16, 4  ;;  %s8790_s6 = int_to_ptr.vmem [resolvable:$true] %s1241_s6 }
 0x284   : > { %s8786_s13 = scalar_lea.hbm %s10564_s8, %s10490_s9  ;;  %s7672_s5 = scalar_lea.hbm %s10564_s8, 512 }
 0x285   : > { %s7668_s3 = scalar_lea.hbm %s8786_s13, 256  ;;  %p7673_p6 = scmp.lt.u32.totalorder %s8786_s13, %s10564_s8 }
 0x286   : > { %p7669_p9 = scmp.ne.s32.totalorder %s8786_s13, %s7668_s3  ;;  %p7674_p3 = scmp.lt.u32.totalorder %s7672_s5, %s7668_s3 }
 0x287   : > { %p7676_p13 = scmp.lt.u32.totalorder %s7668_s3, %s8786_s13 }
 0x288   : > { %p7670_p10 = pnand %p7669_p9, %p10554_p0  ;;  %p7675_p7 = por %p7674_p3, %p7673_p6 }
 0x28a   : > { %p7671_p2 = pneg %p7670_p10  ;;  %p7677_p11 = por %p7676_p13, %p7675_p7 }
 0x28c   : > { %p7678_p12 = pnand %p7677_p11, %p7671_p2 }
 0x28e   : > { %7681 = shalt.err (!%p7678_p12)
}
 0x28f   : > { %s7682_s12 = scalar_lea.vmem %s8790_s6, 256  ;;  %s8122_s28 = smov [#allocation17]  }
 0x290   : > { %p7683_p4 = scmp.ne.s32.totalorder %s8790_s6, %s7682_s12  ;;  %s7686_s17 = sshll.u32 %s8122_s28, 4  ;;  %s7687_s17 = int_to_ptr.vmem [resolvable:$false] %s7686_s17 }
 0x291   : > { %s7688_s22 = scalar_lea.vmem %s7687_s17, 512  ;;  %p7689_p1 = scmp.lt.s32.totalorder %s8790_s6, %s7687_s17 }
 0x292   : > { %p7684_p5 = pnand %p7683_p4, %p10554_p0  ;;  %p7690_p9 = scmp.lt.s32.totalorder %s7688_s22, %s7682_s12 }
 0x294   : > { %p7685_p8 = pneg %p7684_p5  ;;  %p7691_p10 = por %p7690_p9, %p7689_p1 }
 0x296   : > { %p7692_p6 = pnand %p7691_p10, %p7685_p8 }
 0x298   : > { %7695 = shalt.err (!%p7692_p6)
}
 0x299   : > { %s10565_s16 = sld [smem:[#allocation71_spill]]  ;;  %s8814_s3 = sshll.u32 %s8056_s15, 4 }
 0x29a   : > { %6698 = dma.hbm_to_vmem [thread:$0]  (%p10554_p0), %s8786_s13, 256, %s8790_s6, %s8615_s0, %s10558_s2, %s10558_s2, %s10557_s4  }
 0x29b   : > { %s1254_s5 = scalar_lea.vmem [#allocation18], %s8597_s7 }
 0x29c   : > { %s1261_s12 = sshll.u32 %s1254_s5, 4  ;;  %s1262_s12 = int_to_ptr.vmem [resolvable:$true] %s1261_s12 }
 0x29f   : > { %s1259_s28 = scalar_lea.hbm %s10565_s16, %s8814_s3  ;;  %s7700_s22 = scalar_lea.hbm %s10565_s16, 32 }
 0x2a0   : > { %s7696_s17 = scalar_lea.hbm %s1259_s28, 16  ;;  %p7701_p13 = scmp.lt.u32.totalorder %s1259_s28, %s10565_s16 }
 0x2a1   : > { %p7697_p2 = scmp.ne.s32.totalorder %s1259_s28, %s7696_s17  ;;  %p7702_p11 = scmp.lt.u32.totalorder %s7700_s22, %s7696_s17 }
 0x2a2   : > { %p7704_p4 = scmp.lt.u32.totalorder %s7696_s17, %s1259_s28 }
 0x2a3   : > { %p7698_p3 = pnand %p7697_p2, %p10554_p0  ;;  %p7703_p12 = por %p7702_p11, %p7701_p13 }
 0x2a5   : > { %p7699_p7 = pneg %p7698_p3  ;;  %p7705_p5 = por %p7704_p4, %p7703_p12 }
 0x2a7   : > { %p7706_p8 = pnand %p7705_p5, %p7699_p7 }
 0x2a9   : > { %7709 = shalt.err (!%p7706_p8)
}
 0x2aa   : > { %s7710_s13 = scalar_lea.vmem %s1262_s12, 16  ;;  %s8123_s6 = smov [#allocation18]  }
 0x2ab   : > { %p7711_p1 = scmp.ne.s32.totalorder %s1262_s12, %s7710_s13  ;;  %s7714_s5 = sshll.u32 %s8123_s6, 4  ;;  %s7715_s5 = int_to_ptr.vmem [resolvable:$false] %s7714_s5 }
 0x2ac   : > { %s7716_s10 = scalar_lea.vmem %s7715_s5, 32  ;;  %p7717_p6 = scmp.lt.s32.totalorder %s1262_s12, %s7715_s5 }
 0x2ad   : > { %p7712_p9 = pnand %p7711_p1, %p10554_p0  ;;  %p7718_p2 = scmp.lt.s32.totalorder %s7716_s10, %s7710_s13 }
 0x2af   : > { %p7713_p10 = pneg %p7712_p9  ;;  %p7719_p3 = por %p7718_p2, %p7717_p6 }
 0x2b1   : > { %p7720_p11 = pnand %p7719_p3, %p7713_p10 }
 0x2b3   : > { %7723 = shalt.err (!%p7720_p11)
}
 0x2b4   : > { %s10566_s17 = sld [smem:[#allocation72_spill]]  ;;  %s10567_s22 = sld [smem:[#allocation73_spill]] }
 0x2b5   : > { %6699 = dma.hbm_to_vmem [thread:$0]  (%p10554_p0), %s1259_s28, 16, %s1262_s12, %s8615_s0  }
 0x2b6   : > { %s1271_s10 = scalar_lea.vmem [#allocation19], %s8597_s7 }
 0x2b7   : > { %s1278_s13 = sshll.u32 %s1271_s10, 4  ;;  %s1279_s13 = int_to_ptr.vmem [resolvable:$true] %s1278_s13 }
 0x2ba   : > { %s8830_s6 = scalar_lea.hbm %s10566_s17, %s8814_s3  ;;  %s8835_s5 = scalar_lea.hbm %s10567_s22, %s8814_s3 }
 0x2bb   : > { %s7724_s9 = scalar_lea.hbm %s8830_s6, 16  ;;  %s7728_s8 = scalar_lea.hbm %s10566_s17, 32 }
 0x2bc   : > { %p7725_p7 = scmp.ne.s32.totalorder %s8830_s6, %s7724_s9  ;;  %p7729_p4 = scmp.lt.u32.totalorder %s8830_s6, %s10566_s17 }
 0x2bd   : > { %p7730_p5 = scmp.lt.u32.totalorder %s7728_s8, %s7724_s9  ;;  %p7732_p1 = scmp.lt.u32.totalorder %s7724_s9, %s8830_s6 }
 0x2be   : > { %p7726_p13 = pnand %p7725_p7, %p10554_p0 }
 0x2bf   : > { %p7731_p8 = por %p7730_p5, %p7729_p4 }
 0x2c0   : > { %p7727_p12 = pneg %p7726_p13 }
 0x2c1   : > { %p7733_p9 = por %p7732_p1, %p7731_p8 }
 0x2c3   : > { %p7734_p10 = pnand %p7733_p9, %p7727_p12 }
 0x2c5   : > { %7737 = shalt.err (!%p7734_p10)
}
 0x2c6   : > { %s7738_s12 = scalar_lea.vmem %s1279_s13, 16  ;;  %s8124_s28 = smov [#allocation19]  }
 0x2c7   : > { %p7739_p6 = scmp.ne.s32.totalorder %s1279_s13, %s7738_s12  ;;  %s7742_s10 = sshll.u32 %s8124_s28, 4  ;;  %s7743_s10 = int_to_ptr.vmem [resolvable:$false] %s7742_s10 }
 0x2c8   : > { %s7744_s14 = scalar_lea.vmem %s7743_s10, 32  ;;  %p7745_p11 = scmp.lt.s32.totalorder %s1279_s13, %s7743_s10 }
 0x2c9   : > { %p7740_p2 = pnand %p7739_p6, %p10554_p0  ;;  %p7746_p7 = scmp.lt.s32.totalorder %s7744_s14, %s7738_s12 }
 0x2cb   : > { %p7741_p3 = pneg %p7740_p2  ;;  %p7747_p13 = por %p7746_p7, %p7745_p11 }
 0x2cd   : > { %p7748_p4 = pnand %p7747_p13, %p7741_p3 }
 0x2cf   : > { %7751 = shalt.err (!%p7748_p4)
}
 0x2d0   : > { %s10568_s8 = sld [smem:[#allocation74_spill]]  ;;  %s1288_s9 = scalar_lea.vmem [#allocation20], %s8597_s7 }
 0x2d1   : > { %6700 = dma.hbm_to_vmem [thread:$0]  (%p10554_p0), %s8830_s6, 16, %s1279_s13, %s8615_s0  }
 0x2d2   : > { %s1295_s14 = sshll.u32 %s1288_s9, 4  ;;  %s10569_s12 = sshll.u32 %s8056_s15, 8  ;;  %s1296_s14 = int_to_ptr.vmem [resolvable:$true] %s1295_s14 }
 0x2d3   : > { %s7752_s10 = scalar_lea.hbm %s8835_s5, 16  ;;  %s7756_s16 = scalar_lea.hbm %s10567_s22, 32 }
 0x2d4   : > { %p7753_p12 = scmp.ne.s32.totalorder %s8835_s5, %s7752_s10  ;;  %p7757_p1 = scmp.lt.u32.totalorder %s8835_s5, %s10567_s22 }
 0x2d5   : > { %p7758_p9 = scmp.lt.u32.totalorder %s7756_s16, %s7752_s10  ;;  %p7760_p6 = scmp.lt.u32.totalorder %s7752_s10, %s8835_s5 }
 0x2d6   : > { %s8855_s28 = scalar_lea.hbm %s10568_s8, %s10569_s12  ;;  %p7754_p5 = pnand %p7753_p12, %p10554_p0 }
 0x2d7   : > { %p7759_p10 = por %p7758_p9, %p7757_p1 }
 0x2d8   : > { %p7755_p8 = pneg %p7754_p5 }
 0x2d9   : > { %p7761_p2 = por %p7760_p6, %p7759_p10 }
 0x2db   : > { %p7762_p3 = pnand %p7761_p2, %p7755_p8 }
 0x2dd   : > { %7765 = shalt.err (!%p7762_p3)
}
 0x2de   : > { %s7766_s6 = scalar_lea.vmem %s1296_s14, 16  ;;  %s8125_s15 = smov [#allocation20]  }
 0x2df   : > { %p7767_p11 = scmp.ne.s32.totalorder %s1296_s14, %s7766_s6  ;;  %s7770_s13 = sshll.u32 %s8125_s15, 4  ;;  %s7771_s13 = int_to_ptr.vmem [resolvable:$false] %s7770_s13 }
 0x2e0   : > { %s7772_s9 = scalar_lea.vmem %s7771_s13, 32  ;;  %p7773_p4 = scmp.lt.s32.totalorder %s1296_s14, %s7771_s13 }
 0x2e1   : > { %p7768_p7 = pnand %p7767_p11, %p10554_p0  ;;  %p7774_p12 = scmp.lt.s32.totalorder %s7772_s9, %s7766_s6 }
 0x2e3   : > { %p7769_p13 = pneg %p7768_p7  ;;  %p7775_p5 = por %p7774_p12, %p7773_p4 }
 0x2e5   : > { %p7776_p1 = pnand %p7775_p5, %p7769_p13 }
 0x2e7   : > { %7779 = shalt.err (!%p7776_p1)
}
 0x2e8   : > { %s10570_s16 = sld [smem:[#allocation75_spill]]  ;;  %s10571_s12 = sshll.u32 %s8597_s7, 4 }
 0x2e9   : > { %6701 = dma.hbm_to_vmem [thread:$0]  (%p10554_p0), %s8835_s5, 16, %s1296_s14, %s8615_s0  }
 0x2ea   : > { %s1306_s10 = scalar_lea.vmem [#allocation21], %s10571_s12  ;;  %s7780_s13 = scalar_lea.hbm %s8855_s28, 256 }
 0x2eb   : > { %s1313_s6 = sshll.u32 %s1306_s10, 4  ;;  %p7781_p8 = scmp.ne.s32.totalorder %s8855_s28, %s7780_s13  ;;  %s8873_s6 = int_to_ptr.vmem [resolvable:$true] %s1313_s6 }
 0x2ec   : > { %s7784_s9 = scalar_lea.hbm %s10568_s8, 512  ;;  %p7785_p6 = scmp.lt.u32.totalorder %s8855_s28, %s10568_s8 }
 0x2ed   : > { %p7782_p9 = pnand %p7781_p8, %p10554_p0  ;;  %p7786_p2 = scmp.lt.u32.totalorder %s7784_s9, %s7780_s13 }
 0x2ee   : > { %s8877_s15 = scalar_lea.hbm %s10570_s16, %s8814_s3  ;;  %p7788_p11 = scmp.lt.u32.totalorder %s7780_s13, %s8855_s28 }
 0x2ef   : > { %p7783_p10 = pneg %p7782_p9  ;;  %p7787_p3 = por %p7786_p2, %p7785_p6 }
 0x2f1   : > { %p7789_p7 = por %p7788_p11, %p7787_p3 }
 0x2f3   : > { %p7790_p13 = pnand %p7789_p7, %p7783_p10 }
 0x2f5   : > { %7793 = shalt.err (!%p7790_p13)
}
 0x2f6   : > { %s7794_s5 = scalar_lea.vmem %s8873_s6, 256  ;;  %s8126_s14 = smov [#allocation21]  }
 0x2f7   : > { %p7795_p4 = scmp.ne.s32.totalorder %s8873_s6, %s7794_s5  ;;  %s7798_s12 = sshll.u32 %s8126_s14, 4  ;;  %s7799_s12 = int_to_ptr.vmem [resolvable:$false] %s7798_s12 }
 0x2f8   : > { %s7800_s10 = scalar_lea.vmem %s7799_s12, 512  ;;  %p7801_p1 = scmp.lt.s32.totalorder %s8873_s6, %s7799_s12 }
 0x2f9   : > { %p7796_p12 = pnand %p7795_p4, %p10554_p0  ;;  %p7802_p8 = scmp.lt.s32.totalorder %s7800_s10, %s7794_s5 }
 0x2fb   : > { %p7797_p5 = pneg %p7796_p12  ;;  %p7803_p9 = por %p7802_p8, %p7801_p1 }
 0x2fd   : > { %p7804_p6 = pnand %p7803_p9, %p7797_p5 }
 0x2ff   : > { %7807 = shalt.err (!%p7804_p6)
}
 0x300   : > { %s10572_s13 = sld [smem:[#allocation76_spill]]  ;;  %s1326_s9 = scalar_lea.vmem [#allocation22], %s8597_s7 }
 0x301   : > { %6702 = dma.hbm_to_vmem [thread:$0]  (%p10554_p0), %s8855_s28, 256, %s8873_s6, %s8615_s0, %s10558_s2, %s10558_s2, %s10557_s4  }
 0x302   : > { %s1333_s5 = sshll.u32 %s1326_s9, 4  ;;  %s7808_s12 = scalar_lea.hbm %s8877_s15, 16  ;;  %s1334_s5 = int_to_ptr.vmem [resolvable:$true] %s1333_s5 }
 0x303   : > { %p7809_p10 = scmp.ne.s32.totalorder %s8877_s15, %s7808_s12  ;;  %s7812_s10 = scalar_lea.hbm %s10570_s16, 32 }
 0x304   : > { %p7813_p11 = scmp.lt.u32.totalorder %s8877_s15, %s10570_s16  ;;  %p7814_p7 = scmp.lt.u32.totalorder %s7812_s10, %s7808_s12 }
 0x305   : > { %p7810_p2 = pnand %p7809_p10, %p10554_p0  ;;  %p7816_p4 = scmp.lt.u32.totalorder %s7808_s12, %s8877_s15 }
 0x306   : > { %s8903_s14 = scalar_lea.hbm %s10572_s13, %s8603_s18  ;;  %p7815_p13 = por %p7814_p7, %p7813_p11 }
 0x307   : > { %p7811_p3 = pneg %p7810_p2 }
 0x308   : > { %p7817_p12 = por %p7816_p4, %p7815_p13 }
 0x30a   : > { %p7818_p5 = pnand %p7817_p12, %p7811_p3 }
 0x30c   : > { %7821 = shalt.err (!%p7818_p5)
}
 0x30d   : > { %s7822_s8 = scalar_lea.vmem %s1334_s5, 16  ;;  %s8127_s18 = smov [#allocation22]  }
 0x30e   : > { %p7823_p1 = scmp.ne.s32.totalorder %s1334_s5, %s7822_s8  ;;  %s7826_s28 = sshll.u32 %s8127_s18, 4  ;;  %s7827_s28 = int_to_ptr.vmem [resolvable:$false] %s7826_s28 }
 0x30f   : > { %s7828_s6 = scalar_lea.vmem %s7827_s28, 32  ;;  %p7829_p6 = scmp.lt.s32.totalorder %s1334_s5, %s7827_s28 }
 0x310   : > { %p7824_p8 = pnand %p7823_p1, %p10554_p0  ;;  %p7830_p10 = scmp.lt.s32.totalorder %s7828_s6, %s7822_s8 }
 0x312   : > { %p7825_p9 = pneg %p7824_p8  ;;  %p7831_p2 = por %p7830_p10, %p7829_p6 }
 0x314   : > { %p7832_p7 = pnand %p7831_p2, %p7825_p9 }
 0x316   : > { %7835 = shalt.err (!%p7832_p7)
}
 0x317   : > { %s10573_s9 = sld [smem:[#allocation77_spill]]  ;;  %s1344_s12 = scalar_lea.vmem [#allocation23], %s8600_s23 }
 0x318   : > { %6703 = dma.hbm_to_vmem [thread:$0]  (%p10554_p0), %s8877_s15, 16, %s1334_s5, %s8615_s0  }
 0x319   : > { %s1351_s8 = sshll.u32 %s1344_s12, 4  ;;  %s7836_s18 = scalar_lea.hbm %s8903_s14, 512  ;;  %s8920_s8 = int_to_ptr.vmem [resolvable:$true] %s1351_s8 }
 0x31a   : > { %p7837_p3 = scmp.ne.s32.totalorder %s8903_s14, %s7836_s18  ;;  %s7840_s28 = scalar_lea.hbm %s10572_s13, 1024 }
 0x31b   : > { %p7841_p4 = scmp.lt.u32.totalorder %s8903_s14, %s10572_s13  ;;  %p7842_p12 = scmp.lt.u32.totalorder %s7840_s28, %s7836_s18 }
 0x31c   : > { %p7838_p11 = pnand %p7837_p3, %p10554_p0  ;;  %p7844_p1 = scmp.lt.u32.totalorder %s7836_s18, %s8903_s14 }
 0x31d   : > { %s8924_s10 = scalar_lea.hbm %s10573_s9, %s8814_s3  ;;  %p7843_p5 = por %p7842_p12, %p7841_p4 }
 0x31e   : > { %p7839_p13 = pneg %p7838_p11 }
 0x31f   : > { %p7845_p8 = por %p7844_p1, %p7843_p5 }
 0x321   : > { %p7846_p9 = pnand %p7845_p8, %p7839_p13 }
 0x323   : > { %7849 = shalt.err (!%p7846_p9)
}
 0x324   : > { %s7850_s23 = scalar_lea.vmem %s8920_s8, 512  ;;  %s8128_s15 = smov [#allocation23]  }
 0x325   : > { %p7851_p6 = scmp.ne.s32.totalorder %s8920_s8, %s7850_s23  ;;  %s7854_s5 = sshll.u32 %s8128_s15, 4  ;;  %s7855_s5 = int_to_ptr.vmem [resolvable:$false] %s7854_s5 }
 0x326   : > { %s7856_s6 = scalar_lea.vmem %s7855_s5, 1024  ;;  %p7857_p7 = scmp.lt.s32.totalorder %s8920_s8, %s7855_s5 }
 0x327   : > { %p7852_p10 = pnand %p7851_p6, %p10554_p0  ;;  %p7858_p3 = scmp.lt.s32.totalorder %s7856_s6, %s7850_s23 }
 0x329   : > { %p7853_p2 = pneg %p7852_p10  ;;  %p7859_p11 = por %p7858_p3, %p7857_p7 }
 0x32b   : > { %p7860_p4 = pnand %p7859_p11, %p7853_p2 }
 0x32d   : > { %7863 = shalt.err (!%p7860_p4)
}
 0x32e   : > { %s10574_s12 = sld [smem:[#allocation78_spill]]  ;;  %s1364_s18 = scalar_lea.vmem [#allocation24], %s8597_s7 }
 0x32f   : > { %6704 = dma.hbm_to_vmem [thread:$0]  (%p10554_p0), %s8903_s14, 512, %s8920_s8, %s8615_s0, %s10558_s2, %s10558_s2, %s10557_s4  }
 0x330   : > { %s1371_s28 = sshll.u32 %s1364_s18, 4  ;;  %s7864_s15 = scalar_lea.hbm %s8924_s10, 16  ;;  %s1372_s28 = int_to_ptr.vmem [resolvable:$true] %s1371_s28 }
 0x331   : > { %p7865_p13 = scmp.ne.s32.totalorder %s8924_s10, %s7864_s15  ;;  %s7868_s5 = scalar_lea.hbm %s10573_s9, 32 }
 0x332   : > { %p7869_p1 = scmp.lt.u32.totalorder %s8924_s10, %s10573_s9  ;;  %p7870_p8 = scmp.lt.u32.totalorder %s7868_s5, %s7864_s15 }
 0x333   : > { %p7866_p12 = pnand %p7865_p13, %p10554_p0  ;;  %p7872_p6 = scmp.lt.u32.totalorder %s7864_s15, %s8924_s10 }
 0x334   : > { %s8950_s23 = scalar_lea.hbm %s10574_s12, %s8814_s3  ;;  %p7871_p9 = por %p7870_p8, %p7869_p1 }
 0x335   : > { %p7867_p5 = pneg %p7866_p12 }
 0x336   : > { %p7873_p10 = por %p7872_p6, %p7871_p9 }
 0x338   : > { %p7874_p2 = pnand %p7873_p10, %p7867_p5 }
 0x33a   : > { %7877 = shalt.err (!%p7874_p2)
}
 0x33b   : > { %s7878_s6 = scalar_lea.vmem %s1372_s28, 16  ;;  %s8129_s4 = smov [#allocation24]  }
 0x33c   : > { %p7879_p7 = scmp.ne.s32.totalorder %s1372_s28, %s7878_s6  ;;  %s7882_s2 = sshll.u32 %s8129_s4, 4  ;;  %s7883_s2 = int_to_ptr.vmem [resolvable:$false] %s7882_s2 }
 0x33d   : > { %s7884_s14 = scalar_lea.vmem %s7883_s2, 32  ;;  %p7885_p4 = scmp.lt.s32.totalorder %s1372_s28, %s7883_s2 }
 0x33e   : > { %p7880_p3 = pnand %p7879_p7, %p10554_p0  ;;  %p7886_p13 = scmp.lt.s32.totalorder %s7884_s14, %s7878_s6 }
 0x340   : > { %p7881_p11 = pneg %p7880_p3  ;;  %p7887_p12 = por %p7886_p13, %p7885_p4 }
 0x342   : > { %p7888_p1 = pnand %p7887_p12, %p7881_p11 }
 0x344   : > { %7891 = shalt.err (!%p7888_p1)
}
 0x345   : > { %s10575_s8 = sld [smem:[#allocation79_spill]]  ;;  %s1381_s18 = scalar_lea.vmem [#allocation25], %s8597_s7 }
 0x346   : > { %6705 = dma.hbm_to_vmem [thread:$0]  (%p10554_p0), %s8924_s10, 16, %s1372_s28, %s8615_s0  }
 0x347   : > { %s1388_s15 = sshll.u32 %s1381_s18, 4  ;;  %s7892_s6 = scalar_lea.hbm %s8950_s23, 16  ;;  %s1389_s15 = int_to_ptr.vmem [resolvable:$true] %s1388_s15 }
 0x348   : > { %p7893_p5 = scmp.ne.s32.totalorder %s8950_s23, %s7892_s6  ;;  %s7896_s4 = scalar_lea.hbm %s10574_s12, 32 }
 0x349   : > { %p7897_p6 = scmp.lt.u32.totalorder %s8950_s23, %s10574_s12  ;;  %p7898_p10 = scmp.lt.u32.totalorder %s7896_s4, %s7892_s6 }
 0x34a   : > { %p7894_p8 = pnand %p7893_p5, %p10554_p0  ;;  %p7900_p7 = scmp.lt.u32.totalorder %s7892_s6, %s8950_s23 }
 0x34b   : > { %s8969_s5 = scalar_lea.hbm %s10575_s8, %s8814_s3  ;;  %p7899_p2 = por %p7898_p10, %p7897_p6 }
 0x34c   : > { %p7895_p9 = pneg %p7894_p8 }
 0x34d   : > { %p7901_p3 = por %p7900_p7, %p7899_p2 }
 0x34f   : > { %p7902_p11 = pnand %p7901_p3, %p7895_p9 }
 0x351   : > { %7905 = shalt.err (!%p7902_p11)
}
 0x352   : > { %s7906_s2 = scalar_lea.vmem %s1389_s15, 16  ;;  %s8130_s3 = smov [#allocation25]  }
 0x353   : > { %p7907_p4 = scmp.ne.s32.totalorder %s1389_s15, %s7906_s2  ;;  %s7910_s10 = sshll.u32 %s8130_s3, 4  ;;  %s7911_s10 = int_to_ptr.vmem [resolvable:$false] %s7910_s10 }
 0x354   : > { %s7912_s28 = scalar_lea.vmem %s7911_s10, 32  ;;  %p7913_p1 = scmp.lt.s32.totalorder %s1389_s15, %s7911_s10 }
 0x355   : > { %p7908_p13 = pnand %p7907_p4, %p10554_p0  ;;  %p7914_p5 = scmp.lt.s32.totalorder %s7912_s28, %s7906_s2 }
 0x357   : > { %p7909_p12 = pneg %p7908_p13  ;;  %p7915_p8 = por %p7914_p5, %p7913_p1 }
 0x359   : > { %p7916_p6 = pnand %p7915_p8, %p7909_p12 }
 0x35b   : > { %7919 = shalt.err (!%p7916_p6)
}
 0x35c   : > { %6706 = dma.hbm_to_vmem [thread:$0]  (%p10554_p0), %s8950_s23, 16, %s1389_s15, %s8615_s0  }
 0x35d   : > { %s1398_s14 = scalar_lea.vmem [#allocation26], %s8597_s7  ;;  %s7920_s6 = scalar_lea.hbm %s8969_s5, 16 }
 0x35e   : > { %s1405_s18 = sshll.u32 %s1398_s14, 4  ;;  %p7921_p9 = scmp.ne.s32.totalorder %s8969_s5, %s7920_s6  ;;  %s1406_s18 = int_to_ptr.vmem [resolvable:$true] %s1405_s18 }
 0x35f   : > { %s7924_s4 = scalar_lea.hbm %s10575_s8, 32  ;;  %p7925_p7 = scmp.lt.u32.totalorder %s8969_s5, %s10575_s8 }
 0x360   : > { %p7922_p10 = pnand %p7921_p9, %p10554_p0  ;;  %p7926_p3 = scmp.lt.u32.totalorder %s7924_s4, %s7920_s6 }
 0x361   : > { %p7928_p4 = scmp.lt.u32.totalorder %s7920_s6, %s8969_s5 }
 0x362   : > { %p7923_p2 = pneg %p7922_p10  ;;  %p7927_p11 = por %p7926_p3, %p7925_p7 }
 0x364   : > { %p7929_p13 = por %p7928_p4, %p7927_p11 }
 0x366   : > { %p7930_p12 = pnand %p7929_p13, %p7923_p2 }
 0x368   : > { %7933 = shalt.err (!%p7930_p12)
}
 0x369   : > { %s7934_s2 = scalar_lea.vmem %s1406_s18, 16  ;;  %s8131_s7 = smov [#allocation26]  }
 0x36a   : > { %p7935_p1 = scmp.ne.s32.totalorder %s1406_s18, %s7934_s2  ;;  %s7938_s23 = sshll.u32 %s8131_s7, 4  ;;  %s7939_s23 = int_to_ptr.vmem [resolvable:$false] %s7938_s23 }
 0x36b   : > { %s7940_s15 = scalar_lea.vmem %s7939_s23, 32  ;;  %p7941_p6 = scmp.lt.s32.totalorder %s1406_s18, %s7939_s23 }
 0x36c   : > { %p7936_p5 = pnand %p7935_p1, %p10554_p0  ;;  %p7942_p9 = scmp.lt.s32.totalorder %s7940_s15, %s7934_s2 }
 0x36e   : > { %p7937_p8 = pneg %p7936_p5  ;;  %p7943_p10 = por %p7942_p9, %p7941_p6 }
 0x370   : > { %p7944_p3 = pnand %p7943_p10, %p7937_p8 }
 0x372   : > { %7947 = shalt.err (!%p7944_p3)
}
 0x373   : > { %6707 = dma.hbm_to_vmem [thread:$0]  (%p10554_p0), %s8969_s5, 16, %s1406_s18, %s8615_s0  }
 0x374 PF: > { %p10576_p2 = scmp.ne.s32.totalorder %s10545_s1, 0 }
 0x375   : > { %s10577_s3 = sld [smem:[#allocation88_spill]] (!%p10576_p2) }
 0x376   : > { %1414 = sbr.rel (%p10576_p2) target bundleno = 5748 (0x1674), region = 152 }
 0x37b   : > { %p10578_p7 = scmp.eq.s32.totalorder (!%p10576_p2), %s10577_s3, 0 }
 0x37d   : > { %7991 = dma.done.wait (%p10578_p7), [#allocation4], 256   ;;  %p10579_p11 = pmov %p10578_p7 }
 0x37e   : > { %p10580_p4 = pmov %p10578_p7 }
 0x37f   : > { %7993 = vsyncadd (%p10579_p11), [#allocation4], 4294967040 }
 0x380   : > { %7995 = dma.done.wait (%p10580_p4), [#allocation7], 272   ;;  %p10581_p13 = pmov %p10580_p4 }
 0x381   : > { %p10582_p12 = pmov %p10580_p4 }
 0x382   : > { %7997 = vsyncadd (%p10581_p13), [#allocation7], 4294967024 }
 0x383   : > { %7999 = dma.done.wait (%p10582_p12), [#allocation10], 16   ;;  %p10583_p0 = pmov %p10580_p4 }
 0x384   : > { %s10584_s26 = sld [smem:[#allocation87_spill]]  ;;  %s10585_s1 = sld [smem:[#allocation91_spill]] }
 0x385   : > { %8001 = vsyncadd (%p10583_p0), [#allocation10], 4294967280  ;;  %s1432_s0 = sand.u32 1, %s10577_s3  }
 0x386   : > { %s1433_s28 = scalar_lea.sflag [#allocation4], %s1432_s0 }
 0x38a   : > { %s9016_s5 = sand.u32 1, %s10584_s26   ;;  %p10586_p1 = scmp.ne.s32.totalorder %s10585_s1, 0 }
 0x38b   : > { %s6297_s10 = sshll.u32 %s9016_s5, 5 }
 0x38c   : > { %s9019_s14 = scalar_lea.vmem [#allocation11], %s6297_s10 }
 0x38d   : > { %8003 = dma.done.wait (%p10586_p1), %s1433_s28, 2768  }
 0x38e   : > { %8005 = vsyncadd (%p10586_p1), %s1433_s28, 4294964528  ;;  %s9026_s18 = sshll.u32 %s9016_s5, 1  ;;  %s6303_s6 = sshll.u32 %s9016_s5, 4 }
 0x38f   : > { %s1445_s4 = scalar_lea.vmem [#allocation12], %s9026_s18  ;;  %s9030_s2 = scalar_lea.vmem [#allocation13], %s6297_s10 }
 0x390   : > { %s1463_s7 = scalar_lea.vmem [#allocation14], %s9026_s18  ;;  %s9033_s23 = scalar_lea.vmem [#allocation15], %s6297_s10 }
 0x391   : > { %s1481_s15 = scalar_lea.vmem [#allocation16], %s9026_s18  ;;  %s9036_s26 = scalar_lea.vmem [#allocation17], %s6303_s6 }
 0x392   : > { %s1498_s1 = scalar_lea.vmem [#allocation18], %s9016_s5  ;;  %s1506_s0 = scalar_lea.vmem [#allocation19], %s9016_s5 }
 0x393   : > { %s1514_s28 = scalar_lea.vmem [#allocation20], %s9016_s5  ;;  %s9041_s8 = scalar_lea.vmem [#allocation21], %s6303_s6 }
 0x394   : > { %s1531_s9 = scalar_lea.vmem [#allocation22], %s9016_s5  ;;  %s9044_s12 = scalar_lea.vmem [#allocation23], %s6297_s10 }
 0x395   : > { %s1548_s13 = scalar_lea.vmem [#allocation24], %s9016_s5  ;;  %s1556_s16 = scalar_lea.vmem [#allocation25], %s9016_s5 }
 0x396   : > { %s1564_s17 = scalar_lea.vmem [#allocation26], %s9016_s5  ;;  %p10587_p5 = pmov %p10583_p0 }
 0x397   : > { %p10588_p8 = pmov %p10583_p0 }
 0x398   : > { %8007 = dma.done.wait (%p10587_p5), [#allocation7], 512  }
 0x399   : > { %8009 = vsyncadd (%p10588_p8), [#allocation7], 4294966784  ;;  %p10589_p6 = pmov %p10583_p0 }
 0x39a   : > { %p10590_p9 = pmov %p10583_p0 }
 0x39b   : > { %8011 = dma.done.wait (%p10589_p6), [#allocation10], 512  }
 0x39c   : > { %8013 = vsyncadd (%p10590_p9), [#allocation10], 4294966784  ;;  %p10591_p10 = pmov %p10583_p0 }
 0x39d   : > { %p10592_p3 = pmov %p10583_p0 }
 0x39e   : > { %8015 = dma.done.wait (%p10591_p10), [#allocation30], 288  }
 0x39f   : > { %8017 = vsyncadd (%p10592_p3), [#allocation30], 4294967008  ;;  %p10593_p2 = pmov %p10583_p0 }
 0x3a0   : > { %p10594_p7 = pmov %p10583_p0 }
 0x3a1   : > { %8019 = dma.done.wait (%p10593_p2), [#allocation33], 272  }
 0x3a2   : > { %8021 = vsyncadd (%p10594_p7), [#allocation33], 4294967024  ;;  %p10595_p11 = pmov %p10583_p0 }
 0x3a3   : > { %p10596_p4 = pmov %p10583_p0 }
 0x3a4   : > { %8023 = dma.done.wait (%p10595_p11), [#allocation36], 32  }
 0x3a5   : > { %8025 = vsyncadd (%p10596_p4), [#allocation36], 4294967264  ;;  %p10597_p13 = pmov %p10583_p0 }
 0x3a6   : > { %p10598_p12 = pmov %p10583_p0 }
 0x3a7   : > { %8027 = dma.done.wait (%p10597_p13), [#allocation39], 272  }
 0x3a8   : > { %8029 = vsyncadd (%p10598_p12), [#allocation39], 4294967024 }
 0x3a9   : > { %8031 = dma.done.wait (%p10583_p0), [#allocation42], 256   ;;  %p10599_p1 = pmov %p10583_p0 }
 0x3aa   : > { %p10600_p5 = pmov %p10583_p0 }
 0x3ab   : > { %8033 = vsyncadd (%p10599_p1), [#allocation42], 4294967040 }
 0x3ac   : > { %8035 = dma.done.wait (%p10600_p5), [#allocation45], 16   ;;  %p10601_p8 = pmov %p10583_p0 }
 0x3ad   : > { %p10602_p6 = scmp.ne.s32.totalorder %s10577_s3, 0 }
 0x3ae   : > { %8037 = vsyncadd (%p10601_p8), [#allocation45], 4294967280  ;;  %v1767_v0 = vld [vmem:[#allocation3] sm:$0xff] (!%p10602_p6)  ;;  %vm1771_vm0 = vcmask (!%p10602_p6), 261120   ;;  %v1768_v1 = vld [vmem:[#allocation3 + $0x8] sm:$0xff] (!%p10602_p6) }
 0x3af   : > { %1766 = sbr.rel (%p10602_p6) target bundleno = 1261 (0x4ed), region = 288  ;;  %v1772_v2 = vsel (!%p10602_p6), %vm1771_vm0, %v1767_v0, 0.0  ;;  %v1775_v3 = vsel (!%p10602_p6), %vm1771_vm0, %v1768_v1, 0.0  ;;  %v6320_v21 = vld [vmem:[#allocation8] ss:$0 sm:$0xff] (!%p10602_p6) }
 0x3b0   : > { %1773 = vadd.xlane.f32.xlu0 (!%p10602_p6), %v1772_v2  ;;  %v6321_v23 = vld [vmem:[#allocation9] ss:$0 sm:$0xff] (!%p10602_p6) }
 0x3b4   : > { %1776 = vadd.xlane.f32.xlu0 (!%p10602_p6), %v1775_v3 }
 0x43d   : > { %v1774_v4 = vpop.xlane.xlu0 %1773 }
 0x43e   : > { %v1779_v5 = vmul.f32 0.03125, %v1774_v4 }
 0x440   : > { %v1781_v6 = vsub.f32 %v1767_v0, %v1779_v5 }
 0x441   : > { %v1777_v7 = vpop.xlane.xlu0 %1776 }
 0x442   : > { %v1780_v8 = vmul.f32 0.03125, %v1777_v7  ;;  %v1783_v9 = vmul.f32 %v1781_v6, %v1781_v6 }
 0x444   : > { %v1782_v10 = vsub.f32 %v1768_v1, %v1780_v8  ;;  %v1785_v11 = vsel %vm1771_vm0, %v1783_v9, 0.0 }
 0x445   : > { %1786 = vadd.xlane.f32.xlu1 %v1785_v11 }
 0x446   : > { %v1784_v12 = vmul.f32 %v1782_v10, %v1782_v10 }
 0x448   : > { %v1788_v13 = vsel %vm1771_vm0, %v1784_v12, 0.0 }
 0x449   : > { %1789 = vadd.xlane.f32.xlu1 %v1788_v13 }
 0x4d2   : > { %v1787_v14 = vpop.xlane.xlu1 %1786 }
 0x4d3   : > { %v1791_v15 = vmul.f32 0.03125, %v1787_v14 }
 0x4d5   : > { %v1793_v16 = vadd.f32 1e-12, %v1791_v15 }
 0x4d6   : > { %v1790_v17 = vpop.xlane.xlu1 %1789 }
 0x4d7   : > { %6946 = vrsqrt.f32 %v1793_v16  ;;  %v1792_v18 = vmul.f32 0.03125, %v1790_v17 }
 0x4d9   : > { %v1794_v19 = vadd.f32 1e-12, %v1792_v18 }
 0x4db   : > { %6948 = vrsqrt.f32 %v1794_v19 }
 0x4e1   : > { %v6947_v20 = vpop.eup %6946 }
 0x4e2   : > { %v1797_v22 = vmul.f32 %v6947_v20, %v1781_v6 }
 0x4e4   : > { %v1805_v24 = vmul.f32 %v6320_v21, %v1797_v22 }
 0x4e5   : > { %v6949_v25 = vpop.eup %6948 }
 0x4e6   : > { %v1813_v26 = vadd.f32 %v6321_v23, %v1805_v24  ;;  %v1798_v27 = vmul.f32 %v6949_v25, %v1782_v10 }
 0x4e8   : > { %1815 = vst.msk [vmem:[#allocation2] sm:$0xff] %vm1771_vm0, %v1813_v26  ;;  %v1806_v28 = vmul.f32 %v6320_v21, %v1798_v27 }
 0x4ea   : > { %v1814_v29 = vadd.f32 %v6321_v23, %v1806_v28 }
 0x4ec   : > { %1816 = vst.msk [vmem:[#allocation2 + $0x8] sm:$0xff] %vm1771_vm0, %v1814_v29 }
 0x4ed PF: > { %v6950_v30 = vld [vmem:[%s9030_s2] sm:$0xff]   ;;  %v8132_v31 = vmov 0.0   ;;  %v6951_v32 = vld [vmem:[%s9030_s2 + $0x8] sm:$0xff]   ;;  %vm8133_vm1 = vmmov 0   ;;  %vm1874_vm2 = vcmask 261120   ;;  %vm2041_vm3 = vcmask 130048  }
 0x4ee   : > { %6486 = vmatprep.subr.bf16.mxu1 %v8132_v31  ;;  %6478 = vmatprep.subr.bf16.mxu0 %v8132_v31  ;;  %v6952_v33 = vld [vmem:[%s9019_s14] sm:$0xff]   ;;  %v6953_v36 = vld [vmem:[%s9019_s14 + $0x8] sm:$0xff]   ;;  %v6955_v39 = vld [vmem:[%s9033_s23 + $0x8] sm:$0xff]   ;;  %vm2164_vm4 = vcmask 1043456   ;;  %vm2134_vm5 = vcmask 64512   ;;  %vm2929_vm6 = vcmask 523264  }
 0x4ef   : > { %6487 = vmatpush3.bf16.msra.mxu1 %v6950_v30  ;;  %6490 = vmatprep.mubr.msk.bf16.mxu1 %vm8133_vm1, %v8132_v31  ;;  %v9097_v34 = vld [vmem:[#allocation2] sm:$0xff]  ;;  %v6326_v40 = vld [vmem:[%s1463_s7] ss:$0 sm:$0xff]  ;;  %v6322_v45 = vld [vmem:[%s1445_s4] ss:$0 sm:$0xff] }
 0x4f0   : > { %6488 = vmatprep.subr.bf16.mxu1 %v8132_v31  ;;  %6482 = vmatprep.mubr.msk.bf16.mxu0 %vm8133_vm1, %v8132_v31  ;;  %v6954_v38 = vld [vmem:[%s9033_s23] sm:$0xff]   ;;  %v9147_v8 = vld [vmem:[#allocation6 + $0x8] sm:$0xff] }
 0x4f1   : > { %6479 = vmatpush3.bf16.msra.mxu0 %v6952_v33  ;;  %v6330_v57 = vld [vmem:[%s1481_s15] ss:$0 sm:$0xff]  ;;  %v9149_v10 = vld [vmem:[#allocation6] sm:$0xff] }
 0x4f2   : > { %6480 = vmatprep.subr.bf16.mxu0 %v8132_v31 }
 0x4f3   : > { %v9099_v35 = vld [vmem:[#allocation2 + $0x8] sm:$0xff]  ;;  %6489 = vmatpush3.bf16.msra.mxu1 %v6951_v32 }
 0x4f4   : > { %v9106_v37 = vpack.c.bf16 %v9099_v35, %v9097_v34  ;;  %6502 = vmatprep.subr.bf16.mxu1 %v8132_v31 }
 0x4f5   : > { %6481 = vmatpush3.bf16.msra.mxu0 %v6953_v36 }
 0x4f6   : > { %6491 = vmatmul.mubr.msk.bf16.vlgmr.msra.gmra.mrb[0].mxu1 %vm1874_vm2, %v9106_v37  ;;  %6494 = vmatprep.subr.bf16.mxu0 %v8132_v31 }
 0x4f7   : > { %6504 = vmatprep.mubr.msk.bf16.mxu1 %vm8133_vm1, %v8132_v31 }
 0x4f8   : > { %6483 = vmatmul.mubr.msk.bf16.vlgmr.msra.gmra.mrb[0].mxu0 %vm1874_vm2, %v9106_v37 }
 0x4f9   : > { %6495 = vmatpush3.bf16.msra.mxu0 %v6954_v38  ;;  %6498 = vmatprep.mubr.msk.bf16.mxu0 %vm8133_vm1, %v8132_v31 }
 0x4fa   : > { %6496 = vmatprep.subr.bf16.mxu0 %v8132_v31 }
 0x4fd   : > { %6497 = vmatpush3.bf16.msra.mxu0 %v6955_v39  ;;  %v6956_v39 = vld [vmem:[%s9030_s2 + $0x10] sm:$0xff]  }
 0x4fe   : > { %6508 = vmatprep.subr.bf16.mxu0 %v8132_v31 }
 0x500   : > { %6499 = vmatmul.mubr.msk.bf16.vlgmr.msra.gmra.mrb[4].mxu0 %vm1874_vm2, %v9106_v37 }
 0x501   : > { %6510 = vmatprep.mubr.msk.bf16.mxu0 %vm8133_vm1, %v8132_v31 }
 0x5c9   : > { %v1971_v41 = vpop.f32.mrb[0].mxu1 }
 0x5ca   : > { %v1972_v42 = vadd.f32 %v6326_v40, %v1971_v41  ;;  %v6492_v43 = vpop.f32.mrb[1].mxu1 }
 0x5cb   : > { %v1974_v44 = vpop.f32.mrb[2].mxu1  ;;  %v1912_v46 = vpop.f32.mrb[0].mxu0  ;;  %v6957_v43 = vld [vmem:[%s9030_s2 + $0x18] sm:$0xff]  }
 0x5cc   : > { %v2039_v47 = vpack.c.bf16 %v1972_v42, %v1972_v42  ;;  %v1975_v48 = vadd.f32 %v6326_v40, %v1974_v44  ;;  %v6493_v49 = vpop.f32.mrb[3].mxu1  ;;  %v6484_v50 = vpop.f32.mrb[1].mxu0  ;;  %v1913_v54 = vadd.f32 %v6322_v45, %v1912_v46  ;;  %v6958_v44 = vld [vmem:[%s9019_s14 + $0x10] sm:$0xff]   ;;  %v6959_v46 = vld [vmem:[%s9019_s14 + $0x18] sm:$0xff]  }
 0x5cd   : > { %v1915_v51 = vpop.f32.mrb[2].mxu0 }
 0x5ce   : > { %v2046_v52 = vsel %vm2041_vm3, %v2039_v47, 0  ;;  %v2040_v53 = vpack.c.bf16 %v1975_v48, %v1975_v48  ;;  %v6485_v55 = vpop.f32.mrb[3].mxu0  ;;  %v2037_v58 = vpack.c.bf16 %v1913_v54, %v1913_v54  ;;  %v1916_v59 = vadd.f32 %v6322_v45, %v1915_v51  ;;  %v6960_v47 = vld [vmem:[%s9033_s23 + $0x10] sm:$0xff]   ;;  %v6961_v48 = vld [vmem:[%s9033_s23 + $0x18] sm:$0xff]  }
 0x5cf   : > { %6503 = vmatpush3.bf16.xpose.msra.mxu1 %v2046_v52 }
 0x5d0   : > { %v2092_v56 = vsel %vm2041_vm3, %v2040_v53, 0  ;;  %6514 = vmatprep.subr.bf16.mxu1 %v8132_v31  ;;  %v2038_v0 = vpack.c.bf16 %v1916_v59, %v1916_v59 }
 0x5d1   : > { %6509 = vmatpush3.bf16.xpose.msra.mxu0 %v2092_v56 }
 0x5d2   : > { %6520 = vmatprep.subr.bf16.mxu0 %v8132_v31 }
 0x5d3   : > { %v2030_v60 = vpop.f32.mrb[4].mxu0 }
 0x5d4   : > { %v2031_v61 = vadd.f32 %v6330_v57, %v2030_v60  ;;  %v6500_v62 = vpop.f32.mrb[5].mxu0 }
 0x5d5   : > { %v2033_v63 = vpop.f32.mrb[6].mxu0  ;;  %v6338_v62 = vld [vmem:[%s1445_s4 + $0x1] ss:$0 sm:$0xff] }
 0x5d6   : > { %6505 = vmatmul.mubr.msk.bf16.vlgmr.msra.gmra.mrb[4].mxu1 %vm2041_vm3, %v2037_v58  ;;  %v2159_v1 = vpack.c.bf16 %v2031_v61, %v2031_v61  ;;  %v2034_v2 = vadd.f32 %v6330_v57, %v2033_v63  ;;  %v6501_v3 = vpop.f32.mrb[7].mxu0  ;;  %v6342_v57 = vld [vmem:[%s1463_s7 + $0x1] ss:$0 sm:$0xff] }
 0x5d7   : > { %6516 = vmatprep.mubr.msk.bf16.mxu1 %vm8133_vm1, %v8132_v31 }
 0x5d8   : > { %6511 = vmatmul.mubr.msk.bf16.vlgmr.msra.gmra.mrb[8].mxu0 %vm2041_vm3, %v2038_v0  ;;  %v2166_v4 = vsel %vm2164_vm4, %v2159_v1, 0  ;;  %v2160_v5 = vpack.c.bf16 %v2034_v2, %v2034_v2 }
 0x5d9   : > { %6515 = vmatpush3.bf16.msra.mxu1 %v2166_v4  ;;  %6522 = vmatprep.mubr.msk.bf16.mxu0 %vm8133_vm1, %v8132_v31 }
 0x5da   : > { %v2212_v6 = vsel %vm2164_vm4, %v2160_v5, 0  ;;  %6526 = vmatprep.subr.bf16.mxu1 %v8132_v31 }
 0x5db   : > { %6521 = vmatpush3.bf16.msra.mxu0 %v2212_v6 }
 0x5dc   : > { %6534 = vmatprep.subr.bf16.mxu0 %v8132_v31 }
 0x6a9   : > { %v2082_v7 = vpop.f32.mrb[4].mxu1 }
 0x6aa   : > { %v6506_v9 = vpop.f32.mrb[5].mxu1  ;;  %v2083_v17 = vadd.f32 %v2082_v7, %v9149_v10 }
 0x6ab   : > { %v2085_v11 = vpop.f32.mrb[6].mxu1  ;;  %v2128_v12 = vpop.f32.mrb[8].mxu0 }
 0x6ac   : > { %v2129_v13 = vadd.f32 %v2128_v12, %v9147_v8  ;;  %v6507_v14 = vpop.f32.mrb[7].mxu1  ;;  %v6512_v15 = vpop.f32.mrb[9].mxu0  ;;  %v2135_v20 = vsel %vm2134_vm5, %v2083_v17, -inf }
 0x6ad   : > { %v2131_v16 = vpop.f32.mrb[10].mxu0  ;;  %v6346_v15 = vld [vmem:[%s1481_s15 + $0x1] ss:$0 sm:$0xff] }
 0x6ae   : > { %v6513_v18 = vpop.f32.mrb[11].mxu0  ;;  %v2138_v19 = vsel %vm2134_vm5, %v2129_v13, -inf }
 0x6af   : > { %2139 = vmax.xlane.f32.xlu0 %v2138_v19 }
 0x6b3   : > { %2136 = vmax.xlane.f32.xlu0 %v2135_v20 }
 0x73c   : > { %v2140_v21 = vpop.xlane.xlu0 %2139 }
 0x73d   : > { %v2142_v22 = vsub.f32 %v2129_v13, %v2140_v21 }
 0x73f   : > { %v2145_v23 = vmul.f32 1.442695, %v2142_v22 }
 0x740   : > { %v2137_v24 = vpop.xlane.xlu0 %2136 }
 0x741   : > { %6970 = vpow2.f32 %v2145_v23  ;;  %v2141_v25 = vsub.f32 %v2083_v17, %v2137_v24 }
 0x743   : > { %v2143_v26 = vmul.f32 1.442695, %v2141_v25 }
 0x745   : > { %6972 = vpow2.f32 %v2143_v26 }
 0x74b   : > { %v6971_v27 = vpop.eup %6970 }
 0x74c   : > { %v2150_v28 = vsel %vm2134_vm5, %v6971_v27, 0.0 }
 0x74d   : > { %2151 = vadd.xlane.f32.xlu1 %v2150_v28 }
 0x74f   : > { %v6973_v29 = vpop.eup %6972 }
 0x750   : > { %v2147_v30 = vsel %vm2134_vm5, %v6973_v29, 0.0 }
 0x751   : > { %2148 = vadd.xlane.f32.xlu1 %v2147_v30 }
 0x7da   : > { %v2152_v32 = vpop.xlane.xlu1 %2151 }
 0x7db   : > { %6974 = vrcp.f32 %v2152_v32 }
 0x7de   : > { %v2149_v33 = vpop.xlane.xlu1 %2148 }
 0x7df   : > { %6976 = vrcp.f32 %v2149_v33 }
 0x7e5   : > { %v6975_v36 = vpop.eup %6974 }
 0x7e6   : > { %v2156_v38 = vmul.f32 %v6975_v36, %v6971_v27 }
 0x7e8   : > { %v2158_v40 = vpack.c.bf16 %v2156_v38, %v2156_v38 }
 0x7e9   : > { %v6977_v41 = vpop.eup %6976 }
 0x7ea   : > { %v2155_v42 = vmul.f32 %v6977_v41, %v6973_v29  ;;  %6523 = vmatmul.mubr.msk.bf16.vlgmr.msra.gmra.mrb[12].mxu0 %vm2134_vm5, %v2158_v40 }
 0x7eb   : > { %6535 = vmatpush3.bf16.msra.mxu0 %v6956_v39  ;;  %6538 = vmatprep.mubr.msk.bf16.mxu0 %vm8133_vm1, %v8132_v31 }
 0x7ec   : > { %v2157_v45 = vpack.c.bf16 %v2155_v42, %v2155_v42  ;;  %6536 = vmatprep.subr.bf16.mxu0 %v8132_v31 }
 0x7ee   : > { %6517 = vmatmul.mubr.msk.bf16.vlgmr.msra.gmra.mrb[8].mxu1 %vm2134_vm5, %v2157_v45 }
 0x7ef   : > { %6537 = vmatpush3.bf16.msra.mxu0 %v6957_v43  ;;  %6527 = vmatpush3.bf16.msra.mxu1 %v6958_v44 }
 0x7f0   : > { %6528 = vmatprep.subr.bf16.mxu1 %v8132_v31  ;;  %6530 = vmatprep.mubr.msk.bf16.mxu1 %vm8133_vm1, %v8132_v31 }
 0x7f1   : > { %6550 = vmatprep.subr.bf16.mxu0 %v8132_v31 }
 0x7f2   : > { %6539 = vmatmul.mubr.msk.bf16.vlgmr.msra.gmra.mrb[16].mxu0 %vm1874_vm2, %v9106_v37 }
 0x7f3   : > { %6529 = vmatpush3.bf16.msra.mxu1 %v6959_v46  ;;  %6552 = vmatprep.mubr.msk.bf16.mxu0 %vm8133_vm1, %v8132_v31 }
 0x7f4   : > { %6542 = vmatprep.subr.bf16.mxu1 %v8132_v31 }
 0x7f6   : > { %6531 = vmatmul.mubr.msk.bf16.vlgmr.msra.gmra.mrb[12].mxu1 %vm1874_vm2, %v9106_v37 }
 0x7f7   : > { %6546 = vmatprep.mubr.msk.bf16.mxu1 %vm8133_vm1, %v8132_v31  ;;  %6543 = vmatpush3.bf16.msra.mxu1 %v6960_v47 }
 0x7f8   : > { %6544 = vmatprep.subr.bf16.mxu1 %v8132_v31 }
 0x7fb   : > { %6545 = vmatpush3.bf16.msra.mxu1 %v6961_v48 }
 0x7fc   : > { %6556 = vmatprep.subr.bf16.mxu1 %v8132_v31 }
 0x7fe   : > { %6547 = vmatmul.mubr.msk.bf16.vlgmr.msra.gmra.mrb[16].mxu1 %vm1874_vm2, %v9106_v37 }
 0x7ff   : > { %6558 = vmatprep.mubr.msk.bf16.mxu1 %vm8133_vm1, %v8132_v31 }
 0x8bd   : > { %v9187_v49 = vpop.f32.mrb[12].mxu0 }
 0x8be   : > { %v6524_v50 = vpop.f32.mrb[13].mxu0 }
 0x8bf   : > { %v2251_v51 = vpop.f32.mrb[14].mxu0 }
 0x8c0   : > { %v6525_v52 = vpop.f32.mrb[15].mxu0 }
 0x8c1   : > { %v9189_v53 = vpop.f32.mrb[8].mxu1 }
 0x8c2   : > { %v2254_v54 = vpack.c.bf16 %v9187_v49, %v9189_v53  ;;  %v6518_v55 = vpop.f32.mrb[9].mxu1 }
 0x8c3   : > { %v2205_v56 = vpop.f32.mrb[10].mxu1 }
 0x8c4   : > { %v6519_v58 = vpop.f32.mrb[11].mxu1 }
 0x8c5   : > { %v2366_v37 = vpop.f32.mrb[16].mxu0  ;;  %v6963_v58 = vld [vmem:[%s9036_s26 + $0x8] sm:$0xff]  }
 0x8c6   : > { %v2367_v59 = vadd.f32 %v6342_v57, %v2366_v37  ;;  %v6540_v60 = vpop.f32.mrb[17].mxu0 }
 0x8c7   : > { %v2369_v61 = vpop.f32.mrb[18].mxu0  ;;  %v6962_v60 = vld [vmem:[%s9036_s26] sm:$0xff]  }
 0x8c8   : > { %v2434_v63 = vpack.c.bf16 %v2367_v59, %v2367_v59  ;;  %v2370_v0 = vadd.f32 %v6342_v57, %v2369_v61  ;;  %v6541_v1 = vpop.f32.mrb[19].mxu0 }
 0x8c9   : > { %v2307_v2 = vpop.f32.mrb[12].mxu1 }
 0x8ca   : > { %v2440_v3 = vsel %vm2041_vm3, %v2434_v63, 0  ;;  %v2435_v4 = vpack.c.bf16 %v2370_v0, %v2370_v0  ;;  %v2308_v5 = vadd.f32 %v6338_v62, %v2307_v2  ;;  %v6532_v6 = vpop.f32.mrb[13].mxu1 }
 0x8cb   : > { %6551 = vmatpush3.bf16.xpose.msra.mxu0 %v2440_v3  ;;  %v2310_v7 = vpop.f32.mrb[14].mxu1 }
 0x8cc   : > { %v2486_v9 = vsel %vm2041_vm3, %v2435_v4, 0  ;;  %v6533_v11 = vpop.f32.mrb[15].mxu1  ;;  %6562 = vmatprep.subr.bf16.mxu0 %v8132_v31  ;;  %v2432_v12 = vpack.c.bf16 %v2308_v5, %v2308_v5  ;;  %v2311_v13 = vadd.f32 %v6338_v62, %v2310_v7 }
 0x8cd   : > { %6557 = vmatpush3.bf16.xpose.msra.mxu1 %v2486_v9 }
 0x8ce   : > { %6568 = vmatprep.subr.bf16.mxu1 %v8132_v31  ;;  %v2433_v14 = vpack.c.bf16 %v2311_v13, %v2311_v13 }
 0x8d1   : > { %v2425_v16 = vpop.f32.mrb[16].mxu1 }
 0x8d2   : > { %6553 = vmatmul.mubr.msk.bf16.vlgmr.msra.gmra.mrb[20].mxu0 %vm2041_vm3, %v2432_v12  ;;  %v2426_v17 = vadd.f32 %v6346_v15, %v2425_v16  ;;  %v6548_v18 = vpop.f32.mrb[17].mxu1 }
 0x8d3   : > { %6564 = vmatprep.mubr.msk.bf16.mxu0 %vm8133_vm1, %v8132_v31  ;;  %v2428_v19 = vpop.f32.mrb[18].mxu1 }
 0x8d4   : > { %6559 = vmatmul.mubr.msk.bf16.vlgmr.msra.gmra.mrb[20].mxu1 %vm2041_vm3, %v2433_v14  ;;  %v2552_v20 = vpack.c.bf16 %v2426_v17, %v2426_v17  ;;  %v2429_v21 = vadd.f32 %v6346_v15, %v2428_v19  ;;  %v6549_v22 = vpop.f32.mrb[19].mxu1  ;;  %v6358_v14 = vld [vmem:[%s1498_s1] ss:$0 sm:$0xff] }
 0x8d5   : > { %6570 = vmatprep.mubr.msk.bf16.mxu1 %vm8133_vm1, %v8132_v31 }
 0x8d6   : > { %v2558_v23 = vsel %vm2164_vm4, %v2552_v20, 0  ;;  %v2553_v24 = vpack.c.bf16 %v2429_v21, %v2429_v21 }
 0x8d7   : > { %6563 = vmatpush3.bf16.msra.mxu0 %v2558_v23 }
 0x8d8   : > { %v2604_v25 = vsel %vm2164_vm4, %v2553_v24, 0  ;;  %6574 = vmatprep.subr.bf16.mxu0 %v8132_v31 }
 0x8d9   : > { %6569 = vmatpush3.bf16.msra.mxu1 %v2604_v25 }
 0x8da   : > { %6580 = vmatprep.subr.bf16.mxu1 %v8132_v31 }
 0x9a5   : > { %v2476_v26 = vpop.f32.mrb[20].mxu0 }
 0x9a6   : > { %v2477_v27 = vadd.f32 %v2476_v26, %v9149_v10  ;;  %v6554_v28 = vpop.f32.mrb[21].mxu0 }
 0x9a7   : > { %v2479_v29 = vpop.f32.mrb[22].mxu0  ;;  %v2522_v30 = vpop.f32.mrb[20].mxu1 }
 0x9a8   : > { %v2523_v32 = vadd.f32 %v2522_v30, %v9147_v8  ;;  %v6555_v33 = vpop.f32.mrb[23].mxu0  ;;  %v6560_v36 = vpop.f32.mrb[21].mxu1  ;;  %v2528_v38 = vsel %vm2134_vm5, %v2477_v27, -inf }
 0x9a9   : > { %v2525_v39 = vpop.f32.mrb[22].mxu1  ;;  %2529 = vmax.xlane.f32.xlu0 %v2528_v38  ;;  %v6965_v33 = vld [vmem:[%s9041_s8 + $0x8] sm:$0xff]  }
 0x9aa   : > { %v6561_v40 = vpop.f32.mrb[23].mxu1  ;;  %v2531_v41 = vsel %vm2134_vm5, %v2523_v32, -inf }
 0x9ab   : > { %2532 = vmax.xlane.f32.xlu1 %v2531_v41 }
 0xa36   : > { %v2530_v42 = vpop.xlane.xlu0 %2529 }
 0xa37   : > { %v2534_v43 = vsub.f32 %v2477_v27, %v2530_v42 }
 0xa38   : > { %v2533_v44 = vpop.xlane.xlu1 %2532 }
 0xa39   : > { %v2536_v45 = vmul.f32 1.442695, %v2534_v43  ;;  %v2535_v10 = vsub.f32 %v2523_v32, %v2533_v44  ;;  %v6964_v32 = vld [vmem:[%s9041_s8] sm:$0xff]   ;;  %v6359_v44 = vld [vmem:[%s1506_s0] ss:$0 sm:$0xff] }
 0xa3b   : > { %6978 = vpow2.f32 %v2536_v45  ;;  %v2538_v46 = vmul.f32 1.442695, %v2535_v10 }
 0xa3d   : > { %6980 = vpow2.f32 %v2538_v46 }
 0xa45   : > { %v6979_v8 = vpop.eup %6978 }
 0xa46   : > { %v2540_v47 = vsel %vm2134_vm5, %v6979_v8, 0.0 }
 0xa47   : > { %v6981_v48 = vpop.eup %6980  ;;  %2541 = vadd.xlane.f32.xlu0 %v2540_v47  ;;  %v6360_v47 = vld [vmem:[%s1514_s28] ss:$0 sm:$0xff] }
 0xa48   : > { %v2543_v50 = vsel %vm2134_vm5, %v6981_v48, 0.0 }
 0xa49   : > { %2544 = vadd.xlane.f32.xlu1 %v2543_v50 }
 0xad4   : > { %v2542_v51 = vpop.xlane.xlu0 %2541 }
 0xad5   : > { %6982 = vrcp.f32 %v2542_v51 }
 0xad6   : > { %v2545_v52 = vpop.xlane.xlu1 %2544 }
 0xad7   : > { %6984 = vrcp.f32 %v2545_v52 }
 0xadf   : > { %v6983_v55 = vpop.eup %6982 }
 0xae0   : > { %v2548_v56 = vmul.f32 %v6983_v55, %v6979_v8  ;;  %v6966_v55 = vld [vmem:[%s9044_s12] sm:$0xff]  }
 0xae1   : > { %v6985_v57 = vpop.eup %6984 }
 0xae2   : > { %v2549_v37 = vmul.f32 %v6985_v57, %v6981_v48  ;;  %v2550_v59 = vpack.c.bf16 %v2548_v56, %v2548_v56  ;;  %v6967_v56 = vld [vmem:[%s9044_s12 + $0x8] sm:$0xff]   ;;  %v6968_v57 = vld [vmem:[%s9044_s12 + $0x10] sm:$0xff]  }
 0xae4   : > { %6565 = vmatmul.mubr.msk.bf16.vlgmr.msra.gmra.mrb[24].mxu0 %vm2134_vm5, %v2550_v59  ;;  %v2551_v61 = vpack.c.bf16 %v2549_v37, %v2549_v37  ;;  %v6361_v37 = vld [vmem:[%s1531_s9] ss:$0 sm:$0xff] }
 0xae5   : > { %6575 = vmatpush3.bf16.msra.mxu0 %v6963_v58  ;;  %6576 = vmatprep.mubr.msk.bf16.mxu0 %vm8133_vm1, %v8132_v31  ;;  %v6969_v58 = vld [vmem:[%s9044_s12 + $0x18] sm:$0xff]  }
 0xae6   : > { %6571 = vmatmul.mubr.msk.bf16.vlgmr.msra.gmra.mrb[24].mxu1 %vm2134_vm5, %v2551_v61  ;;  %6586 = vmatprep.subr.bf16.mxu0 %v8132_v31 }
 0xae7   : > { %6581 = vmatpush3.bf16.msra.mxu1 %v6962_v60  ;;  %6582 = vmatprep.mubr.msk.bf16.mxu1 %vm8133_vm1, %v8132_v31 }
 0xae8   : > { %6594 = vmatprep.subr.bf16.mxu1 %v8132_v31 }
 0xaee   : > { %6583 = vmatmul.mubr.msk.bf16.vlgmr.msra.gmra.mrb[28].mxu1 %vm2041_vm3, %v2254_v54 }
 0xaef   : > { %6602 = vmatprep.mubr.msk.bf16.mxu1 %vm8133_vm1, %v8132_v31  ;;  %6595 = vmatpush3.bf16.msra.mxu1 %v6966_v55 }
 0xaf0   : > { %6596 = vmatprep.subr.bf16.mxu1 %v8132_v31 }
 0xaf3   : > { %6597 = vmatpush3.bf16.msra.mxu1 %v6967_v56 }
 0xaf4   : > { %6598 = vmatprep.subr.bf16.mxu1 %v8132_v31 }
 0xaf7   : > { %6599 = vmatpush3.bf16.msra.mxu1 %v6968_v57 }
 0xaf8   : > { %6600 = vmatprep.subr.bf16.mxu1 %v8132_v31 }
 0xafb   : > { %6601 = vmatpush3.bf16.msra.mxu1 %v6969_v58 }
 0xbb7   : > { %v2594_v62 = vpop.f32.mrb[24].mxu0 }
 0xbb8   : > { %v6566_v63 = vpop.f32.mrb[25].mxu0 }
 0xbb9   : > { %v2597_v0 = vpop.f32.mrb[26].mxu0  ;;  %v2640_v1 = vpop.f32.mrb[24].mxu1 }
 0xbba   : > { %v2646_v2 = vpack.c.bf16 %v2640_v1, %v2594_v62  ;;  %v6567_v3 = vpop.f32.mrb[27].mxu0  ;;  %v6572_v4 = vpop.f32.mrb[25].mxu1 }
 0xbbb   : > { %v2643_v5 = vpop.f32.mrb[26].mxu1 }
 0xbbc   : > { %v6573_v6 = vpop.f32.mrb[27].mxu1  ;;  %6577 = vmatmul.mubr.msk.bf16.vlgmr.msra.gmra.mrb[28].mxu0 %vm2041_vm3, %v2646_v2 }
 0xbbd   : > { %6590 = vmatprep.mubr.msk.bf16.mxu0 %vm8133_vm1, %v8132_v31  ;;  %6587 = vmatpush3.bf16.msra.mxu0 %v6964_v32 }
 0xbbe   : > { %6588 = vmatprep.subr.bf16.mxu0 %v8132_v31 }
 0xbc1   : > { %v2740_v49 = vpop.f32.mrb[28].mxu1  ;;  %6589 = vmatpush3.bf16.msra.mxu0 %v6965_v33 }
 0xbc2   : > { %v6584_v53 = vpop.f32.mrb[29].mxu1 }
 0xbc3   : > { %v2743_v54 = vpop.f32.mrb[30].mxu1 }
 0xbc4   : > { %v6585_v7 = vpop.f32.mrb[31].mxu1 }
 0xc8f   : > { %v2690_v9 = vpop.f32.mrb[28].mxu0 }
 0xc90   : > { %v2741_v11 = vadd.f32 %v2740_v49, %v2690_v9  ;;  %v6578_v12 = vpop.f32.mrb[29].mxu0 }
 0xc91   : > { %v2693_v13 = vpop.f32.mrb[30].mxu0 }
 0xc92   : > { %v2747_v15 = vadd.f32 %v2741_v11, %v9097_v34  ;;  %v2744_v16 = vadd.f32 %v2743_v54, %v2693_v13  ;;  %v6579_v17 = vpop.f32.mrb[31].mxu0 }
 0xc94   : > { %v2748_v18 = vadd.f32 %v2744_v16, %v9099_v35  ;;  %v2756_v19 = vadd.f32 %v6358_v14, %v2747_v15 }
 0xc96   : > { %v2760_v20 = vsel %vm1874_vm2, %v2756_v19, 0.0  ;;  %v2757_v21 = vadd.f32 %v6358_v14, %v2748_v18  ;;  %v6365_v18 = vld [vmem:[%s1548_s13] ss:$0 sm:$0xff]  ;;  %s10603_s13 = sld [smem:[#allocation88_spill]] }
 0xc97   : > { %2761 = vadd.xlane.f32.xlu0 %v2760_v20 }
 0xc98   : > { %v2763_v22 = vsel %vm1874_vm2, %v2757_v21, 0.0 }
 0xc99   : > { %2764 = vadd.xlane.f32.xlu1 %v2763_v22 }
 0xc9c   : > { %p6373_p9 = scmp.ne.s32.totalorder %s10603_s13, 1 }
 0xc9d   : > { %v6998_v58 = vld [vmem:[#allocation31] sm:$0xff] (!%p6373_p9)  }
 0xc9e   : > { %6606 = vmatprep.subr.bf16.mxu0 (!%p6373_p9), %v6998_v58 }
 0xd24   : > { %v2762_v23 = vpop.xlane.xlu0 %2761 }
 0xd25   : > { %v2767_v24 = vmul.f32 0.03125, %v2762_v23 }
 0xd26   : > { %v2765_v25 = vpop.xlane.xlu1 %2764 }
 0xd27   : > { %v2769_v26 = vsub.f32 %v2756_v19, %v2767_v24  ;;  %v2768_v27 = vmul.f32 0.03125, %v2765_v25 }
 0xd29   : > { %v2770_v34 = vsub.f32 %v2757_v21, %v2768_v27  ;;  %v2771_v28 = vmul.f32 %v2769_v26, %v2769_v26 }
 0xd2b   : > { %v2773_v29 = vsel %vm1874_vm2, %v2771_v28, 0.0  ;;  %v2772_v35 = vmul.f32 %v2770_v34, %v2770_v34 }
 0xd2c   : > { %2774 = vadd.xlane.f32.xlu0 %v2773_v29 }
 0xd2d   : > { %v2776_v30 = vsel %vm1874_vm2, %v2772_v35, 0.0 }
 0xd2e   : > { %2777 = vadd.xlane.f32.xlu1 %v2776_v30 }
 0xdb9   : > { %v2775_v36 = vpop.xlane.xlu0 %2774 }
 0xdba   : > { %v2779_v38 = vmul.f32 0.03125, %v2775_v36 }
 0xdbb   : > { %v2778_v39 = vpop.xlane.xlu1 %2777 }
 0xdbc   : > { %v2781_v40 = vadd.f32 1e-12, %v2779_v38  ;;  %v2780_v41 = vmul.f32 0.03125, %v2778_v39 }
 0xdbe   : > { %6986 = vrsqrt.f32 %v2781_v40  ;;  %v2782_v42 = vadd.f32 1e-12, %v2780_v41 }
 0xdc0   : > { %6988 = vrsqrt.f32 %v2782_v42 }
 0xdc8   : > { %v6987_v43 = vpop.eup %6986 }
 0xdc9   : > { %v2785_v45 = vmul.f32 %v6987_v43, %v2769_v26 }
 0xdca   : > { %v6989_v10 = vpop.eup %6988 }
 0xdcb   : > { %v2793_v46 = vmul.f32 %v6359_v44, %v2785_v45  ;;  %v2786_v8 = vmul.f32 %v6989_v10, %v2770_v34 }
 0xdcd   : > { %v2794_v48 = vmul.f32 %v6359_v44, %v2786_v8  ;;  %v2801_v50 = vadd.f32 %v6360_v47, %v2793_v46  ;;  %v6371_v8 = vld [vmem:[%s1556_s16] ss:$0 sm:$0xff] }
 0xdcf   : > { %v2802_v51 = vadd.f32 %v6360_v47, %v2794_v48 }
 0xdd1   : > { %v2803_v52 = vpack.c.bf16 %v2802_v51, %v2801_v50 }
 0xdd3   : > { %6591 = vmatmul.mubr.msk.bf16.vlgmr.msra.gmra.mrb[32].mxu0 %vm1874_vm2, %v2803_v52 }
 0xdd4   : > { %6607 = vmatpush3.bf16.msra.mxu0 (!%p6373_p9), %v6998_v58 }
 0xea6   : > { %v2864_v59 = vpop.f32.mrb[32].mxu0 }
 0xea7   : > { %v2865_v60 = vadd.f32 %v6361_v37, %v2864_v59  ;;  %v6592_v61 = vpop.f32.mrb[33].mxu0  ;;  %v7000_v59 = vld [vmem:[#allocation31 + $0x8] sm:$0xff] (!%p6373_p9)  }
 0xea8   : > { %v2867_v62 = vpop.f32.mrb[34].mxu0  ;;  %6608 = vmatprep.subr.bf16.mxu0 (!%p6373_p9), %v7000_v59  ;;  %v3026_v61 = vld [vmem:[#allocation27] sm:$0xff] (!%p6373_p9) }
 0xea9   : > { %v2871_v63 = vmul.f32 %v2865_v60, %v2865_v60  ;;  %v2868_v0 = vadd.f32 %v6361_v37, %v2867_v62  ;;  %v6593_v1 = vpop.f32.mrb[35].mxu0  ;;  %v6999_v37 = vld [vmem:[#allocation34] sm:$0xff] (!%p6373_p9)   ;;  %v3027_v62 = vld [vmem:[#allocation27 + $0x8] sm:$0xff] (!%p6373_p9)  ;;  %6609 = vmatpush3.bf16.msra.mxu0 (!%p6373_p9), %v7000_v59 }
 0xeaa   : > { %6614 = vmatprep.subr.bf16.mxu1 (!%p6373_p9), %v6999_v37  ;;  %v3029_v1 = vld [vmem:[#allocation27 + $0x18] sm:$0xff] (!%p6373_p9) }
 0xeab   : > { %v2873_v2 = vmul.f32 %v2871_v63, %v2865_v60  ;;  %v2872_v3 = vmul.f32 %v2868_v0, %v2868_v0  ;;  %v3028_v63 = vld [vmem:[#allocation27 + $0x10] sm:$0xff] (!%p6373_p9) }
 0xead   : > { %v2875_v4 = vmul.f32 0.044715, %v2873_v2  ;;  %v2874_v5 = vmul.f32 %v2872_v3, %v2868_v0  ;;  %v3031_v2 = vpack.c.bf16 (!%p6373_p9), %v3029_v1, %v3028_v63  ;;  %v3191_v3 = vlaneseq (!%p6373_p9) }
 0xeaf   : > { %v2877_v6 = vadd.f32 %v2875_v4, %v2865_v60  ;;  %v2876_v49 = vmul.f32 0.044715, %v2874_v5  ;;  %v3192_v4 = vshrl.u32 (!%p6373_p9), %v3191_v3, 7  ;;  %v4710_v5 = vand.u32 (!%p6373_p9), 127, %v3191_v3 }
 0xeb1   : > { %v2879_v53 = vmul.f32 0.7978846, %v2877_v6  ;;  %v2878_v31 = vadd.f32 %v2876_v49, %v2868_v0  ;;  %v9286_v6 = vsub.s32 (!%p6373_p9), %v4710_v5, %v3192_v4  ;;  %v4715_v49 = vadd.s32 (!%p6373_p9), 4294967288, %v4710_v5 }
 0xeb3   : > { %6990 = vtanh.f32 %v2879_v53  ;;  %v2880_v54 = vmul.f32 0.7978846, %v2878_v31  ;;  %v4722_v53 = vadd.s32 (!%p6373_p9), 4294967280, %v4710_v5  ;;  %v4729_v31 = vadd.s32 (!%p6373_p9), 4294967272, %v4710_v5 }
 0xeb5   : > { %6992 = vtanh.f32 %v2880_v54  ;;  %v9288_v54 = vsub.s32 (!%p6373_p9), %v4715_v49, %v3192_v4 }
 0xebd   : > { %v6991_v7 = vpop.eup %6990 }
 0xebe   : > { %v2883_v9 = vadd.f32 1.0, %v6991_v7  ;;  %v9290_v7 = vsub.s32 (!%p6373_p9), %v4722_v53, %v3192_v4 }
 0xebf   : > { %v6993_v11 = vpop.eup %6992 }
 0xec0   : > { %v2885_v12 = vmul.f32 0.5, %v2883_v9  ;;  %v2884_v13 = vadd.f32 1.0, %v6993_v11  ;;  %v9292_v9 = vsub.s32 (!%p6373_p9), %v4729_v31, %v3192_v4  ;;  %v8134_v11 = vmov (!%p6373_p9), 1966171168  }
 0xec2   : > { %v2886_v14 = vmul.f32 0.5, %v2884_v13  ;;  %v2887_v15 = vmul.f32 %v2885_v12, %v2865_v60  ;;  %v7001_v60 = vld [vmem:[#allocation34 + $0x8] sm:$0xff] (!%p6373_p9)   ;;  %v3189_v12 = vunpack.c.l.s4 (!%p6373_p9), %v8134_v11 }
 0xec4   : > { %v2888_v16 = vmul.f32 %v2886_v14, %v2868_v0  ;;  %v3030_v0 = vpack.c.bf16 (!%p6373_p9), %v3027_v62, %v3026_v61  ;;  %v3190_v13 = vunpack.c.0.s8 (!%p6373_p9), %v3189_v12  ;;  %v6379_v14 = vld [vmem:[#allocation35] ss:$0 sm:$0xff] (!%p6373_p9) }
 0xec6   : > { %v2889_v17 = vpack.c.bf16 %v2888_v16, %v2887_v15  ;;  %6610 = vmatprep.mubr.msk.bf16.mxu0 (!%p6373_p9), %vm1874_vm2, %v3030_v0  ;;  %v9294_v16 = vsub.s32 (!%p6373_p9), %v3190_v13, %v3192_v4 }
 0xec7   : > { %6611 = vmatmul.mubr.msk.bf16.vlgmr.msra.gmra.mrb[0].mxu0 (!%p6373_p9), %vm1874_vm2, %v3031_v2 }
 0xec8   : > { %6603 = vmatmul.mubr.msk.bf16.vlgmr.msra.gmra.mrb[32].mxu1 %vm2929_vm6, %v2889_v17 }
 0xec9   : > { %6615 = vmatpush3.bf16.msra.mxu1 (!%p6373_p9), %v6999_v37  ;;  %6618 = vmatprep.mubr.msk.bf16.mxu1 (!%p6373_p9), %vm1874_vm2, %v3030_v0 }
 0xeca   : > { %6616 = vmatprep.subr.bf16.mxu1 (!%p6373_p9), %v7001_v60 }
 0xecd   : > { %6617 = vmatpush3.bf16.msra.mxu1 (!%p6373_p9), %v7001_v60 }
 0xed0   : > { %6619 = vmatmul.mubr.msk.bf16.vlgmr.msra.gmra.mrb[0].mxu1 (!%p6373_p9), %vm1874_vm2, %v3031_v2 }
 0xf9a   : > { %v6612_v15 = vpop.f32.mrb[0].mxu0 (!%p6373_p9) }
 0xf9b   : > { %v2967_v19 = vpop.f32.mrb[32].mxu1 }
 0xf9c   : > { %v2968_v20 = vadd.f32 %v6365_v18, %v2967_v19  ;;  %v6604_v21 = vpop.f32.mrb[33].mxu1 }
 0xf9d   : > { %v2970_v22 = vpop.f32.mrb[34].mxu1 }
 0xf9e   : > { %v2971_v23 = vadd.f32 %v6365_v18, %v2970_v22  ;;  %v6605_v24 = vpop.f32.mrb[35].mxu1  ;;  %v2974_v25 = vadd.f32 %v2968_v20, %v2801_v50  ;;  %v6372_v50 = vld [vmem:[%s1564_s17] ss:$0 sm:$0xff]  ;;  %v3095_v18 = vpop.f32.mrb[1].mxu0 (!%p6373_p9) }
 0xf9f   : > { %v6613_v21 = vpop.f32.mrb[2].mxu0 (!%p6373_p9)  ;;  %v6374_v22 = vld [vmem:[#allocation32] ss:$0 sm:$0xff] (!%p6373_p9) }
 0xfa0   : > { %v2978_v26 = vsel %vm1874_vm2, %v2974_v25, 0.0  ;;  %v2975_v27 = vadd.f32 %v2971_v23, %v2802_v51 }
 0xfa1   : > { %2979 = vadd.xlane.f32.xlu0 %v2978_v26 }
 0xfa2   : > { %v2981_v34 = vsel %vm1874_vm2, %v2975_v27, 0.0 }
 0xfa3   : > { %2982 = vadd.xlane.f32.xlu1 %v2981_v34  ;;  %v6620_v17 = vpop.f32.mrb[0].mxu1 (!%p6373_p9)  ;;  %v9297_v34 = vsub.s32 (!%p6373_p9), 0, %v3192_v4 }
 0xfa4   : > { %v3176_v19 = vadd.f32 (!%p6373_p9), %v6620_v17, %v6379_v14  ;;  %v3167_v20 = vpop.f32.mrb[1].mxu1 (!%p6373_p9) }
 0xfa5   : > { %v3168_v23 = vadd.f32 (!%p6373_p9), %v6379_v14, %v3167_v20  ;;  %v6621_v24 = vpop.f32.mrb[2].mxu1 (!%p6373_p9) }
 0xfa6   : > { %v3285_v26 = vcombine.high (!%p6373_p9), %v3176_v19, %v3176_v19 }
0x102e   : > { %v2980_v28 = vpop.xlane.xlu0 %2979 }
0x102f   : > { %v2984_v29 = vmul.f32 0.03125, %v2980_v28  ;;  %v3170_v28 = vpop.f32.mrb[3].mxu1 (!%p6373_p9) }
0x1030   : > { %v2983_v35 = vpop.xlane.xlu1 %2982 }
0x1031   : > { %v2986_v30 = vsub.f32 %v2974_v25, %v2984_v29  ;;  %v2985_v32 = vmul.f32 0.03125, %v2983_v35  ;;  %v3098_v25 = vpop.f32.mrb[3].mxu0 (!%p6373_p9)  ;;  %v9299_v29 = vadd.f32 (!%p6373_p9), %v6612_v15, %v6374_v22  ;;  %v3187_v35 = vcombine.high (!%p6373_p9), %v3168_v23, %v3168_v23 }
0x1033   : > { %v2987_v33 = vsub.f32 %v2975_v27, %v2985_v32  ;;  %v2988_v36 = vmul.f32 %v2986_v30, %v2986_v30  ;;  %v3292_v27 = vrot.slane (!%p6373_p9), %v3176_v19, %v9294_v16  ;;  %v9302_v32 = vadd.f32 (!%p6373_p9), %v6613_v21, %v6374_v22 }
0x1035   : > { %v2990_v38 = vsel %vm1874_vm2, %v2988_v36, 0.0  ;;  %v2989_v39 = vmul.f32 %v2987_v33, %v2987_v33  ;;  %v3300_v36 = vcombine.high (!%p6373_p9), %v3292_v27, %v3292_v27 }
0x1036   : > { %2991 = vadd.xlane.f32.xlu0 %v2990_v38  ;;  %v3308_v38 = vrot.slane (!%p6373_p9), %v3292_v27, %v9294_v16 }
0x1037   : > { %v2993_v40 = vsel %vm1874_vm2, %v2989_v39, 0.0  ;;  %v9306_v39 = vadd.f32 (!%p6373_p9), %v6374_v22, %v3095_v18 }
0x1038   : > { %2994 = vadd.xlane.f32.xlu1 %v2993_v40  ;;  %v3201_v40 = vrot.slane (!%p6373_p9), %v3187_v35, %v9294_v16  ;;  %v9341_v2 = vrot.slane (!%p6373_p9), %v3308_v38, %v9297_v34 }
0x10c3   : > { %v2992_v41 = vpop.xlane.xlu0 %2991 }
0x10c4   : > { %v2996_v42 = vmul.f32 0.03125, %v2992_v41 }
0x10c5   : > { %v2995_v43 = vpop.xlane.xlu1 %2994 }
0x10c6   : > { %v2998_v44 = vadd.f32 1e-12, %v2996_v42  ;;  %v2997_v45 = vmul.f32 0.03125, %v2995_v43  ;;  %v3179_v42 = vadd.f32 (!%p6373_p9), %v6621_v24, %v6379_v14  ;;  %v9309_v43 = vadd.f32 (!%p6373_p9), %v6374_v22, %v3098_v25 }
0x10c8   : > { %6994 = vrsqrt.f32 %v2998_v44  ;;  %v2999_v10 = vadd.f32 1e-12, %v2997_v45  ;;  %v3334_v60 = vcombine.high (!%p6373_p9), %v3179_v42, %v3179_v42  ;;  %v3341_v61 = vrot.slane (!%p6373_p9), %v3179_v42, %v9294_v16 }
0x10c9   : > { %v3608_v24 = vadd.f32 (!%p6373_p9), %v9341_v2, %v9309_v43 }
0x10ca   : > { %6996 = vrsqrt.f32 %v2999_v10  ;;  %v3322_v10 = vrot.slane (!%p6373_p9), %v3300_v36, %v9294_v16  ;;  %v3348_v17 = vrot.slane (!%p6373_p9), %v3334_v60, %v9294_v16  ;;  %v3349_v18 = vcombine.high (!%p6373_p9), %v3341_v61, %v3341_v61 }
0x10cb   : > { %v3357_v19 = vrot.slane (!%p6373_p9), %v3341_v61, %v9294_v16  ;;  %v3607_v36 = vadd.f32 (!%p6373_p9), %v9341_v2, %v9306_v39  ;;  %vm3736_vm7 = vcmp.gt.f32.partialorder (!%p6373_p9), %v3608_v24, 0.0 }
0x10cc   : > { %v3332_v58 = vcombine.high (!%p6373_p9), %v3322_v10, %v3322_v10  ;;  %v9346_v49 = vrot.slane (!%p6373_p9), %v3322_v10, %v9297_v34  ;;  %v3350_v25 = vcombine.high (!%p6373_p9), %v3348_v17, %v3348_v17  ;;  %v3371_v27 = vrot.slane (!%p6373_p9), %v3349_v18, %v9294_v16 }
0x10cd   : > { %vm3735_vm8 = vcmp.gt.f32.partialorder (!%p6373_p9), %v3607_v36, 0.0 }
0x10ce   : > { %v9332_v63 = vrot.slane (!%p6373_p9), %v3332_v58, %v9297_v34  ;;  %v9390_v42 = vrot.slane (!%p6373_p9), %v3371_v27, %v9297_v34 }
0x10d2   : > { %v6995_v46 = vpop.eup %6994 }
0x10d3   : > { %v3002_v47 = vmul.f32 %v6995_v46, %v2986_v30  ;;  %v3194_v30 = vrot.slane (!%p6373_p9), %v3168_v23, %v9294_v16  ;;  %v3171_v46 = vadd.f32 (!%p6373_p9), %v6379_v14, %v3170_v28  ;;  %v5418_v23 = vpack.c.bf16 (!%p6373_p9), %v9309_v43, %v9306_v39 }
0x10d4   : > { %v6997_v48 = vpop.eup %6996  ;;  %v3379_v28 = vcombine.high (!%p6373_p9), %v3357_v19, %v3357_v19 }
0x10d5   : > { %v3010_v51 = vmul.f32 %v6371_v8, %v3002_v47  ;;  %v3003_v52 = vmul.f32 %v6997_v48, %v2987_v33  ;;  %3025 = sbr.rel (%p6373_p9) target bundleno = 5714 (0x1652), region = 292  ;;  %v3299_v33 = vrot.slane (!%p6373_p9), %v3285_v26, %v9294_v16  ;;  %v3202_v41 = vcombine.high (!%p6373_p9), %v3194_v30, %v3194_v30  ;;  %6622 = vmatprep.subr.bf16.mxu0 (!%p6373_p9), %v5418_v23 }
0x10d6   : > { %v3217_v47 = vrot.slane (!%p6373_p9), %v3201_v40, %v9294_v16  ;;  %v9327_v37 = vrot.slane (!%p6373_p9), %v3194_v30, %v9294_v16  ;;  %v3236_v20 = vcombine.high (!%p6373_p9), %v3171_v46, %v3171_v46  ;;  %v3243_v22 = vrot.slane (!%p6373_p9), %v3171_v46, %v9294_v16  ;;  %6623 = vmatpush3.bf16.msra.mxu0 (!%p6373_p9), %v5418_v23 }
0x10d7   : > { %v9273_v55 = vadd.f32 %v6372_v50, %v3010_v51  ;;  %v3011_v56 = vmul.f32 %v6371_v8, %v3003_v52  ;;  %v3301_v44 = vcombine.high (!%p6373_p9), %v3299_v33, %v3299_v33  ;;  %v9312_v45 = vrot.slane (!%p6373_p9), %v3299_v33, %v9294_v16 }
0x10d8   : > { %v3203_v8 = vcombine.high (!%p6373_p9), %v3201_v40, %v3201_v40  ;;  %v9317_v48 = vrot.slane (!%p6373_p9), %v3202_v41, %v9294_v16  ;;  %v3330_v52 = vcombine.high (!%p6373_p9), %v3308_v38, %v3308_v38  ;;  %v3233_v3 = vcombine.high (!%p6373_p9), %v3217_v47, %v3217_v47 }
0x10d9   : > { %3020 = vst.msk [vmem:[#allocation2] sm:$0xff] %vm1874_vm2, %v9273_v55  ;;  %v9277_v57 = vadd.f32 %v6372_v50, %v3011_v56  ;;  %v9321_v50 = vpack.c.bf16 (!%p6373_p9), %v9302_v32, %v9299_v29  ;;  %v3329_v51 = vrot.slane (!%p6373_p9), %v3301_v44, %v9294_v16  ;;  %v3331_v56 = vcombine.high (!%p6373_p9), %v9312_v45, %v9312_v45 }
0x10da   : > { %v3231_v59 = vrot.slane (!%p6373_p9), %v3203_v8, %v9294_v16  ;;  %v3234_v4 = vcombine.high (!%p6373_p9), %v9317_v48, %v9317_v48  ;;  %v9349_v53 = vrot.slane (!%p6373_p9), %v3330_v52, %v9297_v34  ;;  %v9355_v11 = vrot.slane (!%p6373_p9), %v3217_v47, %v9297_v34 }
0x10db   : > { %3021 = vst.msk [vmem:[#allocation2 + $0x8] sm:$0xff] %vm1874_vm2, %v9277_v57  ;;  %v3333_v62 = vcombine.high (!%p6373_p9), %v3329_v51, %v3329_v51  ;;  %v9335_v0 = vrot.slane (!%p6373_p9), %v3329_v51, %v9297_v34  ;;  %v9338_v1 = vrot.slane (!%p6373_p9), %v3331_v56, %v9297_v34  ;;  %v9364_v14 = vrot.slane (!%p6373_p9), %v3233_v3, %v9297_v34 }
0x10dc   : > { %v3235_v5 = vcombine.high %v3231_v59, %v3231_v59  ;;  %v9358_v12 = vrot.slane %v3234_v4, %v9297_v34  ;;  %v9361_v13 = vrot.slane %v3231_v59, %v9297_v34  ;;  %v9373_v21 = vrot.slane %v9327_v37, %v9297_v34  ;;  %6624 = vmatprep.subr.bf16.mxu0 %v9321_v50 }
0x10dd   : > { %v9352_v31 = vrot.slane %v3333_v62, %v9297_v34  ;;  %v3364_v26 = vrot.slane %v3348_v17, %v9294_v16  ;;  %v3250_v35 = vrot.slane %v3236_v20, %v9294_v16  ;;  %v3251_v30 = vcombine.high %v3243_v22, %v3243_v22  ;;  %6625 = vmatpush3.bf16.msra.mxu0 %v9321_v50 }
0x10de   : > { %v9367_v15 = vrot.slane %v3235_v5, %v9297_v34  ;;  %v9384_v33 = vrot.slane %v3243_v22, %v9294_v16  ;;  %v3378_v38 = vrot.slane %v3350_v25, %v9294_v16  ;;  %v3381_v41 = vcombine.high %v3371_v27, %v3371_v27  ;;  %v9435_v22 = vld [vmem:[#allocation37] ss:$0 sm:$0xff] }
0x10df   : > { %v3380_v40 = vcombine.high %v3364_v26, %v3364_v26  ;;  %v9393_v44 = vrot.slane %v3379_v28, %v9297_v34  ;;  %v9396_v10 = vrot.slane %v3364_v26, %v9297_v34  ;;  %v3252_v46 = vcombine.high %v3250_v35, %v3250_v35 }
0x10e0   : > { %v3266_v8 = vrot.slane %v3250_v35, %v9294_v16  ;;  %v3382_v47 = vcombine.high %v3378_v38, %v3378_v38  ;;  %v9401_v51 = vrot.slane %v3381_v41, %v9297_v34  ;;  %v9404_v52 = vrot.slane %v3378_v38, %v9297_v34 }
0x10e1   : > { %v9407_v56 = vrot.slane %v3380_v40, %v9297_v34  ;;  %v3273_v58 = vrot.slane %v3251_v30, %v9294_v16  ;;  %v3280_v59 = vrot.slane %v3252_v46, %v9294_v16  ;;  %v3281_v60 = vcombine.high %v9384_v33, %v9384_v33 }
0x10e2   : > { %v3282_v61 = vcombine.high %v3266_v8, %v3266_v8  ;;  %v9414_v62 = vrot.slane %v3357_v19, %v9297_v34  ;;  %v9417_v3 = vrot.slane %v3382_v47, %v9297_v34  ;;  %v9420_v4 = vrot.slane %v3266_v8, %v9297_v34 }
0x10e3   : > { %v3283_v5 = vcombine.high %v3273_v58, %v3273_v58  ;;  %v3284_v17 = vcombine.high %v3280_v59, %v3280_v59  ;;  %v9424_v16 = vrot.slane %v3273_v58, %v9297_v34  ;;  %v9427_v18 = vrot.slane %v3281_v60, %v9297_v34 }
0x10e4   : > { %v9430_v19 = vrot.slane %v3280_v59, %v9297_v34  ;;  %v9433_v20 = vrot.slane %v3282_v61, %v9297_v34  ;;  %v3864_v23 = vmul.f32 0.2, %v3608_v24  ;;  %v3863_v26 = vmul.f32 0.2, %v3607_v36 }
0x10e5   : > { %v9438_v50 = vrot.slane %v3283_v5, %v9297_v34  ;;  %v9441_v25 = vrot.slane %v3284_v17, %v9297_v34  ;;  %v3612_v27 = vadd.f32 %v9346_v49, %v9309_v43  ;;  %v3609_v35 = vadd.f32 %v9341_v2, %v9299_v29 }
0x10e6   : > { %v3992_v28 = vsel %vm3736_vm7, %v3608_v24, %v3864_v23  ;;  %v3640_v30 = vadd.f32 %v9414_v62, %v9309_v43  ;;  %v3610_v38 = vadd.f32 %v9341_v2, %v9302_v32  ;;  %v3991_v41 = vsel %vm3735_vm8, %v3607_v36, %v3863_v26 }
0x10e7   : > { %v4126_v40 = vmul.f32 %v9435_v22, %v3992_v28  ;;  %vm3740_vm9 = vcmp.gt.f32.partialorder %v3612_v27, 0.0  ;;  %v3868_v46 = vmul.f32 0.2, %v3612_v27  ;;  %v4125_v8 = vmul.f32 %v9435_v22, %v3991_v41 }
0x10e8   : > { %vm3737_vm10 = vcmp.gt.f32.partialorder %v3609_v35, 0.0  ;;  %v3865_v47 = vmul.f32 0.2, %v3609_v35  ;;  %vm3768_vm11 = vcmp.gt.f32.partialorder %v3640_v30, 0.0  ;;  %v3896_v59 = vmul.f32 0.2, %v3640_v30 }
0x10e9   : > { %v4384_v24 = vsel %vm2041_vm3, %v4126_v40, 0.0  ;;  %v3996_v58 = vsel %vm3740_vm9, %v3612_v27, %v3868_v46  ;;  %vm3738_vm12 = vcmp.gt.f32.partialorder %v3610_v38, 0.0  ;;  %v4381_v60 = vsel %vm2041_vm3, %v4125_v8, 0.0 }
0x10ea   : > { %4385 = vadd.xlane.f32.xlu1 %v4384_v24  ;;  %v4130_v2 = vmul.f32 %v9435_v22, %v3996_v58  ;;  %v3993_v61 = vsel %vm3737_vm10, %v3609_v35, %v3865_v47  ;;  %v3866_v5 = vmul.f32 0.2, %v3610_v38  ;;  %4382 = vadd.xlane.f32.xlu0 %v4381_v60  ;;  %v4024_v17 = vsel %vm3768_vm11, %v3640_v30, %v3896_v59 }
0x10eb   : > { %v4127_v36 = vmul.f32 %v9435_v22, %v3993_v61  ;;  %v3613_v23 = vadd.f32 %v9346_v49, %v9299_v29  ;;  %v3543_v26 = vadd.f32 %v9373_v21, %v9306_v39  ;;  %v3616_v40 = vadd.f32 %v9349_v53, %v9309_v43 }
0x10ec   : > { %v4396_v27 = vsel %vm2041_vm3, %v4130_v2, 0.0  ;;  %v3994_v28 = vsel %vm3738_vm12, %v3610_v38, %v3866_v5  ;;  %v4158_v35 = vmul.f32 %v9435_v22, %v4024_v17  ;;  %v9469_v47 = vrot.slane %v9312_v45, %v9297_v34 }
0x10ed   : > { %v4387_v41 = vsel %vm2041_vm3, %v4127_v36, 0.0  ;;  %vm3741_vm13 = vcmp.gt.f32.partialorder %v3613_v23, 0.0  ;;  %v3869_v46 = vmul.f32 0.2, %v3613_v23  ;;  %v4128_v30 = vmul.f32 %v9435_v22, %v3994_v28 }
0x10ee   : > { %4397 = vadd.xlane.f32.xlu1 %v4396_v27  ;;  %vm3671_vm14 = vcmp.gt.f32.partialorder %v3543_v26, 0.0  ;;  %v3799_v8 = vmul.f32 0.2, %v3543_v26  ;;  %vm3744_vm15 = vcmp.gt.f32.partialorder %v3616_v40, 0.0  ;;  %4388 = vadd.xlane.f32.xlu0 %v4387_v41  ;;  %v3872_v24 = vmul.f32 0.2, %v3616_v40 }
0x10ef   : > { %v3997_v38 = vsel %vm3741_vm13, %v3613_v23, %v3869_v46  ;;  %v3544_v58 = vadd.f32 %v9373_v21, %v9309_v43  ;;  %v3614_v2 = vadd.f32 %v9346_v49, %v9302_v32  ;;  %v3545_v61 = vadd.f32 %v9373_v21, %v9299_v29 }
0x10f0   : > { %v4131_v59 = vmul.f32 %v9435_v22, %v3997_v38  ;;  %v3927_v60 = vsel %vm3671_vm14, %v3543_v26, %v3799_v8  ;;  %v4480_v5 = vsel %vm2041_vm3, %v4158_v35, 0.0  ;;  %v4000_v36 = vsel %vm3744_vm15, %v3616_v40, %v3872_v24 }
0x10f1   : > { %vm3672_vm0 = vcmp.gt.f32.partialorder %v3544_v58, 0.0  ;;  %v3800_v45 = vmul.f32 0.2, %v3544_v58  ;;  %v4390_v17 = vsel %vm2041_vm3, %v4128_v30, 0.0  ;;  %v4061_v23 = vmul.f32 %v9435_v22, %v3927_v60 }
0x10f2   : > { %4481 = vadd.xlane.f32.xlu1 %v4480_v5  ;;  %vm3742_vm1 = vcmp.gt.f32.partialorder %v3614_v2, 0.0  ;;  %v3870_v27 = vmul.f32 0.2, %v3614_v2  ;;  %4391 = vadd.xlane.f32.xlu0 %v4390_v17  ;;  %v4134_v26 = vmul.f32 %v9435_v22, %v4000_v36  ;;  %vm3673_vm4 = vcmp.gt.f32.partialorder %v3545_v61, 0.0 }
0x10f3   : > { %v3928_v28 = vsel %vm3672_vm0, %v3544_v58, %v3800_v45  ;;  %v3801_v41 = vmul.f32 0.2, %v3545_v61  ;;  %v4399_v46 = vsel %vm2041_vm3, %v4131_v59, 0.0  ;;  %v3642_v40 = vadd.f32 %v9414_v62, %v9302_v32 }
0x10f4   : > { %v4062_v35 = vmul.f32 %v9435_v22, %v3928_v28  ;;  %v3998_v8 = vsel %vm3742_vm1, %v3614_v2, %v3870_v27  ;;  %v3546_v30 = vadd.f32 %v9373_v21, %v9302_v32  ;;  %v3624_v24 = vadd.f32 %v9469_v47, %v9309_v43 }
0x10f5   : > { %v3929_v38 = vsel %vm3673_vm4, %v3545_v61, %v3801_v41  ;;  %v4189_v58 = vsel %vm2041_vm3, %v4061_v23, 0.0  ;;  %vm3770_vm5 = vcmp.gt.f32.partialorder %v3642_v40, 0.0  ;;  %v3898_v60 = vmul.f32 0.2, %v3642_v40 }
0x10f6   : > { %4400 = vadd.xlane.f32.xlu1 %v4399_v46  ;;  %v9493_v59 = vrot.slane %v9317_v48, %v9297_v34  ;;  %4190 = vadd.xlane.f32.xlu0 %v4189_v58  ;;  %v4408_v5 = vsel %vm2041_vm3, %v4134_v26, 0.0  ;;  %vm3674_vm6 = vcmp.gt.f32.partialorder %v3546_v30, 0.0  ;;  %v3802_v2 = vmul.f32 0.2, %v3546_v30 }
0x10f7   : > { %v4192_v61 = vsel %vm2041_vm3, %v4062_v35, 0.0  ;;  %v4132_v21 = vmul.f32 %v9435_v22, %v3998_v8  ;;  %v4063_v36 = vmul.f32 %v9435_v22, %v3929_v38  ;;  %v3611_v45 = vadd.f32 %v9346_v49, %v9306_v39 }
0x10f8   : > { %v4026_v17 = vsel %vm3770_vm5, %v3642_v40, %v3898_v60  ;;  %v3930_v23 = vsel %vm3674_vm6, %v3546_v30, %v3802_v2  ;;  %v3880_v27 = vmul.f32 0.2, %v3624_v24  ;;  %v3625_v48 = vadd.f32 %v9469_v47, %v9299_v29 }
0x10f9   : > { %vm3752_vm7 = vcmp.gt.f32.partialorder %v3624_v24, 0.0  ;;  %vm3739_vm8 = vcmp.gt.f32.partialorder %v3611_v45, 0.0  ;;  %v3867_v26 = vmul.f32 0.2, %v3611_v45  ;;  %v3639_v28 = vadd.f32 %v9414_v62, %v9306_v39 }
0x10fa   : > { %4409 = vadd.xlane.f32.xlu1 %v4408_v5  ;;  %4193 = vadd.xlane.f32.xlu0 %v4192_v61  ;;  %v4402_v41 = vsel %vm2041_vm3, %v4132_v21, 0.0  ;;  %v4160_v46 = vmul.f32 %v9435_v22, %v4026_v17  ;;  %v4064_v49 = vmul.f32 %v9435_v22, %v3930_v23  ;;  %v4008_v35 = vsel %vm3752_vm7, %v3624_v24, %v3880_v27 }
0x10fb   : > { %v3995_v40 = vsel %vm3739_vm8, %v3611_v45, %v3867_v26  ;;  %v3881_v8 = vmul.f32 0.2, %v3625_v48  ;;  %v3547_v38 = vadd.f32 %v9493_v59, %v9306_v39  ;;  %v4195_v30 = vsel %vm2041_vm3, %v4063_v36, 0.0 }
0x10fc   : > { %vm3753_vm9 = vcmp.gt.f32.partialorder %v3625_v48, 0.0  ;;  %v3895_v58 = vmul.f32 0.2, %v3639_v28  ;;  %v3615_v60 = vadd.f32 %v9349_v53, %v9306_v39  ;;  %vm3767_vm10 = vcmp.gt.f32.partialorder %v3639_v28, 0.0 }
0x10fd   : > { %v9515_v5 = vrot.slane %v9384_v33, %v9297_v34  ;;  %v4486_v24 = vsel %vm2041_vm3, %v4160_v46, 0.0  ;;  %v4142_v2 = vmul.f32 %v9435_v22, %v4008_v35  ;;  %v4129_v61 = vmul.f32 %v9435_v22, %v3995_v40 }
0x10fe   : > { %4403 = vadd.xlane.f32.xlu1 %v4402_v41  ;;  %4196 = vadd.xlane.f32.xlu0 %v4195_v30  ;;  %v4198_v21 = vsel %vm2041_vm3, %v4064_v49, 0.0  ;;  %v4009_v36 = vsel %vm3753_vm9, %v3625_v48, %v3881_v8  ;;  %v3803_v45 = vmul.f32 0.2, %v3547_v38  ;;  %v3548_v17 = vadd.f32 %v9493_v59, %v9309_v43 }
0x10ff   : > { %v4023_v23 = vsel %vm3767_vm10, %v3639_v28, %v3895_v58  ;;  %vm3675_vm11 = vcmp.gt.f32.partialorder %v3547_v38, 0.0  ;;  %v3871_v27 = vmul.f32 0.2, %v3615_v60  ;;  %v3641_v33 = vadd.f32 %v9414_v62, %v9299_v29 }
0x1100   : > { %vm3743_vm12 = vcmp.gt.f32.partialorder %v3615_v60, 0.0  ;;  %v3232_v26 = vcombine.high %v9327_v37, %v9327_v37  ;;  %v4432_v41 = vsel %vm2041_vm3, %v4142_v2, 0.0  ;;  %v4393_v48 = vsel %vm2041_vm3, %v4129_v61, 0.0 }
0x1101   : > { %v4143_v46 = vmul.f32 %v9435_v22, %v4009_v36  ;;  %v4157_v49 = vmul.f32 %v9435_v22, %v4023_v23  ;;  %v3931_v35 = vsel %vm3675_vm11, %v3547_v38, %v3803_v45  ;;  %vm3676_vm13 = vcmp.gt.f32.partialorder %v3548_v17, 0.0 }
0x1102   : > { %4487 = vadd.xlane.f32.xlu1 %v4486_v24  ;;  %4199 = vadd.xlane.f32.xlu0 %v4198_v21  ;;  %v3804_v28 = vmul.f32 0.2, %v3548_v17  ;;  %v3999_v40 = vsel %vm3743_vm12, %v3615_v60, %v3871_v27  ;;  %v3897_v8 = vmul.f32 0.2, %v3641_v33  ;;  %v3576_v62 = vadd.f32 %v9515_v5, %v9309_v43 }
0x1103   : > { %v3617_v37 = vadd.f32 %v9349_v53, %v9299_v29  ;;  %vm3769_vm14 = vcmp.gt.f32.partialorder %v3641_v33, 0.0  ;;  %v9536_v30 = vrot.slane %v3232_v26, %v9297_v34  ;;  %v4435_v58 = vsel %vm2041_vm3, %v4143_v46, 0.0 }
0x1104   : > { %v4477_v38 = vsel %vm2041_vm3, %v4157_v49, 0.0  ;;  %v4065_v24 = vmul.f32 %v9435_v22, %v3931_v35  ;;  %v4133_v60 = vmul.f32 %v9435_v22, %v3999_v40  ;;  %v3932_v2 = vsel %vm3676_vm13, %v3548_v17, %v3804_v28 }
0x1105   : > { %v4025_v61 = vsel %vm3769_vm14, %v3641_v33, %v3897_v8  ;;  %v3832_v21 = vmul.f32 0.2, %v3576_v62  ;;  %v3873_v36 = vmul.f32 0.2, %v3617_v37  ;;  %v3549_v45 = vadd.f32 %v9493_v59, %v9299_v29 }
0x1106   : > { %4433 = vadd.xlane.f32.xlu1 %v4432_v41  ;;  %4394 = vadd.xlane.f32.xlu0 %v4393_v48  ;;  %vm3704_vm15 = vcmp.gt.f32.partialorder %v3576_v62, 0.0  ;;  %vm3745_vm0 = vcmp.gt.f32.partialorder %v3617_v37, 0.0  ;;  %v3618_v34 = vadd.f32 %v9349_v53, %v9302_v32  ;;  %v4201_v23 = vsel %vm2041_vm3, %v4065_v24, 0.0 }
0x1107   : > { %v4405_v27 = vsel %vm2041_vm3, %v4133_v60, 0.0  ;;  %v4066_v26 = vmul.f32 %v9435_v22, %v3932_v2  ;;  %v4159_v17 = vmul.f32 %v9435_v22, %v4025_v61  ;;  %v3960_v33 = vsel %vm3704_vm15, %v3576_v62, %v3832_v21 }
0x1108   : > { %v4001_v41 = vsel %vm3745_vm0, %v3617_v37, %v3873_v36  ;;  %v3805_v48 = vmul.f32 0.2, %v3549_v45  ;;  %v3552_v46 = vadd.f32 %v9536_v30, %v9309_v43  ;;  %vm3677_vm1 = vcmp.gt.f32.partialorder %v3549_v45, 0.0 }
0x1109   : > { %v3874_v49 = vmul.f32 0.2, %v3618_v34  ;;  %v3623_v53 = vadd.f32 %v9469_v47, %v9306_v39  ;;  %vm3746_vm4 = vcmp.gt.f32.partialorder %v3618_v34, 0.0  ;;  %v4204_v35 = vsel %vm2041_vm3, %v4066_v26, 0.0 }
0x110a   : > { %4436 = vadd.xlane.f32.xlu1 %v4435_v58  ;;  %4478 = vadd.xlane.f32.xlu0 %v4477_v38  ;;  %v4094_v28 = vmul.f32 %v9435_v22, %v3960_v33  ;;  %v4135_v40 = vmul.f32 %v9435_v22, %v4001_v41  ;;  %v3550_v8 = vadd.f32 %v9493_v59, %v9302_v32  ;;  %v4483_v62 = vsel %vm2041_vm3, %v4159_v17, 0.0 }
0x110b   : > { %v3933_v37 = vsel %vm3677_vm1, %v3549_v45, %v3805_v48  ;;  %v3808_v58 = vmul.f32 0.2, %v3552_v46  ;;  %v4002_v38 = vsel %vm3746_vm4, %v3618_v34, %v3874_v49  ;;  %vm3680_vm5 = vcmp.gt.f32.partialorder %v3552_v46, 0.0 }
0x110c   : > { %v3879_v24 = vmul.f32 0.2, %v3623_v53  ;;  %v3626_v60 = vadd.f32 %v9469_v47, %v9302_v32  ;;  %vm3751_vm6 = vcmp.gt.f32.partialorder %v3623_v53, 0.0  ;;  %v4288_v2 = vsel %vm2041_vm3, %v4094_v28, 0.0 }
0x110d   : > { %v4411_v61 = vsel %vm2041_vm3, %v4135_v40, 0.0  ;;  %v4067_v21 = vmul.f32 %v9435_v22, %v3933_v37  ;;  %v3806_v59 = vmul.f32 0.2, %v3550_v8  ;;  %v4136_v36 = vmul.f32 %v9435_v22, %v4002_v38 }
0x110e   : > { %4202 = vadd.xlane.f32.xlu1 %v4201_v23  ;;  %4406 = vadd.xlane.f32.xlu0 %v4405_v27  ;;  %v3936_v45 = vsel %vm3680_vm5, %v3552_v46, %v3808_v58  ;;  %vm3678_vm7 = vcmp.gt.f32.partialorder %v3550_v8, 0.0  ;;  %v3578_v34 = vadd.f32 %v9515_v5, %v9302_v32  ;;  %v4007_v23 = vsel %vm3751_vm6, %v3623_v53, %v3879_v24 }
0x110f   : > { %v3882_v27 = vmul.f32 0.2, %v3626_v60  ;;  %v3575_v47 = vadd.f32 %v9515_v5, %v9306_v39  ;;  %vm3754_vm8 = vcmp.gt.f32.partialorder %v3626_v60, 0.0  ;;  %v3560_v26 = vadd.f32 %v9355_v11, %v9309_v43 }
0x1110   : > { %v4207_v17 = vsel %vm2041_vm3, %v4067_v21, 0.0  ;;  %v4070_v33 = vmul.f32 %v9435_v22, %v3936_v45  ;;  %v3934_v41 = vsel %vm3678_vm7, %v3550_v8, %v3806_v59  ;;  %v4414_v48 = vsel %vm2041_vm3, %v4136_v36, 0.0 }
0x1111   : > { %v4141_v46 = vmul.f32 %v9435_v22, %v4007_v23  ;;  %v3834_v49 = vmul.f32 0.2, %v3578_v34  ;;  %v4010_v53 = vsel %vm3754_vm8, %v3626_v60, %v3882_v27  ;;  %vm3706_vm9 = vcmp.gt.f32.partialorder %v3578_v34, 0.0 }
0x1112   : > { %4205 = vadd.xlane.f32.xlu1 %v4204_v35  ;;  %4484 = vadd.xlane.f32.xlu0 %v4483_v62  ;;  %v3831_v35 = vmul.f32 0.2, %v3575_v47  ;;  %v3551_v28 = vadd.f32 %v9536_v30, %v9306_v39  ;;  %v4068_v40 = vmul.f32 %v9435_v22, %v3934_v41  ;;  %vm3703_vm10 = vcmp.gt.f32.partialorder %v3575_v47, 0.0 }
0x1113   : > { %v3816_v62 = vmul.f32 0.2, %v3560_v26  ;;  %v3561_v8 = vadd.f32 %v9355_v11, %v9299_v29  ;;  %v4216_v37 = vsel %vm2041_vm3, %v4070_v33, 0.0  ;;  %vm3688_vm11 = vcmp.gt.f32.partialorder %v3560_v26, 0.0 }
0x1114   : > { %v3577_v58 = vadd.f32 %v9515_v5, %v9299_v29  ;;  %v4429_v38 = vsel %vm2041_vm3, %v4141_v46, 0.0  ;;  %v4144_v24 = vmul.f32 %v9435_v22, %v4010_v53  ;;  %v3962_v60 = vsel %vm3706_vm9, %v3578_v34, %v3834_v49 }
0x1115   : > { %v4210_v21 = vsel %vm2041_vm3, %v4068_v40, 0.0  ;;  %v3944_v59 = vsel %vm3688_vm11, %v3560_v26, %v3816_v62  ;;  %vm3679_vm12 = vcmp.gt.f32.partialorder %v3551_v28, 0.0  ;;  %v3817_v36 = vmul.f32 0.2, %v3561_v8 }
0x1116   : > { %4289 = vadd.xlane.f32.xlu1 %v4288_v2  ;;  %4412 = vadd.xlane.f32.xlu0 %v4411_v61  ;;  %v3959_v2 = vsel %vm3703_vm10, %v3575_v47, %v3831_v35  ;;  %v3807_v61 = vmul.f32 0.2, %v3551_v28  ;;  %v4096_v45 = vmul.f32 %v9435_v22, %v3962_v60  ;;  %vm3689_vm13 = vcmp.gt.f32.partialorder %v3561_v8, 0.0 }
0x1117   : > { %v3833_v23 = vmul.f32 0.2, %v3577_v58  ;;  %v3644_v5 = vadd.f32 %v9390_v42, %v9309_v43  ;;  %v4438_v27 = vsel %vm2041_vm3, %v4144_v24, 0.0  ;;  %v4093_v34 = vmul.f32 %v9435_v22, %v3959_v2 }
0x1118   : > { %vm3705_vm14 = vcmp.gt.f32.partialorder %v3577_v58, 0.0  ;;  %v4078_v47 = vmul.f32 %v9435_v22, %v3944_v59  ;;  %v3553_v26 = vadd.f32 %v9536_v30, %v9299_v29  ;;  %v3945_v33 = vsel %vm3689_vm13, %v3561_v8, %v3817_v36 }
0x1119   : > { %v3645_v41 = vadd.f32 %v9390_v42, %v9299_v29  ;;  %v3961_v46 = vsel %vm3705_vm14, %v3577_v58, %v3833_v23  ;;  %v3900_v49 = vmul.f32 0.2, %v3644_v5  ;;  %v3554_v53 = vadd.f32 %v9536_v30, %v9302_v32 }
0x111a   : > { %4208 = vadd.xlane.f32.xlu1 %v4207_v17  ;;  %4415 = vadd.xlane.f32.xlu0 %v4414_v48  ;;  %v3935_v17 = vsel %vm3679_vm12, %v3551_v28, %v3807_v61  ;;  %v4294_v48 = vsel %vm2041_vm3, %v4096_v45, 0.0  ;;  %v4285_v35 = vsel %vm2041_vm3, %v4093_v34, 0.0  ;;  %vm3772_vm15 = vcmp.gt.f32.partialorder %v3644_v5, 0.0 }
0x111b   : > { %v4069_v40 = vmul.f32 %v9435_v22, %v3935_v17  ;;  %v4240_v28 = vsel %vm2041_vm3, %v4078_v47, 0.0  ;;  %v4079_v62 = vmul.f32 %v9435_v22, %v3945_v33  ;;  %v3809_v8 = vmul.f32 0.2, %v3553_v26 }
0x111c   : > { %vm3681_vm0 = vcmp.gt.f32.partialorder %v3553_v26, 0.0  ;;  %vm3773_vm1 = vcmp.gt.f32.partialorder %v3645_v41, 0.0  ;;  %v3901_v58 = vmul.f32 0.2, %v3645_v41  ;;  %v3810_v24 = vmul.f32 0.2, %v3554_v53 }
0x111d   : > { %v3648_v30 = vadd.f32 %v9393_v44, %v9309_v43  ;;  %v3559_v60 = vadd.f32 %v9355_v11, %v9306_v39  ;;  %v4213_v2 = vsel %vm2041_vm3, %v4069_v40, 0.0  ;;  %vm3682_vm4 = vcmp.gt.f32.partialorder %v3554_v53, 0.0 }
0x111e   : > { %4217 = vadd.xlane.f32.xlu1 %v4216_v37  ;;  %4430 = vadd.xlane.f32.xlu0 %v4429_v38  ;;  %v4095_v37 = vmul.f32 %v9435_v22, %v3961_v46  ;;  %v4028_v38 = vsel %vm3772_vm15, %v3644_v5, %v3900_v49  ;;  %v3937_v61 = vsel %vm3681_vm0, %v3553_v26, %v3809_v8 }
0x111f   : > { %v4162_v36 = vmul.f32 %v9435_v22, %v4028_v38  ;;  %v4029_v45 = vsel %vm3773_vm1, %v3645_v41, %v3901_v58  ;;  %v3938_v23 = vsel %vm3682_vm4, %v3554_v53, %v3810_v24  ;;  %v3904_v5 = vmul.f32 0.2, %v3648_v30 }
0x1120   : > { %v4291_v59 = vsel %vm2041_vm3, %v4095_v37, 0.0  ;;  %v3619_v34 = vadd.f32 %v9332_v63, %v9306_v39  ;;  %v4071_v47 = vmul.f32 %v9435_v22, %v3937_v61  ;;  %vm3776_vm5 = vcmp.gt.f32.partialorder %v3648_v30, 0.0 }
0x1121   : > { %vm3687_vm6 = vcmp.gt.f32.partialorder %v3559_v60, 0.0  ;;  %v3562_v17 = vadd.f32 %v9355_v11, %v9302_v32  ;;  %v4492_v26 = vsel %vm2041_vm3, %v4162_v36, 0.0  ;;  %v4163_v33 = vmul.f32 %v9435_v22, %v4029_v45 }
0x1122   : > { %4211 = vadd.xlane.f32.xlu1 %v4210_v21  ;;  %4439 = vadd.xlane.f32.xlu0 %v4438_v27  ;;  %v4243_v21 = vsel %vm2041_vm3, %v4079_v62, 0.0  ;;  %v3815_v27 = vmul.f32 0.2, %v3559_v60  ;;  %v4072_v41 = vmul.f32 %v9435_v22, %v3938_v23  ;;  %v3875_v49 = vmul.f32 0.2, %v3619_v34 }
0x1123   : > { %v3649_v53 = vadd.f32 %v9393_v44, %v9299_v29  ;;  %vm3747_vm7 = vcmp.gt.f32.partialorder %v3619_v34, 0.0  ;;  %v3818_v40 = vmul.f32 0.2, %v3562_v17  ;;  %v3643_v11 = vadd.f32 %v9390_v42, %v9306_v39 }
0x1124   : > { %v3943_v46 = vsel %vm3687_vm6, %v3559_v60, %v3815_v27  ;;  %vm3690_vm8 = vcmp.gt.f32.partialorder %v3562_v17, 0.0  ;;  %v4222_v37 = vsel %vm2041_vm3, %v4072_v41, 0.0  ;;  %v4003_v58 = vsel %vm3747_vm7, %v3619_v34, %v3875_v49 }
0x1125   : > { %v4077_v8 = vmul.f32 %v9435_v22, %v3943_v46  ;;  %v3905_v38 = vmul.f32 0.2, %v3649_v53  ;;  %v3621_v24 = vadd.f32 %v9332_v63, %v9299_v29  ;;  %vm3777_vm9 = vcmp.gt.f32.partialorder %v3649_v53, 0.0 }
0x1126   : > { %4295 = vadd.xlane.f32.xlu1 %v4294_v48  ;;  %4286 = vadd.xlane.f32.xlu0 %v4285_v35  ;;  %v4032_v48 = vsel %vm3776_vm5, %v3648_v30, %v3904_v5  ;;  %v4219_v35 = vsel %vm2041_vm3, %v4071_v47, 0.0  ;;  %v3946_v30 = vsel %vm3690_vm8, %v3562_v17, %v3818_v40  ;;  %v3899_v60 = vmul.f32 0.2, %v3643_v11 }
0x1127   : > { %v4166_v62 = vmul.f32 %v9435_v22, %v4032_v48  ;;  %vm3771_vm10 = vcmp.gt.f32.partialorder %v3643_v11, 0.0  ;;  %v4080_v36 = vmul.f32 %v9435_v22, %v3946_v30  ;;  %v4033_v45 = vsel %vm3777_vm9, %v3649_v53, %v3905_v38 }
0x1128   : > { %vm3749_vm11 = vcmp.gt.f32.partialorder %v3621_v24, 0.0  ;;  %v3877_v23 = vmul.f32 0.2, %v3621_v24  ;;  %v4027_v5 = vsel %vm3771_vm10, %v3643_v11, %v3899_v60  ;;  %v3656_v34 = vadd.f32 %v9396_v10, %v9309_v43 }
0x1129   : > { %v4504_v61 = vsel %vm2041_vm3, %v4166_v62, 0.0  ;;  %v3620_v47 = vadd.f32 %v9332_v63, %v9309_v43  ;;  %v4161_v41 = vmul.f32 %v9435_v22, %v4027_v5  ;;  %v3646_v40 = vadd.f32 %v9390_v42, %v9302_v32 }
0x112a   : > { %4241 = vadd.xlane.f32.xlu1 %v4240_v28  ;;  %4214 = vadd.xlane.f32.xlu0 %v4213_v2  ;;  %v4495_v28 = vsel %vm2041_vm3, %v4163_v33, 0.0  ;;  %v3647_v2 = vadd.f32 %v9393_v44, %v9306_v39  ;;  %v4167_v33 = vmul.f32 %v9435_v22, %v4033_v45  ;;  %v4005_v48 = vsel %vm3749_vm11, %v3621_v24, %v3877_v23 }
0x112b   : > { %v3912_v49 = vmul.f32 0.2, %v3656_v34  ;;  %v3876_v53 = vmul.f32 0.2, %v3620_v47  ;;  %vm3784_vm13 = vcmp.gt.f32.partialorder %v3656_v34, 0.0  ;;  %vm3748_vm14 = vcmp.gt.f32.partialorder %v3620_v47, 0.0 }
0x112c   : > { %v3903_v27 = vmul.f32 0.2, %v3647_v2  ;;  %vm3775_vm12 = vcmp.gt.f32.partialorder %v3647_v2, 0.0  ;;  %v4507_v11 = vsel %vm2041_vm3, %v4167_v33, 0.0  ;;  %v4139_v62 = vmul.f32 %v9435_v22, %v4005_v48 }
0x112d   : > { %v3657_v24 = vadd.f32 %v9396_v10, %v9299_v29  ;;  %v3902_v30 = vmul.f32 0.2, %v3646_v40  ;;  %v3650_v42 = vadd.f32 %v9393_v44, %v9302_v32  ;;  %vm3774_vm0 = vcmp.gt.f32.partialorder %v3646_v40, 0.0 }
0x112e   : > { %4244 = vadd.xlane.f32.xlu1 %v4243_v21  ;;  %4292 = vadd.xlane.f32.xlu0 %v4291_v59  ;;  %v4237_v21 = vsel %vm2041_vm3, %v4077_v8, 0.0  ;;  %v4137_v59 = vmul.f32 %v9435_v22, %v4003_v58  ;;  %v4031_v46 = vsel %vm3775_vm12, %v3647_v2, %v3903_v27  ;;  %v4004_v58 = vsel %vm3748_vm14, %v3620_v47, %v3876_v53 }
0x112f   : > { %v4165_v8 = vmul.f32 %v9435_v22, %v4031_v46  ;;  %v4423_v60 = vsel %vm2041_vm3, %v4139_v62, 0.0  ;;  %v3913_v45 = vmul.f32 0.2, %v3657_v24  ;;  %v4030_v23 = vsel %vm3774_vm0, %v3646_v40, %v3902_v30 }
0x1130   : > { %v4417_v17 = vsel %vm2041_vm3, %v4137_v59, 0.0  ;;  %vm3785_vm1 = vcmp.gt.f32.partialorder %v3657_v24, 0.0  ;;  %v3906_v5 = vmul.f32 0.2, %v3650_v42  ;;  %v3655_v44 = vadd.f32 %v9396_v10, %v9306_v39 }
0x1131   : > { %v4501_v59 = vsel %vm2041_vm3, %v4165_v8, 0.0  ;;  %vm3778_vm4 = vcmp.gt.f32.partialorder %v3650_v42, 0.0  ;;  %v4041_v33 = vsel %vm3785_vm1, %v3657_v24, %v3913_v45 }
0x1132   : > { %4493 = vadd.xlane.f32.xlu1 %v4492_v26  ;;  %4220 = vadd.xlane.f32.xlu0 %v4219_v35  ;;  %v4246_v26 = vsel %vm2041_vm3, %v4080_v36, 0.0  ;;  %v3628_v35 = vadd.f32 %v9335_v0, %v9309_v43  ;;  %v4034_v48 = vsel %vm3778_vm4, %v3650_v42, %v3906_v5  ;;  %v3911_v46 = vmul.f32 0.2, %v3655_v44 }
0x1133   : > { %vm3783_vm6 = vcmp.gt.f32.partialorder %v3655_v44, 0.0  ;;  %v4168_v62 = vmul.f32 %v9435_v22, %v4034_v48  ;;  %v3580_v42 = vadd.f32 %v9424_v16, %v9309_v43  ;;  %v3584_v48 = vadd.f32 %v9427_v18, %v9309_v43 }
0x1134   : > { %v3884_v38 = vmul.f32 0.2, %v3628_v35  ;;  %vm3756_vm15 = vcmp.gt.f32.partialorder %v3628_v35, 0.0 }
0x1135   : > { %vm3708_vm11 = vcmp.gt.f32.partialorder %v3580_v42, 0.0 }
0x1136   : > { %4496 = vadd.xlane.f32.xlu1 %v4495_v28  ;;  %4223 = vadd.xlane.f32.xlu0 %v4222_v37  ;;  %v4489_v28 = vsel %vm2041_vm3, %v4161_v41, 0.0  ;;  %v4040_v37 = vsel %vm3784_vm13, %v3656_v34, %v3912_v49  ;;  %v4012_v36 = vsel %vm3756_vm15, %v3628_v35, %v3884_v38  ;;  %v3632_v41 = vadd.f32 %v9338_v1, %v9309_v43 }
0x1137   : > { %v4174_v2 = vmul.f32 %v9435_v22, %v4040_v37  ;;  %v4146_v47 = vmul.f32 %v9435_v22, %v4012_v36  ;;  %v3622_v49 = vadd.f32 %v9332_v63, %v9302_v32  ;;  %v4175_v35 = vmul.f32 %v9435_v22, %v4041_v33 }
0x1138   : > { %v3888_v8 = vmul.f32 0.2, %v3632_v41  ;;  %v4039_v37 = vsel %vm3783_vm6, %v3655_v44, %v3911_v46  ;;  %vm3760_vm7 = vcmp.gt.f32.partialorder %v3632_v41, 0.0  ;;  %v3627_v63 = vadd.f32 %v9335_v0, %v9306_v39 }
0x1139   : > { %v4528_v27 = vsel %vm2041_vm3, %v4174_v2, 0.0  ;;  %v4444_v53 = vsel %vm2041_vm3, %v4146_v47, 0.0  ;;  %vm3750_vm8 = vcmp.gt.f32.partialorder %v3622_v49, 0.0  ;;  %v4531_v24 = vsel %vm2041_vm3, %v4175_v35, 0.0 }
0x113a   : > { %4505 = vadd.xlane.f32.xlu1 %v4504_v61  ;;  %4238 = vadd.xlane.f32.xlu0 %v4237_v21  ;;  %v4138_v61 = vmul.f32 %v9435_v22, %v4004_v58  ;;  %v3629_v21 = vadd.f32 %v9335_v0, %v9299_v29  ;;  %v3878_v58 = vmul.f32 0.2, %v3622_v49  ;;  %v4173_v2 = vmul.f32 %v9435_v22, %v4039_v37 }
0x113b   : > { %v3631_v36 = vadd.f32 %v9338_v1, %v9306_v39  ;;  %vm3755_vm10 = vcmp.gt.f32.partialorder %v3627_v63, 0.0  ;;  %v3836_v44 = vmul.f32 0.2, %v3580_v42  ;;  %v3658_v33 = vadd.f32 %v9396_v10, %v9302_v32 }
0x113c   : > { %v4420_v34 = vsel %vm2041_vm3, %v4138_v61, 0.0  ;;  %vm3757_vm5 = vcmp.gt.f32.partialorder %v3629_v21, 0.0  ;;  %v4016_v61 = vsel %vm3760_vm7, %v3632_v41, %v3888_v8  ;;  %v3630_v10 = vadd.f32 %v9335_v0, %v9302_v32 }
0x113d   : > { %vm3759_vm12 = vcmp.gt.f32.partialorder %v3631_v36, 0.0  ;;  %vm3786_vm14 = vcmp.gt.f32.partialorder %v3658_v33, 0.0  ;;  %v3840_v37 = vmul.f32 0.2, %v3584_v48  ;;  %vm3712_vm15 = vcmp.gt.f32.partialorder %v3584_v48, 0.0 }
0x113e   : > { %4418 = vadd.xlane.f32.xlu1 %v4417_v17  ;;  %4247 = vadd.xlane.f32.xlu0 %v4246_v26  ;;  %v3885_v17 = vmul.f32 0.2, %v3629_v21  ;;  %v4164_v26 = vmul.f32 %v9435_v22, %v4030_v23  ;;  %v4150_v23 = vmul.f32 %v9435_v22, %v4016_v61  ;;  %vm3758_vm0 = vcmp.gt.f32.partialorder %v3630_v10, 0.0 }
0x113f   : > { %v3585_v61 = vadd.f32 %v9427_v18, %v9299_v29 }
0x1140   : > { %v4013_v40 = vsel %vm3757_vm5, %v3629_v21, %v3885_v17  ;;  %v4006_v21 = vsel %vm3750_vm8, %v3622_v49, %v3878_v58  ;;  %v4456_v46 = vsel %vm2041_vm3, %v4150_v23, 0.0  ;;  %v3964_v49 = vsel %vm3708_vm11, %v3580_v42, %v3836_v44 }
0x1141   : > { %v4147_v38 = vmul.f32 %v9435_v22, %v4013_v40  ;;  %v4140_v47 = vmul.f32 %v9435_v22, %v4006_v21  ;;  %v4098_v8 = vmul.f32 %v9435_v22, %v3964_v49  ;;  %v3886_v42 = vmul.f32 0.2, %v3630_v10 }
0x1142   : > { %4508 = vadd.xlane.f32.xlu1 %v4507_v11  ;;  %4490 = vadd.xlane.f32.xlu0 %v4489_v28  ;;  %v3633_v11 = vadd.f32 %v9338_v1, %v9299_v29  ;;  %v4498_v28 = vsel %vm2041_vm3, %v4164_v26, 0.0  ;;  %v3887_v26 = vmul.f32 0.2, %v3631_v36  ;;  %v3579_v44 = vadd.f32 %v9424_v16, %v9306_v39 }
0x1143   : > { %v4447_v45 = vsel %vm2041_vm3, %v4147_v38, 0.0  ;;  %v4426_v35 = vsel %vm2041_vm3, %v4140_v47, 0.0  ;;  %v3634_v38 = vadd.f32 %v9338_v1, %v9302_v32  ;;  %v4300_v21 = vsel %vm2041_vm3, %v4098_v8, 0.0 }
0x1144   : > { %v3889_v30 = vmul.f32 0.2, %v3633_v11  ;;  %vm3761_vm9 = vcmp.gt.f32.partialorder %v3633_v11, 0.0  ;;  %vm3713_vm5 = vcmp.gt.f32.partialorder %v3585_v61, 0.0  ;;  %v3835_v49 = vmul.f32 0.2, %v3579_v44 }
0x1145   : > { %vm3762_vm4 = vcmp.gt.f32.partialorder %v3634_v38, 0.0  ;;  %vm3707_vm6 = vcmp.gt.f32.partialorder %v3579_v44, 0.0 }
0x1146   : > { %4424 = vadd.xlane.f32.xlu1 %v4423_v60  ;;  %4502 = vadd.xlane.f32.xlu0 %v4501_v59  ;;  %v4510_v60 = vsel %vm2041_vm3, %v4168_v62, 0.0  ;;  %v3883_v59 = vmul.f32 0.2, %v3627_v63  ;;  %v4017_v5 = vsel %vm3761_vm9, %v3633_v11, %v3889_v30  ;;  %v4015_v11 = vsel %vm3759_vm12, %v3631_v36, %v3887_v26 }
0x1147   : > { %v4151_v41 = vmul.f32 %v9435_v22, %v4017_v5  ;;  %v4149_v30 = vmul.f32 %v9435_v22, %v4015_v11  ;;  %v3890_v36 = vmul.f32 0.2, %v3634_v38  ;;  %v4014_v5 = vsel %vm3758_vm0, %v3630_v10, %v3886_v42 }
0x1148   : > { %v4011_v17 = vsel %vm3755_vm10, %v3627_v63, %v3883_v59  ;;  %v3555_v63 = vadd.f32 %v9358_v12, %v9306_v39  ;;  %v3557_v26 = vadd.f32 %v9358_v12, %v9299_v29  ;;  %v3592_v10 = vadd.f32 %v9420_v4, %v9309_v43 }
0x1149   : > { %v4145_v40 = vmul.f32 %v9435_v22, %v4011_v17  ;;  %v4459_v62 = vsel %vm2041_vm3, %v4151_v41, 0.0  ;;  %v4453_v1 = vsel %vm2041_vm3, %v4149_v30, 0.0  ;;  %v4018_v17 = vsel %vm3762_vm4, %v3634_v38, %v3890_v36 }
0x114a   : > { %4529 = vadd.xlane.f32.xlu1 %v4528_v27  ;;  %4421 = vadd.xlane.f32.xlu0 %v4420_v34  ;;  %v3581_v27 = vadd.f32 %v9424_v16, %v9299_v29  ;;  %v4525_v34 = vsel %vm2041_vm3, %v4173_v2, 0.0  ;;  %v3968_v2 = vsel %vm3712_vm15, %v3584_v48, %v3840_v37  ;;  %v3811_v59 = vmul.f32 0.2, %v3555_v63 }
0x114b   : > { %vm3683_vm1 = vcmp.gt.f32.partialorder %v3555_v63, 0.0  ;;  %v4102_v23 = vmul.f32 %v9435_v22, %v3968_v2  ;;  %v4148_v48 = vmul.f32 %v9435_v22, %v4014_v5  ;;  %v3813_v11 = vmul.f32 0.2, %v3557_v26 }
0x114c   : > { %vm3709_vm13 = vcmp.gt.f32.partialorder %v3581_v27, 0.0  ;;  %v3939_v47 = vsel %vm3683_vm1, %v3555_v63, %v3811_v59  ;;  %vm3685_vm7 = vcmp.gt.f32.partialorder %v3557_v26, 0.0  ;;  %v3963_v37 = vsel %vm3707_vm6, %v3579_v44, %v3835_v49 }
0x114d   : > { %v4450_v8 = vsel %vm2041_vm3, %v4148_v48, 0.0  ;;  %v3941_v30 = vsel %vm3685_vm7, %v3557_v26, %v3813_v11  ;;  %v3848_v42 = vmul.f32 0.2, %v3592_v10  ;;  %v4097_v2 = vmul.f32 %v9435_v22, %v3963_v37 }
0x114e   : > { %4445 = vadd.xlane.f32.xlu1 %v4444_v53  ;;  %4499 = vadd.xlane.f32.xlu0 %v4498_v28  ;;  %v3837_v53 = vmul.f32 0.2, %v3581_v27  ;;  %v3914_v28 = vmul.f32 0.2, %v3658_v33  ;;  %vm3720_vm9 = vcmp.gt.f32.partialorder %v3592_v10, 0.0  ;;  %v4075_v59 = vmul.f32 %v9435_v22, %v3941_v30 }
0x114f   : > { %v3593_v5 = vadd.f32 %v9420_v4, %v9299_v29  ;;  %v3586_v44 = vadd.f32 %v9427_v18, %v9302_v32  ;;  %v3591_v49 = vadd.f32 %v9420_v4, %v9306_v39  ;;  %vm4720_vm15 = vcmask 130112  }
0x1150   : > { %v3965_v58 = vsel %vm3709_vm13, %v3581_v27, %v3837_v53  ;;  %v4042_v0 = vsel %vm3786_vm14, %v3658_v33, %v3914_v28  ;;  %v3583_v33 = vadd.f32 %v9427_v18, %v9306_v39  ;;  %v4073_v53 = vmul.f32 %v9435_v22, %v3939_v47  ;;  %v9756_v47 = vld [vmem:[#allocation37] ss:$0 sm:$0xff] }
0x1151   : > { %vm3721_vm13 = vcmp.gt.f32.partialorder %v3593_v5, 0.0  ;;  %v3849_v18 = vmul.f32 0.2, %v3593_v5  ;;  %vm3714_vm14 = vcmp.gt.f32.partialorder %v3586_v44, 0.0  ;;  %vm4727_vm0 = vcmask 195712  }
0x1152   : > { %4532 = vadd.xlane.f32.xlu1 %v4531_v24  ;;  %4511 = vadd.xlane.f32.xlu0 %v4510_v60  ;;  %v4441_v24 = vsel %vm2041_vm3, %v4145_v40, 0.0  ;;  %v4099_v60 = vmul.f32 %v9435_v22, %v3965_v58  ;;  %v3839_v28 = vmul.f32 0.2, %v3583_v33  ;;  %vm3711_vm8 = vcmp.gt.f32.partialorder %v3583_v33, 0.0 }
0x1153   : > { %v4225_v58 = vsel %vm2041_vm3, %v4073_v53, 0.0  ;;  %vm4734_vm1 = vcmask 261312   ;;  %v3558_v30 = vadd.f32 %v9358_v12, %v9302_v32 }
0x1154   : > { %v4303_v27 = vsel %vm2041_vm3, %v4099_v60, 0.0 }
0x1155   : > { %vm3686_vm7 = vcmp.gt.f32.partialorder %v3558_v30, 0.0 }
0x1156   : > { %4448 = vadd.xlane.f32.xlu1 %v4447_v45  ;;  %4526 = vadd.xlane.f32.xlu0 %v4525_v34  ;;  %v4176_v45 = vmul.f32 %v9435_v22, %v4042_v0  ;;  %v3841_v34 = vmul.f32 0.2, %v3585_v61  ;;  %v3967_v0 = vsel %vm3711_vm8, %v3583_v33, %v3839_v28 }
0x1157   : > { %v4101_v36 = vmul.f32 %v9435_v22, %v3967_v0 }
0x1158   : > { %v4534_v41 = vsel %vm2041_vm3, %v4176_v45, 0.0  ;;  %v3969_v40 = vsel %vm3713_vm5, %v3585_v61, %v3841_v34  ;;  %v3582_v61 = vadd.f32 %v9424_v16, %v9302_v32  ;;  %v3976_v45 = vsel %vm3720_vm9, %v3592_v10, %v3848_v42 }
0x1159   : > { %v4103_v38 = vmul.f32 %v9435_v22, %v3969_v40  ;;  %v4231_v34 = vsel %vm2041_vm3, %v4075_v59, 0.0  ;;  %vm3719_vm5 = vcmp.gt.f32.partialorder %v3591_v49, 0.0 }
0x115a   : > { %4457 = vadd.xlane.f32.xlu1 %v4456_v46  ;;  %4427 = vadd.xlane.f32.xlu0 %v4426_v35  ;;  %v4312_v46 = vsel %vm2041_vm3, %v4102_v23, 0.0  ;;  %v4152_v35 = vmul.f32 %v9435_v22, %v4018_v17  ;;  %v3838_v16 = vmul.f32 0.2, %v3582_v61  ;;  %vm3710_vm12 = vcmp.gt.f32.partialorder %v3582_v61, 0.0 }
0x115b   : > { %v4309_v22 = vsel %vm2041_vm3, %v4101_v36, 0.0  ;;  %v4110_v17 = vmul.f32 %v9756_v47, %v3976_v45 }
0x115c   : > { %v4462_v63 = vsel %vm2041_vm3, %v4152_v35, 0.0  ;;  %v3966_v48 = vsel %vm3710_vm12, %v3582_v61, %v3838_v16  ;;  %v3568_v35 = vadd.f32 %v9364_v14, %v9309_v43  ;;  %v3652_v16 = vadd.f32 %v9401_v51, %v9309_v43 }
0x115d   : > { %v4336_v28 = vsel %vm2041_vm3, %v4110_v17, 0.0  ;;  %v4100_v37 = vmul.f32 %v9756_v47, %v3966_v48 }
0x115e   : > { %4460 = vadd.xlane.f32.xlu1 %v4459_v62  ;;  %4442 = vadd.xlane.f32.xlu0 %v4441_v24  ;;  %v3556_v62 = vadd.f32 %v9358_v12, %v9309_v43  ;;  %v3564_v24 = vadd.f32 %v9361_v13, %v9309_v43  ;;  %vm3696_vm6 = vcmp.gt.f32.partialorder %v3568_v35, 0.0  ;;  %v3563_v12 = vadd.f32 %v9361_v13, %v9306_v39 }
0x115f   : > { %v4306_v45 = vsel %vm2041_vm3, %v4100_v37, 0.0  ;;  %v3567_v37 = vadd.f32 %v9364_v14, %v9306_v39 }
0x1160   : > { %v3812_v60 = vmul.f32 0.2, %v3556_v62  ;;  %vm3684_vm10 = vcmp.gt.f32.partialorder %v3556_v62, 0.0  ;;  %vm3692_vm11 = vcmp.gt.f32.partialorder %v3564_v24, 0.0  ;;  %v3819_v48 = vmul.f32 0.2, %v3563_v12 }
0x1161   : > { %vm3691_vm9 = vcmp.gt.f32.partialorder %v3563_v12, 0.0 }
0x1162   : > { %4301 = vadd.xlane.f32.xlu1 %v4300_v21  ;;  %4454 = vadd.xlane.f32.xlu0 %v4453_v1  ;;  %v4315_v21 = vsel %vm2041_vm3, %v4103_v38, 0.0  ;;  %v3820_v1 = vmul.f32 0.2, %v3564_v24  ;;  %v3940_v23 = vsel %vm3684_vm10, %v3556_v62, %v3812_v60  ;;  %v3824_v60 = vmul.f32 0.2, %v3568_v35 }
0x1163   : > { %v4074_v26 = vmul.f32 %v9756_v47, %v3940_v23  ;;  %vm3780_vm10 = vcmp.gt.f32.partialorder %v3652_v16, 0.0 }
0x1164   : > { %v3948_v33 = vsel %vm3692_vm11, %v3564_v24, %v3820_v1  ;;  %v3847_v24 = vmul.f32 0.2, %v3591_v49  ;;  %v3952_v17 = vsel %vm3696_vm6, %v3568_v35, %v3824_v60  ;;  %vm3695_vm11 = vcmp.gt.f32.partialorder %v3567_v37, 0.0 }
0x1165   : > { %v4228_v10 = vsel %vm2041_vm3, %v4074_v26, 0.0  ;;  %v4082_v62 = vmul.f32 %v9756_v47, %v3948_v33 }
0x1166   : > { %4304 = vadd.xlane.f32.xlu1 %v4303_v27  ;;  %4535 = vadd.xlane.f32.xlu0 %v4534_v41  ;;  %v4297_v27 = vsel %vm2041_vm3, %v4097_v2, 0.0  ;;  %v3842_v41 = vmul.f32 0.2, %v3586_v44  ;;  %v3569_v2 = vadd.f32 %v9364_v14, %v9299_v29 }
0x1167   : > { %v4252_v1 = vsel %vm2041_vm3, %v4082_v62, 0.0 }
0x1168   : > { %v3825_v26 = vmul.f32 0.2, %v3569_v2  ;;  %vm3697_vm8 = vcmp.gt.f32.partialorder %v3569_v2, 0.0 }
0x116a   : > { %4313 = vadd.xlane.f32.xlu1 %v4312_v46  ;;  %4451 = vadd.xlane.f32.xlu0 %v4450_v8  ;;  %v3565_v46 = vadd.f32 %v9361_v13, %v9299_v29  ;;  %v3953_v62 = vsel %vm3697_vm8, %v3569_v2, %v3825_v26 }
0x116c   : > { %vm3693_vm4 = vcmp.gt.f32.partialorder %v3565_v46, 0.0  ;;  %v3821_v38 = vmul.f32 0.2, %v3565_v46 }
0x116e   : > { %4226 = vadd.xlane.f32.xlu1 %v4225_v58  ;;  %4463 = vadd.xlane.f32.xlu0 %v4462_v63  ;;  %v3977_v58 = vsel %vm3721_vm13, %v3593_v5, %v3849_v18  ;;  %v3970_v63 = vsel %vm3714_vm14, %v3586_v44, %v3842_v41  ;;  %v3949_v5 = vsel %vm3693_vm4, %v3565_v46, %v3821_v38 }
0x116f   : > { %v4111_v59 = vmul.f32 %v9756_v47, %v3977_v58  ;;  %v4104_v23 = vmul.f32 %v9756_v47, %v3970_v63  ;;  %v3975_v44 = vsel %vm3719_vm5, %v3591_v49, %v3847_v24  ;;  %v4083_v49 = vmul.f32 %v9756_v47, %v3949_v5 }
0x1170   : > { %v3947_v38 = vsel %vm3691_vm9, %v3563_v12, %v3819_v48  ;;  %v3653_v24 = vadd.f32 %v9401_v51, %v9299_v29  ;;  %v3823_v5 = vmul.f32 0.2, %v3567_v37  ;;  %v3570_v48 = vadd.f32 %v9364_v14, %v9302_v32 }
0x1171   : > { %v4339_v41 = vsel %vm2041_vm3, %v4111_v59, 0.0  ;;  %v4318_v35 = vsel %vm2041_vm3, %v4104_v23, 0.0  ;;  %v4255_v60 = vsel %vm2041_vm3, %v4083_v49, 0.0 }
0x1172   : > { %4316 = vadd.xlane.f32.xlu1 %v4315_v21  ;;  %4298 = vadd.xlane.f32.xlu0 %v4297_v27  ;;  %v3814_v27 = vmul.f32 0.2, %v3558_v30  ;;  %vm3781_vm12 = vcmp.gt.f32.partialorder %v3653_v24, 0.0  ;;  %vm3698_vm6 = vcmp.gt.f32.partialorder %v3570_v48, 0.0 }
0x1176   : > { %4232 = vadd.xlane.f32.xlu1 %v4231_v34  ;;  %4310 = vadd.xlane.f32.xlu0 %v4309_v22 }
0x1177   : > { %v4386_v53 = vpop.xlane.xlu1 %4385  ;;  %v4383_v11 = vpop.xlane.xlu0 %4382 }
0x1178   : > { %v5028_v40 = vrot.slane %v4386_v53, %v9288_v54  ;;  %v5024_v8 = vrot.slane %v4383_v11, %v9286_v6  ;;  %v4109_v53 = vmul.f32 %v9756_v47, %v3975_v44  ;;  %v3942_v11 = vsel %vm3686_vm7, %v3558_v30, %v3814_v27 }
0x1179   : > { %v3594_v30 = vadd.f32 %v9420_v4, %v9302_v32  ;;  %v4076_v12 = vmul.f32 %v9756_v47, %v3942_v11 }
0x117a   : > { %4337 = vadd.xlane.f32.xlu1 %v4336_v28  ;;  %v5029_v0 = vsel %vm4720_vm15, %v5028_v40, %v5024_v8  ;;  %4229 = vadd.xlane.f32.xlu0 %v4228_v10  ;;  %v4086_v40 = vmul.f32 %v9756_v47, %v3952_v17  ;;  %v3908_v8 = vmul.f32 0.2, %v3652_v16  ;;  %v4333_v2 = vsel %vm2041_vm3, %v4109_v53, 0.0 }
0x117b   : > { %v9777_v42 = vpop.xlane.xlu1 %4397  ;;  %v4389_v21 = vpop.xlane.xlu0 %4388  ;;  %v3850_v17 = vmul.f32 0.2, %v3594_v30  ;;  %vm3722_vm13 = vcmp.gt.f32.partialorder %v3594_v30, 0.0 }
0x117c   : > { %v5047_v61 = vrot.slane %v9777_v42, %v9288_v54  ;;  %v5033_v36 = vrot.slane %v4389_v21, %v9290_v7  ;;  %v3660_v21 = vadd.f32 %v9404_v52, %v9309_v43  ;;  %v4264_v59 = vsel %vm2041_vm3, %v4086_v40, 0.0 }
0x117d   : > { %v4036_v23 = vsel %vm3780_vm10, %v3652_v16, %v3908_v8  ;;  %v3978_v14 = vsel %vm3722_vm13, %v3594_v30, %v3850_v17  ;;  %vm5325_vm10 = vcmask 1041409   ;;  %v3659_v42 = vadd.f32 %v9404_v52, %v9306_v39 }
0x117e   : > { %4253 = vadd.xlane.f32.xlu1 %v4252_v1  ;;  %v5034_v34 = vsel %vm4727_vm0, %v5033_v36, %v5029_v0  ;;  %4307 = vadd.xlane.f32.xlu0 %v4306_v45  ;;  %v4087_v36 = vmul.f32 %v9756_v47, %v3953_v62  ;;  %v3566_v1 = vadd.f32 %v9361_v13, %v9302_v32  ;;  %v3916_v13 = vmul.f32 0.2, %v3660_v21 }
0x117f   : > { %v9794_v22 = vpop.xlane.xlu1 %4481  ;;  %v4392_v18 = vpop.xlane.xlu0 %4391  ;;  %v4081_v45 = vmul.f32 %v9756_v47, %v3947_v38  ;;  %vm3788_vm14 = vcmp.gt.f32.partialorder %v3660_v21, 0.0  ;;  %v4170_v53 = vmul.f32 %v9756_v47, %v4036_v23  ;;  %v4112_v30 = vmul.f32 %v9756_v47, %v3978_v14 }
0x1180   : > { %v5180_v33 = vrot.slane %v9794_v22, %v9288_v54  ;;  %v5038_v46 = vrot.slane %v4392_v18, %v9292_v9  ;;  %v3661_v18 = vadd.f32 %v9404_v52, %v9299_v29  ;;  %v3822_v16 = vmul.f32 0.2, %v3566_v1 }
0x1181   : > { %vm3694_vm4 = vcmp.gt.f32.partialorder %v3566_v1, 0.0  ;;  %v4267_v62 = vsel %vm2041_vm3, %v4087_v36, 0.0  ;;  %v4249_v38 = vsel %vm2041_vm3, %v4081_v45, 0.0  ;;  %vm3787_vm13 = vcmp.gt.f32.partialorder %v3659_v42, 0.0 }
0x1182   : > { %4340 = vadd.xlane.f32.xlu1 %v4339_v41  ;;  %v9805_v28 = vsel %vm4734_vm1, %v5038_v46, %v5034_v34  ;;  %4319 = vadd.xlane.f32.xlu0 %v4318_v35  ;;  %v3909_v34 = vmul.f32 0.2, %v3653_v24  ;;  %v4234_v41 = vsel %vm2041_vm3, %v4076_v12, 0.0  ;;  %v3951_v35 = vsel %vm3695_vm11, %v3567_v37, %v3823_v5 }
0x1183   : > { %v9807_v10 = vpop.xlane.xlu1 %4400  ;;  %v4191_v63 = vpop.xlane.xlu0 %4190  ;;  %v4085_v37 = vmul.f32 %v9756_v47, %v3951_v35  ;;  %vm3789_vm5 = vcmp.gt.f32.partialorder %v3661_v18, 0.0 }
0x1184   : > { %v5052_v58 = vrot.slane %v9807_v10, %v9290_v7  ;;  %v4714_v0 = vrot.slane %v4191_v63, %v9286_v6  ;;  %v4037_v8 = vsel %vm3781_vm12, %v3653_v24, %v3909_v34 }
0x1185   : > { %v4171_v24 = vmul.f32 %v9756_v47, %v4037_v8 }
0x1186   : > { %4256 = vadd.xlane.f32.xlu1 %v4255_v60  ;;  %4334 = vadd.xlane.f32.xlu0 %v4333_v2  ;;  %v3917_v60 = vmul.f32 0.2, %v3661_v18  ;;  %v3950_v2 = vsel %vm3694_vm4, %v3566_v1, %v3822_v16  ;;  %v3664_v1 = vadd.f32 %v9407_v56, %v9309_v43  ;;  %v3636_v16 = vadd.f32 %v9352_v31, %v9309_v43 }
0x1187   : > { %v9827_v4 = vpop.xlane.xlu1 %4409  ;;  %v4194_v27 = vpop.xlane.xlu0 %4193  ;;  %v4084_v34 = vmul.f32 %v9756_v47, %v3950_v2  ;;  %v3654_v2 = vadd.f32 %v9401_v51, %v9302_v32 }
0x1188   : > { %v5066_v44 = vrot.slane %v9827_v4, %v9288_v54  ;;  %v4719_v26 = vrot.slane %v4194_v27, %v9288_v54  ;;  %v4516_v27 = vsel %vm2041_vm3, %v4170_v53, 0.0  ;;  %v4045_v17 = vsel %vm3789_vm5, %v3661_v18, %v3917_v60 }
0x1189   : > { %v4519_v53 = vsel %vm2041_vm3, %v4171_v24, 0.0  ;;  %v4342_v18 = vsel %vm2041_vm3, %v4112_v30, 0.0  ;;  %v4179_v8 = vmul.f32 %v9756_v47, %v4045_v17  ;;  %vm3792_vm7 = vcmp.gt.f32.partialorder %v3664_v1, 0.0 }
0x118a   : > { %4265 = vadd.xlane.f32.xlu1 %v4264_v59  ;;  %v4721_v46 = vsel %vm4720_vm15, %v4719_v26, %v4714_v0  ;;  %4235 = vadd.xlane.f32.xlu0 %v4234_v41  ;;  %v4044_v0 = vsel %vm3788_vm14, %v3660_v21, %v3916_v13  ;;  %v3826_v59 = vmul.f32 0.2, %v3570_v48  ;;  %v4261_v26 = vsel %vm2041_vm3, %v4085_v37, 0.0 }
0x118b   : > { %v9840_v49 = vpop.xlane.xlu1 %4403  ;;  %v4197_v11 = vpop.xlane.xlu0 %4196  ;;  %v4178_v23 = vmul.f32 %v9756_v47, %v4044_v0  ;;  %v3651_v41 = vadd.f32 %v9401_v51, %v9306_v39  ;;  %v3920_v0 = vmul.f32 0.2, %v3664_v1  ;;  %v3892_v37 = vmul.f32 0.2, %v3636_v16 }
0x118c   : > { %v5057_v40 = vrot.slane %v9840_v49, %v9292_v9  ;;  %v4726_v63 = vrot.slane %v4197_v11, %v9290_v7  ;;  %v3954_v13 = vsel %vm3698_vm6, %v3570_v48, %v3826_v59  ;;  %vm3764_vm9 = vcmp.gt.f32.partialorder %v3636_v16, 0.0 }
0x118d   : > { %vm3779_vm8 = vcmp.gt.f32.partialorder %v3651_v41, 0.0  ;;  %v3907_v60 = vmul.f32 0.2, %v3651_v41  ;;  %v3665_v24 = vadd.f32 %v9407_v56, %v9299_v29  ;;  %v4543_v10 = vsel %vm2041_vm3, %v4179_v8, 0.0 }
0x118e   : > { %4268 = vadd.xlane.f32.xlu1 %v4267_v62  ;;  %v4728_v12 = vsel %vm4727_vm0, %v4726_v63, %v4721_v46  ;;  %4250 = vadd.xlane.f32.xlu0 %v4249_v38  ;;  %v4540_v62 = vsel %vm2041_vm3, %v4178_v23, 0.0  ;;  %v4258_v63 = vsel %vm2041_vm3, %v4084_v34, 0.0  ;;  %v4088_v38 = vmul.f32 %v9756_v47, %v3954_v13 }
0x118f   : > { %v9854_v36 = vpop.xlane.xlu1 %4487  ;;  %v4200_v45 = vpop.xlane.xlu0 %4199  ;;  %v4020_v34 = vsel %vm3764_vm9, %v3636_v16, %v3892_v37  ;;  %vm3782_vm11 = vcmp.gt.f32.partialorder %v3654_v2, 0.0  ;;  %v3921_v13 = vmul.f32 0.2, %v3665_v24  ;;  %vm3793_vm12 = vcmp.gt.f32.partialorder %v3665_v24, 0.0 }
0x1190   : > { %v5190_v21 = vrot.slane %v9854_v36, %v9292_v9  ;;  %v4733_v5 = vrot.slane %v4200_v45, %v9292_v9  ;;  %v4270_v22 = vsel %vm2041_vm3, %v4088_v38, 0.0  ;;  %vm5327_vm6 = vcmask 1042434  }
0x1192   : > { %4517 = vadd.xlane.f32.xlu1 %v4516_v27  ;;  %v9872_v46 = vsel %vm4734_vm1, %v4733_v5, %v4728_v12  ;;  %4262 = vadd.xlane.f32.xlu0 %v4261_v26  ;;  %v4035_v27 = vsel %vm3779_vm8, %v3651_v41, %v3907_v60  ;;  %v3910_v26 = vmul.f32 0.2, %v3654_v2 }
0x1193   : > { %v9874_v35 = vpop.xlane.xlu1 %4433  ;;  %v4395_v48 = vpop.xlane.xlu0 %4394 }
0x1194   : > { %v5104_v11 = vrot.slane %v9874_v35, %v9288_v54  ;;  %v5043_v14 = vrot.slane %v4395_v48, %v9286_v6 }
0x1196   : > { %4520 = vadd.xlane.f32.xlu1 %v4519_v53  ;;  %v5048_v59 = vsel %vm4720_vm15, %v5047_v61, %v5043_v14  ;;  %4343 = vadd.xlane.f32.xlu0 %v4342_v18  ;;  %v3637_v61 = vadd.f32 %v9352_v31, %v9299_v29  ;;  %v3915_v53 = vmul.f32 0.2, %v3659_v42 }
0x1197   : > { %v9891_v12 = vpop.xlane.xlu1 %4436  ;;  %v5053_v30 = vsel %vm4727_vm0, %v5052_v58, %v5048_v59  ;;  %v4479_v45 = vpop.xlane.xlu0 %4478  ;;  %v4048_v58 = vsel %vm3792_vm7, %v3664_v1, %v3920_v0  ;;  %v3663_v1 = vadd.f32 %v9407_v56, %v9306_v39  ;;  %v4049_v0 = vsel %vm3793_vm12, %v3665_v24, %v3921_v13 }
0x1198   : > { %v5109_v51 = vrot.slane %v9891_v12, %v9290_v7  ;;  %v5058_v23 = vsel %vm4734_vm1, %v5057_v40, %v5053_v30  ;;  %v5176_v5 = vrot.slane %v4479_v45, %v9286_v6  ;;  %v3893_v18 = vmul.f32 0.2, %v3637_v61 }
0x1199   : > { %v9915_v17 = vsel %vm5325_vm10, %v5058_v23, %v9805_v28  ;;  %v4182_v48 = vmul.f32 %v9756_v47, %v4048_v58  ;;  %vm3765_vm14 = vcmp.gt.f32.partialorder %v3637_v61, 0.0  ;;  %v3919_v60 = vmul.f32 0.2, %v3663_v1 }
0x119a   : > { %4541 = vadd.xlane.f32.xlu1 %v4540_v62  ;;  %v5181_v49 = vsel %vm4720_vm15, %v5180_v33, %v5176_v5  ;;  %4259 = vadd.xlane.f32.xlu0 %v4258_v63  ;;  %v4169_v33 = vmul.f32 %v9756_v47, %v4035_v27  ;;  %v4154_v62 = vmul.f32 %v9756_v47, %v4020_v34  ;;  %vm3791_vm4 = vcmp.gt.f32.partialorder %v3663_v1, 0.0 }
0x119b   : > { %v4203_v40 = vpop.xlane.xlu1 %4202  ;;  %v4407_v16 = vpop.xlane.xlu0 %4406  ;;  %v4038_v63 = vsel %vm3782_vm11, %v3654_v2, %v3910_v26  ;;  %v4043_v30 = vsel %vm3787_vm13, %v3659_v42, %v3915_v53  ;;  %v4021_v38 = vsel %vm3765_vm14, %v3637_v61, %v3893_v18  ;;  %v3588_v45 = vadd.f32 %v9438_v50, %v9309_v43 }
0x119c   : > { %v4739_v41 = vrot.slane %v4203_v40, %v9286_v6  ;;  %v5062_v28 = vrot.slane %v4407_v16, %v9286_v6  ;;  %v4552_v4 = vsel %vm2041_vm3, %v4182_v48, 0.0  ;;  %v4513_v24 = vsel %vm2041_vm3, %v4169_v33, 0.0 }
0x119d   : > { %v4468_v5 = vsel %vm2041_vm3, %v4154_v62, 0.0  ;;  %v4172_v42 = vmul.f32 %v9756_v47, %v4038_v63  ;;  %v4183_v58 = vmul.f32 %v9756_v47, %v4049_v0  ;;  %v4177_v27 = vmul.f32 %v9756_v47, %v4043_v30 }
0x119e   : > { %4544 = vadd.xlane.f32.xlu1 %v4543_v10  ;;  %v5067_v8 = vsel %vm4720_vm15, %v5066_v44, %v5062_v28  ;;  %4271 = vadd.xlane.f32.xlu0 %v4270_v22  ;;  %v3635_v44 = vadd.f32 %v9352_v31, %v9306_v39  ;;  %v4155_v34 = vmul.f32 %v9756_v47, %v4021_v38  ;;  %vm3716_vm5 = vcmp.gt.f32.partialorder %v3588_v45, 0.0 }
0x119f   : > { %v4206_v14 = vpop.xlane.xlu1 %4205  ;;  %v4485_v59 = vpop.xlane.xlu0 %4484  ;;  %v3589_v18 = vadd.f32 %v9438_v50, %v9299_v29  ;;  %v4522_v36 = vsel %vm2041_vm3, %v4172_v42, 0.0  ;;  %v4555_v48 = vsel %vm2041_vm3, %v4183_v58, 0.0  ;;  %v4537_v22 = vsel %vm2041_vm3, %v4177_v27, 0.0 }
0x11a0   : > { %v4743_v37 = vrot.slane %v4206_v14, %v9288_v54  ;;  %v5185_v23 = vrot.slane %v4485_v59, %v9290_v7  ;;  %v3891_v53 = vmul.f32 0.2, %v3635_v44  ;;  %vm3763_vm7 = vcmp.gt.f32.partialorder %v3635_v44, 0.0 }
0x11a1   : > { %v4471_v63 = vsel %vm2041_vm3, %v4155_v34, 0.0  ;;  %v3666_v59 = vadd.f32 %v9407_v56, %v9302_v32  ;;  %vm3717_vm8 = vcmp.gt.f32.partialorder %v3589_v18, 0.0 }
0x11a2   : > { %v4744_v2 = vsel %vm4720_vm15, %v4743_v37, %v4739_v41  ;;  %4553 = vadd.xlane.f32.xlu1 %v4552_v4  ;;  %v5186_v61 = vsel %vm4727_vm0, %v5185_v23, %v5181_v49  ;;  %4514 = vadd.xlane.f32.xlu0 %v4513_v24  ;;  %v4047_v49 = vsel %vm3791_vm4, %v3663_v1, %v3919_v60  ;;  %v3844_v41 = vmul.f32 0.2, %v3588_v45 }
0x11a3   : > { %v9946_v10 = vpop.xlane.xlu1 %4289  ;;  %v9955_v40 = vsel %vm4734_vm1, %v5190_v21, %v5186_v61  ;;  %v4413_v13 = vpop.xlane.xlu0 %4412  ;;  %v3662_v21 = vadd.f32 %v9404_v52, %v9302_v32  ;;  %v4181_v33 = vmul.f32 %v9756_v47, %v4047_v49  ;;  %v3596_v52 = vadd.f32 %v9430_v19, %v9309_v43 }
0x11a4   : > { %v4876_v26 = vrot.slane %v9946_v10, %v9288_v54  ;;  %v5071_v16 = vrot.slane %v4413_v13, %v9290_v7  ;;  %v3972_v0 = vsel %vm3716_vm5, %v3588_v45, %v3844_v41  ;;  %v4019_v60 = vsel %vm3763_vm7, %v3635_v44, %v3891_v53 }
0x11a5   : > { %v3845_v37 = vmul.f32 0.2, %v3589_v18  ;;  %v3918_v38 = vmul.f32 0.2, %v3662_v21  ;;  %v3597_v23 = vadd.f32 %v9430_v19, %v9299_v29  ;;  %v4549_v24 = vsel %vm2041_vm3, %v4181_v33, 0.0 }
0x11a6   : > { %4469 = vadd.xlane.f32.xlu1 %v4468_v5  ;;  %v5072_v28 = vsel %vm4727_vm0, %v5071_v16, %v5067_v8  ;;  %4523 = vadd.xlane.f32.xlu0 %v4522_v36  ;;  %v4106_v44 = vmul.f32 %v9756_v47, %v3972_v0  ;;  %vm3790_vm9 = vcmp.gt.f32.partialorder %v3662_v21, 0.0  ;;  %v4153_v42 = vmul.f32 %v9756_v47, %v4019_v60 }
0x11a7   : > { %v4209_v1 = vpop.xlane.xlu1 %4208  ;;  %v4416_v14 = vpop.xlane.xlu0 %4415  ;;  %vm3724_vm11 = vcmp.gt.f32.partialorder %v3596_v52, 0.0  ;;  %v3973_v58 = vsel %vm3717_vm8, %v3589_v18, %v3845_v37  ;;  %v3852_v27 = vmul.f32 0.2, %v3596_v52  ;;  %v3922_v34 = vmul.f32 0.2, %v3666_v59 }
0x11a8   : > { %v4748_v62 = vrot.slane %v4209_v1, %v9290_v7  ;;  %v5076_v8 = vrot.slane %v4416_v14, %v9292_v9  ;;  %v4046_v13 = vsel %vm3790_vm9, %v3662_v21, %v3918_v38  ;;  %vm3794_vm12 = vcmp.gt.f32.partialorder %v3666_v59, 0.0 }
0x11a9   : > { %v3853_v49 = vmul.f32 0.2, %v3597_v23  ;;  %v4324_v53 = vsel %vm2041_vm3, %v4106_v44, 0.0  ;;  %vm3725_vm13 = vcmp.gt.f32.partialorder %v3597_v23, 0.0  ;;  %v3600_v18 = vadd.f32 %v9433_v20, %v9309_v43 }
0x11aa   : > { %v4749_v30 = vsel %vm4727_vm0, %v4748_v62, %v4744_v2  ;;  %4556 = vadd.xlane.f32.xlu1 %v4555_v48  ;;  %v5077_v45 = vsel %vm4734_vm1, %v5076_v8, %v5072_v28  ;;  %4538 = vadd.xlane.f32.xlu0 %v4537_v22  ;;  %v4465_v35 = vsel %vm2041_vm3, %v4153_v42, 0.0  ;;  %v4180_v48 = vmul.f32 %v9756_v47, %v4046_v13 }
0x11ab   : > { %v9982_v4 = vpop.xlane.xlu1 %4217  ;;  %v9988_v56 = vsel %vm5327_vm6, %v5077_v45, %v9915_v17  ;;  %v4431_v5 = vpop.xlane.xlu0 %4430  ;;  %v3587_v17 = vadd.f32 %v9438_v50, %v9306_v39  ;;  %v3980_v22 = vsel %vm3724_vm11, %v3596_v52, %v3852_v27  ;;  %v4050_v33 = vsel %vm3794_vm12, %v3666_v59, %v3922_v34 }
0x11ac   : > { %v4762_v2 = vrot.slane %v9982_v4, %v9288_v54  ;;  %v5100_v61 = vrot.slane %v4431_v5, %v9286_v6  ;;  %v3981_v14 = vsel %vm3725_vm13, %v3597_v23, %v3853_v49  ;;  %v3856_v8 = vmul.f32 0.2, %v3600_v18 }
0x11ad   : > { %vm3715_vm14 = vcmp.gt.f32.partialorder %v3587_v17, 0.0  ;;  %v3843_v12 = vmul.f32 0.2, %v3587_v17  ;;  %v3590_v52 = vadd.f32 %v9438_v50, %v9302_v32  ;;  %v4114_v37 = vmul.f32 %v9756_v47, %v3980_v22 }
0x11ae   : > { %4472 = vadd.xlane.f32.xlu1 %v4471_v63  ;;  %v5105_v41 = vsel %vm4720_vm15, %v5104_v11, %v5100_v61  ;;  %4550 = vadd.xlane.f32.xlu0 %v4549_v24  ;;  %v4107_v11 = vmul.f32 %v9756_v47, %v3973_v58  ;;  %vm3728_vm4 = vcmp.gt.f32.partialorder %v3600_v18, 0.0  ;;  %v3572_v38 = vadd.f32 %v9367_v15, %v9309_v43 }
0x11af   : > { %v4212_v16 = vpop.xlane.xlu1 %4211  ;;  %v5110_v21 = vsel %vm4727_vm0, %v5109_v51, %v5105_v41  ;;  %v4440_v28 = vpop.xlane.xlu0 %4439  ;;  %v4546_v23 = vsel %vm2041_vm3, %v4180_v48, 0.0  ;;  %v4115_v45 = vmul.f32 %v9756_v47, %v3981_v14  ;;  %v3971_v50 = vsel %vm3715_vm14, %v3587_v17, %v3843_v12 }
0x11b0   : > { %v4753_v36 = vrot.slane %v4212_v16, %v9292_v9  ;;  %v5114_v1 = vrot.slane %v4440_v28, %v9292_v9  ;;  %v3595_v24 = vadd.f32 %v9430_v19, %v9306_v39  ;;  %v3984_v42 = vsel %vm3728_vm4, %v3600_v18, %v3856_v8 }
0x11b1   : > { %v3846_v61 = vmul.f32 0.2, %v3590_v52  ;;  %v3601_v58 = vadd.f32 %v9433_v20, %v9299_v29  ;;  %vm3718_vm5 = vcmp.gt.f32.partialorder %v3590_v52, 0.0  ;;  %v3599_v34 = vadd.f32 %v9433_v20, %v9306_v39 }
0x11b2   : > { %v4754_v62 = vsel %vm4734_vm1, %v4753_v36, %v4749_v30  ;;  %4325 = vadd.xlane.f32.xlu1 %v4324_v53  ;;  %v10020_v63 = vsel %vm4734_vm1, %v5114_v1, %v5110_v21  ;;  %4466 = vadd.xlane.f32.xlu0 %v4465_v35  ;;  %v4327_v30 = vsel %vm2041_vm3, %v4107_v11, 0.0  ;;  %v4348_v49 = vsel %vm2041_vm3, %v4114_v37, 0.0 }
0x11b3   : > { %v10017_v51 = vsel %vm5325_vm10, %v4754_v62, %v9872_v46  ;;  %v4296_v0 = vpop.xlane.xlu1 %4295  ;;  %v4287_v60 = vpop.xlane.xlu0 %4286  ;;  %v4184_v46 = vmul.f32 %v9756_v47, %v4050_v33  ;;  %v4351_v17 = vsel %vm2041_vm3, %v4115_v45, 0.0  ;;  %v4105_v41 = vmul.f32 %v9756_v47, %v3971_v50 }
0x11b4   : > { %v4872_v59 = vrot.slane %v4287_v60, %v9286_v6  ;;  %v4118_v16 = vmul.f32 %v9756_v47, %v3984_v42  ;;  %vm3700_vm7 = vcmp.gt.f32.partialorder %v3572_v38, 0.0  ;;  %v3974_v36 = vsel %vm3718_vm5, %v3590_v52, %v3846_v61 }
0x11b5   : > { %v4558_v10 = vsel %vm2041_vm3, %v4184_v46, 0.0  ;;  %v3851_v21 = vmul.f32 0.2, %v3595_v24  ;;  %v3857_v28 = vmul.f32 0.2, %v3601_v58  ;;  %vm3723_vm8 = vcmp.gt.f32.partialorder %v3595_v24, 0.0 }
0x11b6   : > { %4328 = vadd.xlane.f32.xlu1 %v4327_v30  ;;  %v4877_v44 = vsel %vm4720_vm15, %v4876_v26, %v4872_v59  ;;  %4547 = vadd.xlane.f32.xlu0 %v4546_v23  ;;  %v3828_v26 = vmul.f32 0.2, %v3572_v38  ;;  %vm3729_vm9 = vcmp.gt.f32.partialorder %v3601_v58, 0.0  ;;  %v3855_v11 = vmul.f32 0.2, %v3599_v34 }
0x11b7   : > { %v10039_v5 = vpop.xlane.xlu1 %4241  ;;  %v4215_v27 = vpop.xlane.xlu0 %4214  ;;  %v3573_v1 = vadd.f32 %v9367_v15, %v9299_v29  ;;  %vm3727_vm11 = vcmp.gt.f32.partialorder %v3599_v34, 0.0  ;;  %v3571_v4 = vadd.f32 %v9367_v15, %v9306_v39  ;;  %v4321_v33 = vsel %vm2041_vm3, %v4105_v41, 0.0 }
0x11b8   : > { %v4758_v13 = vrot.slane %v4215_v27, %v9286_v6  ;;  %v3956_v22 = vsel %vm3700_vm7, %v3572_v38, %v3828_v26  ;;  %v4108_v62 = vmul.f32 %v9756_v47, %v3974_v36  ;;  %v4360_v8 = vsel %vm2041_vm3, %v4118_v16, 0.0 }
0x11b9   : > { %v3979_v52 = vsel %vm3723_vm8, %v3595_v24, %v3851_v21  ;;  %v3985_v60 = vsel %vm3729_vm9, %v3601_v58, %v3857_v28  ;;  %v4090_v59 = vmul.f32 %v9756_v47, %v3956_v22  ;;  %v3983_v30 = vsel %vm3727_vm11, %v3599_v34, %v3855_v11 }
0x11ba   : > { %4349 = vadd.xlane.f32.xlu1 %v4348_v49  ;;  %v4763_v53 = vsel %vm4720_vm15, %v4762_v2, %v4758_v13  ;;  %4559 = vadd.xlane.f32.xlu0 %v4558_v10  ;;  %v4886_v2 = vrot.slane %v4296_v0, %v9292_v9  ;;  %v3829_v46 = vmul.f32 0.2, %v3573_v1  ;;  %vm3701_vm12 = vcmp.gt.f32.partialorder %v3573_v1, 0.0 }
0x11bb   : > { %v10055_v18 = vpop.xlane.xlu1 %4244  ;;  %v4293_v35 = vpop.xlane.xlu0 %4292  ;;  %v3827_v23 = vmul.f32 0.2, %v3571_v4  ;;  %v3668_v45 = vadd.f32 %v9417_v3, %v9309_v43  ;;  %v4330_v50 = vsel %vm2041_vm3, %v4108_v62, 0.0  ;;  %v4113_v24 = vmul.f32 %v9756_v47, %v3979_v52 }
0x11bc   : > { %v4881_v48 = vrot.slane %v4293_v35, %v9290_v7  ;;  %vm3699_vm13 = vcmp.gt.f32.partialorder %v3571_v4, 0.0  ;;  %v4117_v58 = vmul.f32 %v9756_v47, %v3983_v30  ;;  %v3598_v27 = vadd.f32 %v9430_v19, %v9302_v32 }
0x11bd   : > { %v4276_v49 = vsel %vm2041_vm3, %v4090_v59, 0.0  ;;  %v3957_v10 = vsel %vm3701_vm12, %v3573_v1, %v3829_v46  ;;  %v3924_v41 = vmul.f32 0.2, %v3668_v45  ;;  %v3669_v16 = vadd.f32 %v9417_v3, %v9299_v29 }
0x11be   : > { %4352 = vadd.xlane.f32.xlu1 %v4351_v17  ;;  %v4882_v14 = vsel %vm4727_vm0, %v4881_v48, %v4877_v44  ;;  %4322 = vadd.xlane.f32.xlu0 %v4321_v33  ;;  %v4119_v44 = vmul.f32 %v9756_v47, %v3985_v60  ;;  %v3955_v17 = vsel %vm3699_vm13, %v3571_v4, %v3827_v23  ;;  %vm3796_vm14 = vcmp.gt.f32.partialorder %v3668_v45, 0.0 }
0x11bf   : > { %v10066_v12 = vpop.xlane.xlu1 %4493  ;;  %v10072_v37 = vsel %vm4734_vm1, %v4886_v2, %v4882_v14  ;;  %v4221_v0 = vpop.xlane.xlu0 %4220  ;;  %v3602_v36 = vadd.f32 %v9433_v20, %v9302_v32  ;;  %v4357_v35 = vsel %vm2041_vm3, %v4117_v58, 0.0  ;;  %v4091_v11 = vmul.f32 %v9756_v47, %v3957_v10 }
0x11c0   : > { %v4767_v38 = vrot.slane %v4221_v0, %v9290_v7  ;;  %v4363_v19 = vsel %vm2041_vm3, %v4119_v44, 0.0  ;;  %v3854_v1 = vmul.f32 0.2, %v3598_v27  ;;  %v4089_v20 = vmul.f32 %v9756_v47, %v3955_v17 }
0x11c1   : > { %vm3726_vm4 = vcmp.gt.f32.partialorder %v3598_v27, 0.0  ;;  %v4800_v2 = vrot.slane %v10039_v5, %v9288_v54  ;;  %v4052_v62 = vsel %vm3796_vm14, %v3668_v45, %v3924_v41  ;;  %v3925_v14 = vmul.f32 0.2, %v3669_v16 }
0x11c2   : > { %4361 = vadd.xlane.f32.xlu1 %v4360_v8  ;;  %v4768_v42 = vsel %vm4727_vm0, %v4767_v38, %v4763_v53  ;;  %4331 = vadd.xlane.f32.xlu0 %v4330_v50  ;;  %v4345_v53 = vsel %vm2041_vm3, %v4113_v24, 0.0  ;;  %v4805_v8 = vrot.slane %v10055_v18, %v9290_v7  ;;  %vm3797_vm5 = vcmp.gt.f32.partialorder %v3669_v16, 0.0 }
0x11c3   : > { %v10082_v61 = vpop.xlane.xlu1 %4496  ;;  %v4224_v13 = vpop.xlane.xlu0 %4223  ;;  %v3604_v52 = vadd.f32 %v9441_v25, %v9309_v43  ;;  %v3982_v59 = vsel %vm3726_vm4, %v3598_v27, %v3854_v1  ;;  %vm3730_vm7 = vcmp.gt.f32.partialorder %v3602_v36, 0.0  ;;  %v3574_v5 = vadd.f32 %v9367_v15, %v9302_v32 }
0x11c4   : > { %v5204_v34 = vrot.slane %v10082_v61, %v9290_v7  ;;  %v4772_v26 = vrot.slane %v4224_v13, %v9292_v9  ;;  %v4186_v38 = vmul.f32 %v9756_v47, %v4052_v62  ;;  %v4279_v23 = vsel %vm2041_vm3, %v4091_v11, 0.0 }
0x11c5   : > { %v4053_v45 = vsel %vm3797_vm5, %v3669_v16, %v3925_v14  ;;  %v3605_v50 = vadd.f32 %v9441_v25, %v9299_v29  ;;  %v4273_v24 = vsel %vm2041_vm3, %v4089_v20, 0.0  ;;  %v4116_v15 = vmul.f32 %v9756_v47, %v3982_v59 }
0x11c6   : > { %4277 = vadd.xlane.f32.xlu1 %v4276_v49  ;;  %v4773_v21 = vsel %vm4734_vm1, %v4772_v26, %v4768_v42  ;;  %4346 = vadd.xlane.f32.xlu0 %v4345_v53  ;;  %v3860_v42 = vmul.f32 0.2, %v3604_v52  ;;  %vm3732_vm8 = vcmp.gt.f32.partialorder %v3604_v52, 0.0  ;;  %v3830_v13 = vmul.f32 0.2, %v3574_v5 }
0x11c7   : > { %v10099_v28 = vpop.xlane.xlu1 %4505  ;;  %v10105_v48 = vsel %vm5327_vm6, %v4773_v21, %v10017_v51  ;;  %v4239_v4 = vpop.xlane.xlu0 %4238  ;;  %v3858_v51 = vmul.f32 0.2, %v3602_v36  ;;  %v3667_v49 = vadd.f32 %v9417_v3, %v9306_v39  ;;  %v4564_v26 = vsel %vm2041_vm3, %v4186_v38, 0.0 }
0x11c8   : > { %v5218_v22 = vrot.slane %v10099_v28, %v9288_v54  ;;  %v4796_v33 = vrot.slane %v4239_v4, %v9286_v6  ;;  %v4187_v17 = vmul.f32 %v9756_v47, %v4053_v45  ;;  %vm3702_vm9 = vcmp.gt.f32.partialorder %v3574_v5, 0.0 }
0x11c9   : > { %v3986_v44 = vsel %vm3730_vm7, %v3602_v36, %v3858_v51  ;;  %v5199_v41 = vrot.slane %v10066_v12, %v9288_v54  ;;  %v4354_v36 = vsel %vm2041_vm3, %v4116_v15, 0.0  ;;  %v3988_v21 = vsel %vm3732_vm8, %v3604_v52, %v3860_v42 }
0x11ca   : > { %4364 = vadd.xlane.f32.xlu1 %v4363_v19  ;;  %v4801_v60 = vsel %vm4720_vm15, %v4800_v2, %v4796_v33  ;;  %4358 = vadd.xlane.f32.xlu0 %v4357_v35  ;;  %v4120_v53 = vmul.f32 %v9756_v47, %v3986_v44  ;;  %v3861_v19 = vmul.f32 0.2, %v3605_v50  ;;  %vm3733_vm11 = vcmp.gt.f32.partialorder %v3605_v50, 0.0 }
0x11cb   : > { %v10118_v0 = vpop.xlane.xlu1 %4418  ;;  %v4806_v18 = vsel %vm4727_vm0, %v4805_v8, %v4801_v60  ;;  %v4248_v46 = vpop.xlane.xlu0 %4247  ;;  %v3606_v35 = vadd.f32 %v9441_v25, %v9302_v32  ;;  %v3958_v4 = vsel %vm3702_vm9, %v3574_v5, %v3830_v13  ;;  %v3923_v20 = vmul.f32 0.2, %v3667_v49 }
0x11cc   : > { %v5081_v30 = vrot.slane %v10118_v0, %v9286_v6  ;;  %v4810_v43 = vrot.slane %v4248_v46, %v9292_v9  ;;  %v3603_v12 = vadd.f32 %v9441_v25, %v9306_v39  ;;  %v4567_v62 = vsel %vm2041_vm3, %v4187_v17, 0.0 }
0x11cd   : > { %vm3795_vm12 = vcmp.gt.f32.partialorder %v3667_v49, 0.0  ;;  %v4366_v51 = vsel %vm2041_vm3, %v4120_v53, 0.0  ;;  %v4122_v52 = vmul.f32 %v9756_v47, %v3988_v21  ;;  %v3989_v60 = vsel %vm3733_vm11, %v3605_v50, %v3861_v19 }
0x11ce   : > { %4280 = vadd.xlane.f32.xlu1 %v4279_v23  ;;  %v10133_v58 = vsel %vm4734_vm1, %v4810_v43, %v4806_v18  ;;  %4274 = vadd.xlane.f32.xlu0 %v4273_v24  ;;  %v4092_v39 = vmul.f32 %v9756_v47, %v3958_v4  ;;  %vm3734_vm13 = vcmp.gt.f32.partialorder %v3606_v35, 0.0  ;;  %v3862_v25 = vmul.f32 0.2, %v3606_v35 }
0x11cf   : > { %v4509_v27 = vpop.xlane.xlu1 %4508  ;;  %v4491_v29 = vpop.xlane.xlu0 %4490  ;;  %v3670_v59 = vadd.f32 %v9417_v3, %v9302_v32  ;;  %v4051_v5 = vsel %vm3795_vm12, %v3667_v49, %v3923_v20  ;;  %v3859_v18 = vmul.f32 0.2, %v3603_v12  ;;  %v3638_v46 = vadd.f32 %v9352_v31, %v9302_v32 }
0x11d0   : > { %v5223_v10 = vrot.slane %v4509_v27, %v9290_v7  ;;  %v5195_v16 = vrot.slane %v4491_v29, %v9286_v6  ;;  %vm3731_vm14 = vcmp.gt.f32.partialorder %v3603_v12, 0.0  ;;  %v4372_v45 = vsel %vm2041_vm3, %v4122_v52, 0.0 }
0x11d1   : > { %v4123_v28 = vmul.f32 %v9756_v47, %v3989_v60  ;;  %v4185_v50 = vmul.f32 %v9756_v47, %v4051_v5  ;;  %v3990_v24 = vsel %vm3734_vm13, %v3606_v35, %v3862_v25  ;;  %v3926_v32 = vmul.f32 0.2, %v3670_v59 }
0x11d2   : > { %4565 = vadd.xlane.f32.xlu1 %v4564_v26  ;;  %v5200_v11 = vsel %vm4720_vm15, %v5199_v41, %v5195_v16  ;;  %4355 = vadd.xlane.f32.xlu0 %v4354_v36  ;;  %v3987_v44 = vsel %vm3731_vm14, %v3603_v12, %v3859_v18  ;;  %vm3798_vm4 = vcmp.gt.f32.partialorder %v3670_v59, 0.0  ;;  %v3894_v42 = vmul.f32 0.2, %v3638_v46 }
0x11d3   : > { %v4425_v1 = vpop.xlane.xlu1 %4424  ;;  %v4503_v33 = vpop.xlane.xlu0 %4502  ;;  %v5205_v14 = vsel %vm4727_vm0, %v5204_v34, %v5200_v11  ;;  %vm3766_vm5 = vcmp.gt.f32.partialorder %v3638_v46, 0.0  ;;  %v4375_v29 = vsel %vm2041_vm3, %v4123_v28, 0.0  ;;  %v4124_v26 = vmul.f32 %v9756_v47, %v3990_v24 }
0x11d4   : > { %v5090_v2 = vrot.slane %v4425_v1, %v9290_v7  ;;  %v5214_v8 = vrot.slane %v4503_v33, %v9286_v6  ;;  %v4561_v0 = vsel %vm2041_vm3, %v4185_v50, 0.0  ;;  %v4054_v41 = vsel %vm3798_vm4, %v3670_v59, %v3926_v32 }
0x11d5   : > { %v4022_v19 = vsel %vm3766_vm5, %v3638_v46, %v3894_v42  ;;  %v4378_v47 = vsel %vm2041_vm3, %v4124_v26, 0.0  ;;  %vm5329_vm7 = vcmask 1043459   ;;  %vm5331_vm8 = vcmask 1044484  }
0x11d6   : > { %4568 = vadd.xlane.f32.xlu1 %v4567_v62  ;;  %v5219_v61 = vsel %vm4720_vm15, %v5218_v22, %v5214_v8  ;;  %4367 = vadd.xlane.f32.xlu0 %v4366_v51  ;;  %v4282_v22 = vsel %vm2041_vm3, %v4092_v39, 0.0  ;;  %vm5333_vm9 = vcmask 1045509   ;;  %vm5335_vm11 = vcmask 1046534  }
0x11d7   : > { %v4530_v34 = vpop.xlane.xlu1 %4529  ;;  %v4422_v43 = vpop.xlane.xlu0 %4421  ;;  %v5224_v23 = vsel %vm4727_vm0, %v5223_v10, %v5219_v61 }
0x11d8   : > { %v5256_v38 = vrot.slane %v4530_v34, %v9288_v54  ;;  %v5085_v3 = vrot.slane %v4422_v43, %v9288_v54 }
0x11da   : > { %4373 = vadd.xlane.f32.xlu1 %v4372_v45  ;;  %v5086_v31 = vsel %vm4720_vm15, %v5085_v3, %v5081_v30  ;;  %4283 = vadd.xlane.f32.xlu0 %v4282_v22  ;;  %v7023_v30 = vld [vmem:[#allocation37] ss:$0 sm:$0xff] }
0x11db   : > { %v4446_v15 = vpop.xlane.xlu1 %4445  ;;  %v4500_v13 = vpop.xlane.xlu0 %4499  ;;  %v5091_v49 = vsel %vm4727_vm0, %v5090_v2, %v5086_v31  ;;  %v4121_v17 = vmul.f32 %v7023_v30, %v3987_v44  ;;  %v4188_v1 = vmul.f32 %v7023_v30, %v4054_v41  ;;  %v4156_v20 = vmul.f32 %v7023_v30, %v4022_v19 }
0x11dc   : > { %v5123_v27 = vrot.slane %v4446_v15, %v9288_v54  ;;  %v5209_v10 = vrot.slane %v4500_v13, %v9292_v9 }
0x11dd   : > { %v4369_v4 = vsel %vm2041_vm3, %v4121_v17, 0.0  ;;  %v4570_v8 = vsel %vm2041_vm3, %v4188_v1, 0.0  ;;  %v4474_v51 = vsel %vm2041_vm3, %v4156_v20, 0.0 }
0x11de   : > { %4376 = vadd.xlane.f32.xlu1 %v4375_v29  ;;  %v5210_v16 = vsel %vm4734_vm1, %v5209_v10, %v5205_v14  ;;  %4562 = vadd.xlane.f32.xlu0 %v4561_v0 }
0x11df   : > { %v4533_v53 = vpop.xlane.xlu1 %4532  ;;  %v5353_v36 = vsel %vm5325_vm10, %v5210_v16, %v9955_v40  ;;  %v4512_v35 = vpop.xlane.xlu0 %4511 }
0x11e0   : > { %v5261_v21 = vrot.slane %v4533_v53, %v9290_v7  ;;  %v5228_v11 = vrot.slane %v4512_v35, %v9292_v9 }
0x11e2   : > { %4379 = vadd.xlane.f32.xlu1 %v4378_v47  ;;  %v5229_v12 = vsel %vm4734_vm1, %v5228_v11, %v5224_v23  ;;  %4370 = vadd.xlane.f32.xlu0 %v4369_v4 }
0x11e3   : > { %v4449_v2 = vpop.xlane.xlu1 %4448  ;;  %v10196_v33 = vsel %vm5327_vm6, %v5229_v12, %v5353_v36  ;;  %v4527_v62 = vpop.xlane.xlu0 %4526 }
0x11e4   : > { %v5128_v40 = vrot.slane %v4449_v2, %v9290_v7  ;;  %v5252_v14 = vrot.slane %v4527_v62, %v9286_v6 }
0x11e6   : > { %4571 = vadd.xlane.f32.xlu1 %v4570_v8  ;;  %v5257_v52 = vsel %vm4720_vm15, %v5256_v38, %v5252_v14  ;;  %4475 = vadd.xlane.f32.xlu0 %v4474_v51 }
0x11e7   : > { %v4458_v60 = vpop.xlane.xlu1 %4457  ;;  %v4428_v25 = vpop.xlane.xlu0 %4427  ;;  %v5262_v59 = vsel %vm4727_vm0, %v5261_v21, %v5257_v52 }
0x11e8   : > { %v5142_v39 = vrot.slane %v4458_v60, %v9288_v54  ;;  %v5095_v61 = vrot.slane %v4428_v25, %v9292_v9 }
0x11ea   : > { %v5096_v34 = vsel %vm4734_vm1, %v5095_v61, %v5091_v49 }
0x11eb   : > { %v4461_v5 = vpop.xlane.xlu1 %4460  ;;  %v5348_v18 = vsel %vm5329_vm7, %v5096_v34, %v9988_v56  ;;  %v4443_v38 = vpop.xlane.xlu0 %4442 }
0x11ec   : > { %v5147_v46 = vrot.slane %v4461_v5, %v9290_v7  ;;  %v5119_v43 = vrot.slane %v4443_v38, %v9286_v6  ;;  %v5349_v23 = vsel %vm5331_vm8, %v10020_v63, %v5348_v18 }
0x11ee   : > { %v5124_v3 = vsel %vm4720_vm15, %v5123_v27, %v5119_v43 }
0x11ef   : > { %v4302_v45 = vpop.xlane.xlu1 %4301  ;;  %v4455_v22 = vpop.xlane.xlu0 %4454  ;;  %v5129_v50 = vsel %vm4727_vm0, %v5128_v40, %v5124_v3 }
0x11f0   : > { %v4895_v28 = vrot.slane %v4302_v45, %v9288_v54  ;;  %v5138_v24 = vrot.slane %v4455_v22, %v9286_v6 }
0x11f2   : > { %v5143_v56 = vsel %vm4720_vm15, %v5142_v39, %v5138_v24 }
0x11f3   : > { %v4305_v32 = vpop.xlane.xlu1 %4304  ;;  %v4536_v15 = vpop.xlane.xlu0 %4535  ;;  %v5148_v44 = vsel %vm4727_vm0, %v5147_v46, %v5143_v56 }
0x11f4   : > { %v4900_v31 = vrot.slane %v4305_v32, %v9290_v7  ;;  %v5266_v63 = vrot.slane %v4536_v15, %v9292_v9 }
0x11f6   : > { %v10222_v42 = vsel %vm4734_vm1, %v5266_v63, %v5262_v59 }
0x11f7   : > { %v4314_v27 = vpop.xlane.xlu1 %4313  ;;  %v4452_v49 = vpop.xlane.xlu0 %4451 }
0x11f8   : > { %v4914_v13 = vrot.slane %v4314_v27, %v9288_v54  ;;  %v5133_v10 = vrot.slane %v4452_v49, %v9292_v9 }
0x11fa   : > { %v5134_v29 = vsel %vm4734_vm1, %v5133_v10, %v5129_v50 }
0x11fb   : > { %v4227_v26 = vpop.xlane.xlu1 %4226  ;;  %v5350_v0 = vsel %vm5333_vm9, %v5134_v29, %v5349_v23  ;;  %v4464_v17 = vpop.xlane.xlu0 %4463 }
0x11fc   : > { %v4777_v30 = vrot.slane %v4227_v26, %v9286_v6  ;;  %v5152_v41 = vrot.slane %v4464_v17, %v9292_v9 }
0x11fe   : > { %v5153_v16 = vsel %vm4734_vm1, %v5152_v41, %v5148_v44 }
0x11ff   : > { %v4317_v53 = vpop.xlane.xlu1 %4316  ;;  %v4299_v36 = vpop.xlane.xlu0 %4298  ;;  %v10233_v21 = vsel %vm5335_vm11, %v5153_v16, %v5350_v0 }
0x1200   : > { %v4919_v19 = vrot.slane %v4317_v53, %v9290_v7  ;;  %v4891_v35 = vrot.slane %v4299_v36, %v9286_v6 }
0x1202   : > { %v4896_v11 = vsel %vm4720_vm15, %v4895_v28, %v4891_v35 }
0x1203   : > { %v4233_v47 = vpop.xlane.xlu1 %4232  ;;  %v4311_v4 = vpop.xlane.xlu0 %4310  ;;  %v4901_v20 = vsel %vm4727_vm0, %v4900_v31, %v4896_v11 }
0x1204   : > { %v4786_v1 = vrot.slane %v4233_v47, %v9290_v7  ;;  %v4910_v12 = vrot.slane %v4311_v4, %v9286_v6 }
0x1206   : > { %v4915_v2 = vsel %vm4720_vm15, %v4914_v13, %v4910_v12 }
0x1207   : > { %v4338_v40 = vpop.xlane.xlu1 %4337  ;;  %v4230_v14 = vpop.xlane.xlu0 %4229  ;;  %v4920_v8 = vsel %vm4727_vm0, %v4919_v19, %v4915_v2 }
0x1208   : > { %v4952_v62 = vrot.slane %v4338_v40, %v9288_v54  ;;  %v4781_v51 = vrot.slane %v4230_v14, %v9288_v54 }
0x120a   : > { %v4782_v52 = vsel %vm4720_vm15, %v4781_v51, %v4777_v30 }
0x120b   : > { %v4254_v60 = vpop.xlane.xlu1 %4253  ;;  %v4308_v25 = vpop.xlane.xlu0 %4307  ;;  %v4787_v59 = vsel %vm4727_vm0, %v4786_v1, %v4782_v52 }
0x120c   : > { %v4819_v39 = vrot.slane %v4254_v60, %v9288_v54  ;;  %v4905_v61 = vrot.slane %v4308_v25, %v9292_v9 }
0x120e   : > { %v4906_v34 = vsel %vm4734_vm1, %v4905_v61, %v4901_v20 }
0x120f   : > { %v4341_v5 = vpop.xlane.xlu1 %4340  ;;  %v5339_v18 = vsel %vm5325_vm10, %v4906_v34, %v10072_v37  ;;  %v4320_v38 = vpop.xlane.xlu0 %4319  ;;  %vm5337_vm10 = vcmask 1047559  }
0x1210   : > { %v4957_v46 = vrot.slane %v4341_v5, %v9290_v7  ;;  %v4924_v43 = vrot.slane %v4320_v38, %v9292_v9 }
0x1212   : > { %v4925_v23 = vsel %vm4734_vm1, %v4924_v43, %v4920_v8 }
0x1213   : > { %v4257_v3 = vpop.xlane.xlu1 %4256  ;;  %v10255_v45 = vsel %vm5327_vm6, %v4925_v23, %v5339_v18  ;;  %v4335_v22 = vpop.xlane.xlu0 %4334 }
0x1214   : > { %v4824_v28 = vrot.slane %v4257_v3, %v9290_v7  ;;  %v4948_v50 = vrot.slane %v4335_v22, %v9286_v6 }
0x1216   : > { %v4953_v24 = vsel %vm4720_vm15, %v4952_v62, %v4948_v50 }
0x1217   : > { %v4266_v56 = vpop.xlane.xlu1 %4265  ;;  %v4236_v32 = vpop.xlane.xlu0 %4235  ;;  %v4958_v31 = vsel %vm4727_vm0, %v4957_v46, %v4953_v24 }
0x1218   : > { %v4838_v37 = vrot.slane %v4266_v56, %v9288_v54  ;;  %v4791_v15 = vrot.slane %v4236_v32, %v9292_v9 }
0x121a   : > { %v4792_v44 = vsel %vm4734_vm1, %v4791_v15, %v4787_v59 }
0x121b   : > { %v4269_v63 = vpop.xlane.xlu1 %4268  ;;  %v5330_v27 = vsel %vm5329_vm7, %v4792_v44, %v10105_v48  ;;  %v4251_v49 = vpop.xlane.xlu0 %4250 }
0x121c   : > { %v4843_v13 = vrot.slane %v4269_v63, %v9290_v7  ;;  %v4815_v10 = vrot.slane %v4251_v49, %v9286_v6  ;;  %v5332_v29 = vsel %vm5331_vm8, %v10133_v58, %v5330_v27 }
0x121e   : > { %v4820_v26 = vsel %vm4720_vm15, %v4819_v39, %v4815_v10 }
0x121f   : > { %v4518_v0 = vpop.xlane.xlu1 %4517  ;;  %v4263_v17 = vpop.xlane.xlu0 %4262  ;;  %v4825_v41 = vsel %vm4727_vm0, %v4824_v28, %v4820_v26 }
0x1220   : > { %v5237_v30 = vrot.slane %v4518_v0, %v9288_v54  ;;  %v4834_v16 = vrot.slane %v4263_v17, %v9286_v6 }
0x1222   : > { %v4839_v48 = vsel %vm4720_vm15, %v4838_v37, %v4834_v16 }
0x1223   : > { %v4521_v53 = vpop.xlane.xlu1 %4520  ;;  %v4344_v36 = vpop.xlane.xlu0 %4343  ;;  %v4844_v35 = vsel %vm4727_vm0, %v4843_v13, %v4839_v48 }
0x1224   : > { %v5242_v19 = vrot.slane %v4521_v53, %v9290_v7  ;;  %v4962_v58 = vrot.slane %v4344_v36, %v9292_v9 }
0x1226   : > { %v10279_v11 = vsel %vm4734_vm1, %v4962_v58, %v4958_v31 }
0x1227   : > { %v4542_v47 = vpop.xlane.xlu1 %4541  ;;  %v4260_v4 = vpop.xlane.xlu0 %4259 }
0x1228   : > { %v5275_v1 = vrot.slane %v4542_v47, %v9288_v54  ;;  %v4829_v20 = vrot.slane %v4260_v4, %v9292_v9 }
0x122a   : > { %v4830_v12 = vsel %vm4734_vm1, %v4829_v20, %v4825_v41 }
0x122b   : > { %v4545_v2 = vpop.xlane.xlu1 %4544  ;;  %v5334_v40 = vsel %vm5333_vm9, %v4830_v12, %v5332_v29  ;;  %v4272_v14 = vpop.xlane.xlu0 %4271 }
0x122c   : > { %v5280_v62 = vrot.slane %v4545_v2, %v9290_v7  ;;  %v4848_v8 = vrot.slane %v4272_v14, %v9292_v9 }
0x122e   : > { %v4849_v51 = vsel %vm4734_vm1, %v4848_v8, %v4844_v35 }
0x122f   : > { %v4554_v52 = vpop.xlane.xlu1 %4553  ;;  %v4515_v39 = vpop.xlane.xlu0 %4514  ;;  %v10290_v25 = vsel %vm5335_vm11, %v4849_v51, %v5334_v40 }
0x1230   : > { %v5294_v60 = vrot.slane %v4554_v52, %v9288_v54  ;;  %v5233_v59 = vrot.slane %v4515_v39, %v9286_v6 }
0x1232   : > { %v5238_v61 = vsel %vm4720_vm15, %v5237_v30, %v5233_v59 }
0x1233   : > { %v4470_v34 = vpop.xlane.xlu1 %4469  ;;  %v5243_v5 = vsel %vm4727_vm0, %v5242_v19, %v5238_v61  ;;  %v4524_v18 = vpop.xlane.xlu0 %4523 }
0x1234   : > { %v5247_v46 = vrot.slane %v4524_v18, %v9292_v9  ;;  %v5161_v27 = vrot.slane %v4470_v34, %v9288_v54 }
0x1236   : > { %v5248_v38 = vsel %vm4734_vm1, %v5247_v46, %v5243_v5 }
0x1237   : > { %v4557_v43 = vpop.xlane.xlu1 %4556  ;;  %v5355_v23 = vsel %vm5329_vm7, %v5248_v38, %v10196_v33  ;;  %v4539_v3 = vpop.xlane.xlu0 %4538 }
0x1238   : > { %v5271_v28 = vrot.slane %v4539_v3, %v9286_v6  ;;  %v5356_v22 = vsel %vm5331_vm8, %v10222_v42, %v5355_v23  ;;  %v5299_v31 = vrot.slane %v4557_v43, %v9290_v7 }
0x123a   : > { %v5276_v50 = vsel %vm4720_vm15, %v5275_v1, %v5271_v28 }
0x123b   : > { %v4473_v24 = vpop.xlane.xlu1 %4472  ;;  %v4551_v56 = vpop.xlane.xlu0 %4550  ;;  %v5281_v37 = vsel %vm4727_vm0, %v5280_v62, %v5276_v50 }
0x123c   : > { %v5290_v32 = vrot.slane %v4551_v56, %v9286_v6  ;;  %v5166_v13 = vrot.slane %v4473_v24, %v9290_v7 }
0x123e   : > { %v5295_v15 = vsel %vm4720_vm15, %v5294_v60, %v5290_v32 }
0x123f   : > { %v4326_v44 = vpop.xlane.xlu1 %4325  ;;  %v4467_v33 = vpop.xlane.xlu0 %4466  ;;  %v5300_v63 = vsel %vm4727_vm0, %v5299_v31, %v5295_v15 }
0x1240   : > { %v5157_v42 = vrot.slane %v4467_v33, %v9286_v6  ;;  %v4933_v58 = vrot.slane %v4326_v44, %v9288_v54 }
0x1242   : > { %v5162_v49 = vsel %vm4720_vm15, %v5161_v27, %v5157_v42 }
0x1243   : > { %v4329_v10 = vpop.xlane.xlu1 %4328  ;;  %v4548_v29 = vpop.xlane.xlu0 %4547  ;;  %v10313_v26 = vsel %vm4727_vm0, %v5166_v13, %v5162_v49  ;;  %v4573_v49 = vld [vmem:[#allocation28] sm:$0xff] }
0x1244   : > { %v5285_v0 = vrot.slane %v4548_v29, %v9292_v9  ;;  %v4938_v1 = vrot.slane %v4329_v10, %v9290_v7  ;;  %vm4577_vm6 = vcmp.gt.f32.partialorder %v4573_v49, 0.0 }
0x1246   : > { %v5286_v30 = vsel %vm4734_vm1, %v5285_v0, %v5281_v37 }
0x1247   : > { %v4350_v17 = vpop.xlane.xlu1 %4349  ;;  %v5357_v41 = vsel %vm5333_vm9, %v5286_v30, %v5356_v22  ;;  %v4560_v16 = vpop.xlane.xlu0 %4559 }
0x1248   : > { %v5304_v48 = vrot.slane %v4560_v16, %v9292_v9  ;;  %v4971_v52 = vrot.slane %v4350_v17, %v9288_v54 }
0x124a   : > { %v5305_v53 = vsel %vm4734_vm1, %v5304_v48, %v5300_v63 }
0x124b   : > { %v4353_v19 = vpop.xlane.xlu1 %4352  ;;  %v4323_v36 = vpop.xlane.xlu0 %4322  ;;  %v10321_v35 = vsel %vm5335_vm11, %v5305_v53, %v5357_v41 }
0x124c   : > { %v4929_v47 = vrot.slane %v4323_v36, %v9286_v6  ;;  %v4976_v59 = vrot.slane %v4353_v19, %v9290_v7 }
0x124e   : > { %v4934_v4 = vsel %vm4720_vm15, %v4933_v58, %v4929_v47 }
0x124f   : > { %v4362_v20 = vpop.xlane.xlu1 %4361  ;;  %v4939_v12 = vsel %vm4727_vm0, %v4938_v1, %v4934_v4  ;;  %v4332_v2 = vpop.xlane.xlu0 %4331 }
0x1250   : > { %v4943_v40 = vrot.slane %v4332_v2, %v9292_v9  ;;  %v4574_v2 = vld [vmem:[#allocation28 + $0x8] sm:$0xff] }
0x1251   : > { %vm4578_vm12 = vcmp.gt.f32.partialorder %v4574_v2, 0.0  ;;  %v7002_v2 = vld [vmem:[#allocation41] sm:$0xff]  }
0x1252   : > { %v4944_v62 = vsel %vm4734_vm1, %v4943_v40, %v4939_v12 }
0x1253   : > { %v4278_v14 = vpop.xlane.xlu1 %4277  ;;  %v5341_v8 = vsel %vm5329_vm7, %v4944_v62, %v10255_v45  ;;  %v4347_v51 = vpop.xlane.xlu0 %4346  ;;  %v4990_v45 = vrot.slane %v4362_v20, %v9288_v54 }
0x1254   : > { %v4967_v60 = vrot.slane %v4347_v51, %v9286_v6  ;;  %v5342_v39 = vsel %vm5331_vm8, %v10279_v11, %v5341_v8  ;;  %v4857_v22 = vrot.slane %v4278_v14, %v9288_v54  ;;  %v4575_v51 = vld [vmem:[#allocation28 + $0x10] sm:$0xff] }
0x1255   : > { %vm4579_vm13 = vcmp.gt.f32.partialorder %v4575_v51, 0.0 }
0x1256   : > { %v4972_v61 = vsel %vm4720_vm15, %v4971_v52, %v4967_v60  ;;  %v4576_v52 = vld [vmem:[#allocation28 + $0x18] sm:$0xff] }
0x1257   : > { %v4365_v34 = vpop.xlane.xlu1 %4364  ;;  %v4359_v18 = vpop.xlane.xlu0 %4358  ;;  %v4977_v46 = vsel %vm4727_vm0, %v4976_v59, %v4972_v61  ;;  %vm4580_vm14 = vcmp.gt.f32.partialorder %v4576_v52, 0.0 }
0x1258   : > { %v4995_v5 = vrot.slane %v4365_v34, %v9290_v7  ;;  %v4986_v38 = vrot.slane %v4359_v18, %v9286_v6 }
0x125a   : > { %v4991_v43 = vsel %vm4720_vm15, %v4990_v45, %v4986_v38 }
0x125b   : > { %v4281_v23 = vpop.xlane.xlu1 %4280  ;;  %v4275_v11 = vpop.xlane.xlu0 %4274  ;;  %v4996_v28 = vsel %vm4727_vm0, %v4995_v5, %v4991_v43 }
0x125c   : > { %v4862_v3 = vrot.slane %v4281_v23, %v9290_v7  ;;  %v4853_v50 = vrot.slane %v4275_v11, %v9286_v6 }
0x125e   : > { %v4858_v24 = vsel %vm4720_vm15, %v4857_v22, %v4853_v50 }
0x125f   : > { %v4566_v56 = vpop.xlane.xlu1 %4565  ;;  %v4356_v37 = vpop.xlane.xlu0 %4355  ;;  %v4863_v32 = vsel %vm4727_vm0, %v4862_v3, %v4858_v24 }
0x1260   : > { %v4981_v31 = vrot.slane %v4356_v37, %v9292_v9  ;;  %v5313_v48 = vrot.slane %v4566_v56, %v9288_v54 }
0x1262   : > { %v4982_v15 = vsel %vm4734_vm1, %v4981_v31, %v4977_v46 }
0x1263   : > { %v4569_v44 = vpop.xlane.xlu1 %4568  ;;  %v5343_v33 = vsel %vm5333_vm9, %v4982_v15, %v5342_v39  ;;  %v4368_v63 = vpop.xlane.xlu0 %4367 }
0x1264   : > { %v5000_v27 = vrot.slane %v4368_v63, %v9292_v9  ;;  %v5318_v36 = vrot.slane %v4569_v44, %v9290_v7 }
0x1266   : > { %v5001_v42 = vsel %vm4734_vm1, %v5000_v27, %v4996_v28 }
0x1267   : > { %v4374_v13 = vpop.xlane.xlu1 %4373  ;;  %v4284_v10 = vpop.xlane.xlu0 %4283  ;;  %v5344_v29 = vsel %vm5335_vm11, %v5001_v42, %v5343_v33 }
0x1268   : > { %v4867_v0 = vrot.slane %v4284_v10, %v9292_v9  ;;  %v5009_v12 = vrot.slane %v4374_v13, %v9288_v54 }
0x126a   : > { %v4868_v30 = vsel %vm4734_vm1, %v4867_v0, %v4863_v32 }
0x126b   : > { %v4377_v17 = vpop.xlane.xlu1 %4376  ;;  %v4563_v41 = vpop.xlane.xlu0 %4562  ;;  %v5338_v16 = vsel %vm5337_vm10, %v4868_v30, %v10290_v25 }
0x126c   : > { %v5309_v53 = vrot.slane %v4563_v41, %v9286_v6  ;;  %v5364_v19 = vsel %vm4577_vm6, %v5338_v16, -1e+30  ;;  %v5014_v40 = vrot.slane %v4377_v17, %v9290_v7 }
0x126d   : > { %v5368_v58 = vsel %vm1874_vm2, %v5364_v19, -inf }
0x126e   : > { %v5314_v47 = vsel %vm4720_vm15, %v5313_v48, %v5309_v53  ;;  %5369 = vmax.xlane.f32.xlu0 %v5368_v58 }
0x126f   : > { %v4380_v1 = vpop.xlane.xlu1 %4379  ;;  %v4371_v4 = vpop.xlane.xlu0 %4370  ;;  %v5319_v20 = vsel %vm4727_vm0, %v5318_v36, %v5314_v47 }
0x1270   : > { %v5005_v25 = vrot.slane %v4371_v4, %v9286_v6  ;;  %v5019_v62 = vrot.slane %v4380_v1, %v9292_v9 }
0x1272   : > { %v5010_v14 = vsel %vm4720_vm15, %v5009_v12, %v5005_v25  ;;  %v8135_v25 = vmov 0.0   ;;  %vm8136_vm15 = vmmov 0  }
0x1273   : > { %v4572_v8 = vpop.xlane.xlu1 %4571  ;;  %v5015_v60 = vsel %vm4727_vm0, %v5014_v40, %v5010_v14  ;;  %v4476_v59 = vpop.xlane.xlu0 %4475  ;;  %6630 = vmatprep.subr.bf16.mxu1 %v8135_v25  ;;  %6638 = vmatprep.subr.bf16.mxu0 %v8135_v25  ;;  %vm5531_vm0 = vcmask 1040384  }
0x1274   : > { %v5323_v39 = vrot.slane %v4572_v8, %v9292_v9  ;;  %v5171_v54 = vrot.slane %v4476_v59, %v9292_v9  ;;  %v5020_v6 = vsel %vm4734_vm1, %v5019_v62, %v5015_v60  ;;  %6634 = vmatprep.mubr.msk.bf16.mxu1 %vm8136_vm15, %v8135_v25  ;;  %v6385_v62 = vld [vmem:[#allocation38] ss:$0 sm:$0xff] }
0x1275   : > { %v5345_v7 = vsel %vm5337_vm10, %v5020_v6, %v5344_v29 }
0x1276   : > { %v5324_v61 = vsel %vm4734_vm1, %v5323_v39, %v5319_v20  ;;  %v5172_v34 = vsel %vm4734_vm1, %v5171_v54, %v10313_v26  ;;  %v5365_v5 = vsel %vm4578_vm12, %v5345_v7, -1e+30  ;;  %v7003_v7 = vld [vmem:[#allocation40] sm:$0xff]  }
0x1277   : > { %v5359_v18 = vsel %vm5337_vm10, %v5324_v61, %v10321_v35  ;;  %v5371_v46 = vsel %vm1874_vm2, %v5365_v5, -inf  ;;  %v5352_v9 = vsel %vm5337_vm10, %v5172_v34, %v10233_v21  ;;  %v5482_v61 = vld [vmem:[#allocation29] sm:$0x3]  ;;  %v7004_v34 = vld [vmem:[#allocation40 + $0x8] sm:$0xff]  }
0x1278   : > { %5372 = vmax.xlane.f32.xlu1 %v5371_v46  ;;  %v5366_v45 = vsel %vm4579_vm13, %v5352_v9, -1e+30  ;;  %v5367_v38 = vsel %vm4580_vm14, %v5359_v18, -1e+30 }
0x1279   : > { %v5374_v43 = vsel %vm1874_vm2, %v5366_v45, -inf  ;;  %v5377_v23 = vsel %vm1874_vm2, %v5367_v38, -inf }
0x127a   : > { %5375 = vmax.xlane.f32.xlu0 %v5374_v43 }
0x127c   : > { %5378 = vmax.xlane.f32.xlu1 %v5377_v23 }
0x12fb   : > { %v5370_v3 = vpop.xlane.xlu0 %5369 }
0x12fc   : > { %v5380_v26 = vsub.f32 %v5364_v19, %v5370_v3 }
0x12fe   : > { %v5384_v11 = vmul.f32 1.442695, %v5380_v26 }
0x1300   : > { %7006 = vpow2.f32 %v5384_v11 }
0x1305   : > { %v5373_v28 = vpop.xlane.xlu1 %5372 }
0x1306   : > { %v5381_v35 = vsub.f32 %v5365_v5, %v5373_v28  ;;  %v5529_v5 = vrot.slane %v9277_v57, 7 }
0x1307   : > { %v5376_v22 = vpop.xlane.xlu0 %5375 }
0x1308   : > { %v5386_v50 = vmul.f32 1.442695, %v5381_v35  ;;  %v5382_v24 = vsub.f32 %v5366_v45, %v5376_v22  ;;  %v5532_v18 = vsel %vm5531_vm0, %v9273_v55, %v5529_v5  ;;  %v7005_v45 = vld [vmem:[#allocation43] sm:$0xff]  }
0x1309   : > { %v5379_v56 = vpop.xlane.xlu1 %5378  ;;  %v5533_v46 = vpack.c.bf16 %v5532_v18, %v5532_v18 }
0x130a   : > { %v7007_v21 = vpop.eup %7006  ;;  %7008 = vpow2.f32 %v5386_v50  ;;  %v5388_v37 = vmul.f32 1.442695, %v5382_v24  ;;  %v5383_v32 = vsub.f32 %v5367_v38, %v5379_v56 }
0x130b   : > { %v5392_v31 = vsel %vm1874_vm2, %v7007_v21, 0.0 }
0x130c   : > { %7010 = vpow2.f32 %v5388_v37  ;;  %v5390_v15 = vmul.f32 1.442695, %v5383_v32  ;;  %5393 = vadd.xlane.f32.xlu0 %v5392_v31  ;;  %v6396_v37 = vld [vmem:[#allocation44] ss:$0 sm:$0xff] }
0x130e   : > { %7012 = vpow2.f32 %v5390_v15 }
0x1314   : > { %v7009_v44 = vpop.eup %7008 }
0x1315   : > { %v5395_v33 = vsel %vm1874_vm2, %v7009_v44, 0.0 }
0x1316   : > { %v7011_v63 = vpop.eup %7010  ;;  %5396 = vadd.xlane.f32.xlu1 %v5395_v33 }
0x1317   : > { %v5398_v27 = vsel %vm1874_vm2, %v7011_v63, 0.0 }
0x1318   : > { %v7013_v42 = vpop.eup %7012  ;;  %5399 = vadd.xlane.f32.xlu0 %v5398_v27 }
0x1319   : > { %v5401_v13 = vsel %vm1874_vm2, %v7013_v42, 0.0 }
0x131a   : > { %5402 = vadd.xlane.f32.xlu1 %v5401_v13 }
0x1399   : > { %v5394_v49 = vpop.xlane.xlu0 %5393 }
0x139a   : > { %v5404_v10 = vmax.f32 %v5394_v49, 1e-20 }
0x139c   : > { %7014 = vrcp.f32 %v5404_v10 }
0x13a3   : > { %v5397_v29 = vpop.xlane.xlu1 %5396 }
0x13a4   : > { %v5405_v0 = vmax.f32 %v5397_v29, 1e-20 }
0x13a5   : > { %v5400_v30 = vpop.xlane.xlu0 %5399 }
0x13a6   : > { %7016 = vrcp.f32 %v5405_v0  ;;  %v5406_v17 = vmax.f32 %v5400_v30, 1e-20  ;;  %v7015_v48 = vpop.eup %7014 }
0x13a7   : > { %v5403_v41 = vpop.xlane.xlu1 %5402  ;;  %v5412_v19 = vmul.f32 %v7015_v48, %v7007_v21 }
0x13a8   : > { %7018 = vrcp.f32 %v5406_v17  ;;  %v5407_v16 = vmax.f32 %v5403_v41, 1e-20 }
0x13aa   : > { %7020 = vrcp.f32 %v5407_v16 }
0x13b0   : > { %v7017_v53 = vpop.eup %7016 }
0x13b1   : > { %v5413_v36 = vmul.f32 %v7017_v53, %v7009_v44 }
0x13b2   : > { %v7019_v58 = vpop.eup %7018 }
0x13b3   : > { %v5416_v47 = vpack.c.bf16 %v5413_v36, %v5412_v19  ;;  %v5414_v4 = vmul.f32 %v7019_v58, %v7011_v63 }
0x13b4   : > { %v7021_v1 = vpop.eup %7020 }
0x13b5   : > { %6626 = vmatprep.mubr.msk.bf16.mxu0 %vm1874_vm2, %v5416_v47  ;;  %v5415_v20 = vmul.f32 %v7021_v1, %v7013_v42 }
0x13b7   : > { %v5417_v12 = vpack.c.bf16 %v5415_v20, %v5414_v4 }
0x13b9   : > { %6627 = vmatmul.mubr.msk.bf16.vlgmr.msra.gmra.mrb[4].mxu0 %vm1874_vm2, %v5417_v12 }
0x13ba   : > { %6640 = vmatprep.mubr.msk.bf16.mxu0 %vm8136_vm15, %v8135_v25  ;;  %6639 = vmatpush3.bf16.msra.mxu0 %v7002_v2 }
0x13bb   : > { %6652 = vmatprep.subr.bf16.mxu0 %v8135_v25 }
0x148c   : > { %v6628_v40 = vpop.f32.mrb[4].mxu0 }
0x148d   : > { %v5467_v14 = vpop.f32.mrb[5].mxu0  ;;  %v5476_v51 = vadd.f32 %v6628_v40, %v6385_v62 }
0x148e   : > { %v6629_v8 = vpop.f32.mrb[6].mxu0  ;;  %v5468_v39 = vadd.f32 %v6385_v62, %v5467_v14 }
0x148f   : > { %v5479_v52 = vadd.f32 %v6629_v8, %v6385_v62  ;;  %v5470_v60 = vpop.f32.mrb[7].mxu0 }
0x1490   : > { %v5471_v59 = vadd.f32 %v6385_v62, %v5470_v60 }
0x1491   : > { %v5484_v54 = vpack.c.bf16 %v5479_v52, %v5476_v51 }
0x1492   : > { %v5483_v6 = vpack.c.bf16 %v5471_v59, %v5468_v39 }
0x1494   : > { %6631 = vmatpush3.bf16.msra.mxu1 %v5483_v6 }
0x1495   : > { %6632 = vmatprep.subr.bf16.mxu1 %v8135_v25 }
0x1498   : > { %6633 = vmatpush3.bf16.msra.mxu1 %v5484_v54 }
0x1499   : > { %6644 = vmatprep.subr.bf16.mxu1 %v8135_v25 }
0x149b   : > { %6635 = vmatmul.mubr.msk.bf16.vlgmr.msra.gmra.mrb[4].mxu1 %vm1874_vm2, %v5482_v61 }
0x149c   : > { %6645 = vmatpush3.bf16.msra.mxu1 %v7003_v7  ;;  %6648 = vmatprep.mubr.msk.bf16.mxu1 %vm8136_vm15, %v8135_v25 }
0x149d   : > { %6646 = vmatprep.subr.bf16.mxu1 %v8135_v25 }
0x14a0   : > { %6647 = vmatpush3.bf16.msra.mxu1 %v7004_v34 }
0x14a3   : > { %6649 = vmatmul.mubr.msk.bf16.vlgmr.msra.gmra.mrb[8].mxu1 %vm1874_vm2, %v5533_v46 }
0x156e   : > { %v5522_v9 = vpop.f32.mrb[4].mxu1 }
0x156f   : > { %v5538_v38 = vpack.c.bf16 %v5522_v9, %v5522_v9  ;;  %v6636_v43 = vpop.f32.mrb[5].mxu1 }
0x1570   : > { %v5525_v23 = vpop.f32.mrb[6].mxu1 }
0x1571   : > { %v6637_v3 = vpop.f32.mrb[7].mxu1  ;;  %6641 = vmatmul.mubr.msk.bf16.vlgmr.msra.gmra.mrb[8].mxu0 %vm2041_vm3, %v5538_v38  ;;  %v5648_v26 = vrot.slane %v5538_v38, 1 }
0x1572   : > { %6653 = vmatpush3.bf16.msra.mxu0 %v7005_v45  ;;  %6654 = vmatprep.mubr.msk.bf16.mxu0 %vm8136_vm15, %v8135_v25 }
0x1576   : > { %v5639_v57 = vpop.f32.mrb[8].mxu1 }
0x1577   : > { %v6650_v11 = vpop.f32.mrb[9].mxu1 }
0x1578   : > { %v5642_v55 = vpop.f32.mrb[10].mxu1 }
0x1579   : > { %6655 = vmatmul.mubr.msk.bf16.vlgmr.msra.gmra.mrb[12].mxu0 %vm2041_vm3, %v5648_v26  ;;  %v6651_v28 = vpop.f32.mrb[11].mxu1 }
0x1644   : > { %v5584_v35 = vpop.f32.mrb[8].mxu0 }
0x1645   : > { %v6642_v22 = vpop.f32.mrb[9].mxu0  ;;  %v5640_v50 = vadd.f32 %v5639_v57, %v5584_v35 }
0x1646   : > { %v5587_v24 = vpop.f32.mrb[10].mxu0 }
0x1647   : > { %v6643_v56 = vpop.f32.mrb[11].mxu0 }
0x164c   : > { %v5692_v21 = vpop.f32.mrb[12].mxu0 }
0x164d   : > { %v5698_v32 = vadd.f32 %v5692_v21, %v5640_v50  ;;  %v6656_v31 = vpop.f32.mrb[13].mxu0 }
0x164e   : > { %v5695_v15 = vpop.f32.mrb[14].mxu0 }
0x164f   : > { %v5706_v44 = vadd.f32 %v6396_v37, %v5698_v32  ;;  %v6657_v33 = vpop.f32.mrb[15].mxu0 }
0x1651   : > { %5707 = vst [vmem:[#allocation46] sm:$0x3] %v5706_v44 }
0x1652 PF: > { %s10604_s17 = sld [smem:[#allocation88_spill]]  ;;  %s8137_s16 = smov [#allocation46]  }
0x1653   : > { %s5715_s9 = sshll.u32 %s8137_s16, 4  ;;  %s5716_s9 = int_to_ptr.vmem [resolvable:$true] %s5715_s9 }
0x1654   : > { %s7948_s12 = scalar_lea.vmem %s5716_s9, 32  ;;  %p7955_p11 = scmp.lt.s32.totalorder %s5716_s9, %s5716_s9 }
0x1655   : > { %p7949_p3 = scmp.ne.s32.totalorder %s5716_s9, %s7948_s12  ;;  %p7956_p4 = scmp.lt.s32.totalorder %s7948_s12, %s7948_s12 }
0x1657   : > { %p7957_p13 = por %p7956_p4, %p7955_p11 }
0x1658   : > { %p6848_p10 = scmp.eq.s32.totalorder %s10604_s17, 1 }
0x165a   : > { %p7950_p2 = pnand %p7949_p3, %p6848_p10 }
0x165c   : > { %p7951_p7 = pneg %p7950_p2 }
0x165e   : > { %p7958_p12 = pnand %p7957_p13, %p7951_p7 }
0x1660   : > { %7961 = shalt.err (!%p7958_p12)
}
0x1661   : > { %s10605_s8 = sld [smem:[#allocation86_spill]] }
0x1667   : > { %s7962_s3 = scalar_lea.hbm %s10605_s8, 32 }
0x1668   : > { %p7963_p0 = scmp.ne.s32.totalorder %s10605_s8, %s7962_s3  ;;  %p7968_p8 = scmp.lt.u32.totalorder %s7962_s3, %s10605_s8 }
0x166a   : > { %p7964_p1 = pnand %p7963_p0, %p6848_p10 }
0x166c   : > { %p7965_p5 = pneg %p7964_p1 }
0x166e   : > { %p7970_p6 = pnand %p7968_p8, %p7965_p5 }
0x1670   : > { %7973 = shalt.err (!%p7970_p6)
}
0x1671   : > { %6759 = dma.vmem_to_hbm [thread:$0]  (%p6848_p10), %s5716_s9, 32, %s10605_s8, [#allocation5]  }
0x1672   : > { %8039 = dma.done.wait (%p6848_p10), [#allocation5], 32  }
0x1673   : > { %8041 = vsyncadd (%p6848_p10), [#allocation5], 4294967264 }
0x1674 PF: > { %s10606_s15 = sld [smem:[#allocation89_spill]]  ;;  %s10607_s7 = sld [smem:[#allocation87_spill]] }
0x1675   : > { %s10608_s5 = sld [smem:[#allocation90_spill]]  ;;  %s10609_s10 = smov %s8052_s11 }
0x167a   : > { %p84_p9 = scmp.ge.s32.totalorder %s10606_s15, 4  }
0x167b   : > { %s10610_s11 = smov %s10608_s5 }
0x167c   :  { %86 = sbr.rel (!%p84_p9) target bundleno = 75 (0x4b), region = 462 }
0x1683   :  { %5728 = vsyncpa [#allocation4], 1 }
0x1684   :  { %5730 = vsyncpa [#allocation4 + $0x1], 1 }
0x1685   :  { %5731 = vsyncpa [#allocation7], 1 }
0x1686   :  { %5732 = vsyncpa [#allocation10], 1 }
0x1687   :  { %5733 = vsyncpa [#allocation30], 1 }
0x1688   :  { %5734 = vsyncpa [#allocation33], 1 }
0x1689   :  { %5735 = vsyncpa [#allocation36], 1 }
0x168a   :  { %5736 = vsyncpa [#allocation39], 1 }
0x168b   :  { %5737 = vsyncpa [#allocation42], 1 }
0x168c   :  { %5738 = vsyncpa [#allocation45], 1 }
0x168d   :  { %5739 = vsyncpa [#allocation5], 1 }
0x168e   :  { %5741 = vsyncpa [#allocation5 + $0x1], 1 }

</bundles_post_ra>
